<compile_context>
chip_gen: v6e
topology: v6e:2x2x1
jax: 0.10.0
libtpu: 0.0.40
codegen_flags: <defaults>
</compile_context>

<pallas_src>
import functools
import math

import jax
import jax.numpy as jnp
from jax.experimental import pallas as pl
from jax.experimental.pallas import tpu as pltpu  # noqa: F401  (not required for this grid-less kernel)


# ----------------------------------------------------------------------------
# In-kernel MAB core: already-projected Q and K|V, batch folded into rows
# ----------------------------------------------------------------------------
def _mab_core(Qf, KVf, wo, bo, *, B, H, dh, q_shared, scale):
    """One MAB given projected queries / keys / values.

    Qf : (Nq, dV) f32 if q_shared (same queries for every batch element, hoisted)
         else (B*Nq, dV) f32                 -- fc_q(Q) + bias
    KVf: (B*Nk, 2*dV) f32                    -- [fc_k(K) | fc_v(K)] + bias
    wo : (dV, dV) bf16, bo: (1, dV) f32
    returns (B*Nq, dV) f32
    """
    f32 = jnp.float32
    bf16 = jnp.bfloat16
    dV = H * dh
    Nk = KVf.shape[0] // B
    Nq = Qf.shape[0] if q_shared else Qf.shape[0] // B

    # Head split = static lane slices + leading-axis concat (cheap XLU relayout).
    K3 = KVf[:, 0:dV].reshape(B, Nk, dV)
    V3 = KVf[:, dV:2 * dV].reshape(B, Nk, dV)
    Kh = jnp.concatenate([K3[:, :, h * dh:(h + 1) * dh] for h in range(H)], 0).astype(bf16)
    Vh = jnp.concatenate([V3[:, :, h * dh:(h + 1) * dh] for h in range(H)], 0).astype(bf16)

    Q3 = Qf.reshape(1, Nq, dV) if q_shared else Qf.reshape(B, Nq, dV)
    if q_shared:                               # hoisted queries are shared across the batch
        Q3 = jnp.broadcast_to(Q3, (B, Nq, dV))
    Qh = jnp.concatenate([Q3[:, :, h * dh:(h + 1) * dh] for h in range(H)], 0)  # (H*B, Nq, dh) f32
    Qh16 = Qh.astype(bf16)

    # Attention, batched over the (head, batch) leading axis; f32 softmax statistics.
    S = jnp.einsum('xqd,xkd->xqk', Qh16, Kh, preferred_element_type=f32) * scale
    S = S - jnp.max(S, axis=-1, keepdims=True)
    P = jnp.exp(S)
    A = P / jnp.sum(P, axis=-1, keepdims=True)
    Oh = Qh + jnp.einsum('xqk,xkd->xqd', A.astype(bf16), Vh, preferred_element_type=f32)

    # Un-head with an f32 lane concat (residual stream stays f32) + rFF.
    C = jnp.concatenate([Oh[h * B:(h + 1) * B] for h in range(H)], axis=-1)     # (B, Nq, dV)
    C = C.reshape(B * Nq, dV)
    Z = jnp.dot(C.astype(bf16), wo, preferred_element_type=f32) + bo
    return C + jnp.maximum(Z, 0.0)


# ----------------------------------------------------------------------------
# Fused whole-model kernel (single launch, no grid, everything in VMEM)
# ----------------------------------------------------------------------------
def _modelnet_kernel(x_ref, wb_ref, fb_ref, o_ref, *,
                     B, H, dh, num_inds, num_seeds, dim_output, wofs, fofs):
    f32 = jnp.float32
    bf16 = jnp.bfloat16
    dV = H * dh
    scale = 1.0 / math.sqrt(dV)        # set-transformer scales by sqrt(dim_V), not sqrt(d_head)
    mab = functools.partial(_mab_core, B=B, H=H, dh=dh, scale=scale)

    def w(name, rows, cols):           # static slice of the packed bf16 weight slab
        r = wofs[name]
        return wb_ref[r:r + rows, 0:cols]

    def fv(name, rows, cols):          # static slice of the packed f32 bias/constant slab
        r = fofs[name]
        return fb_ref[r:r + rows, 0:cols]

    X16 = x_ref[...]                   # (B*N, d_in_pad) bf16, batch folded into rows

    # ---------------- enc: ISAB 0 ----------------
    # X feeds mab0's K/V and mab1's Q: one fused (B*N, d_in)@(d_in, 3*dV) matmul.
    PX = jnp.dot(X16, w("x_kvq", x_ref.shape[1], 3 * dV),
                 preferred_element_type=f32) + fv("b_x_kvq", 1, 3 * dV)
    H0 = mab(fv("q_i0", num_inds, dV), PX[:, 0:2 * dV],
             w("wo1", dV, dV), fv("bo1", 1, dV), q_shared=True)        # (B*num_inds, dV)
    KV2 = jnp.dot(H0.astype(bf16), w("wkv2", dV, 2 * dV),
                  preferred_element_type=f32) + fv("bkv2", 1, 2 * dV)
    Y0 = mab(PX[:, 2 * dV:3 * dV], KV2,
             w("wo2", dV, dV), fv("bo2", 1, dV), q_shared=False)       # (B*N, dV)

    # ---------------- enc: ISAB 1 ----------------
    PY = jnp.dot(Y0.astype(bf16), w("y_kvq", dV, 3 * dV),
                 preferred_element_type=f32) + fv("b_y_kvq", 1, 3 * dV)
    H1 = mab(fv("q_i1", num_inds, dV), PY[:, 0:2 * dV],
             w("wo3", dV, dV), fv("bo3", 1, dV), q_shared=True)
    KV4 = jnp.dot(H1.astype(bf16), w("wkv4", dV, 2 * dV),
                  preferred_element_type=f32) + fv("bkv4", 1, 2 * dV)
    Y1 = mab(PY[:, 2 * dV:3 * dV], KV4,
             w("wo4", dV, dV), fv("bo4", 1, dV), q_shared=False)

    # ------- dec: Dropout(eval)=id -> PMA -> Dropout(eval)=id -> Linear -------
    KV5 = jnp.dot(Y1.astype(bf16), w("wkv5", dV, 2 * dV),
                  preferred_element_type=f32) + fv("bkv5", 1, 2 * dV)
    Pm = mab(fv("q_s", num_seeds, dV), KV5,
             w("wo5", dV, dV), fv("bo5", 1, dV), q_shared=True)        # (B*num_seeds, dV)
    out = jnp.dot(Pm.astype(bf16), w("fcw", dV, dim_output),
                  preferred_element_type=f32) + fv("fcb", 1, dim_output)
    o_ref[...] = out


# ----------------------------------------------------------------------------
# Wrapper: pack all params into 2 blobs, hoist constant-Q projections, call kernel
# ----------------------------------------------------------------------------
def _pack_blocks(named_blocks, *, width, out_dtype, align):
    """Stack 2-D blocks row-wise into one (rows, width) slab; return slab + row offsets."""
    offs, r = {}, 0
    for name, a in named_blocks:
        al = align if a.shape[0] > 1 else 1
        r = -(-r // al) * al
        offs[name] = r
        r += a.shape[0]
    total = -(-r // align) * align
    buf = jnp.zeros((total, width), jnp.float32)
    for name, a in named_blocks:
        buf = buf.at[offs[name]:offs[name] + a.shape[0], 0:a.shape[1]].set(a.astype(jnp.float32))
    return buf.astype(out_dtype), offs


def _prepare_operands(params, d_in_pad):
    def mabd(m):
        wq, bq, wk, bk, wv, bv, wo, bo = m
        return dict(wq=wq, bq=bq,
                    wkv=jnp.concatenate([wk, wv], 1), bkv=jnp.concatenate([bk, bv], 1),
                    wo=wo, bo=bo)

    p1 = mabd(params["isab0"]["mab0"]); p2 = mabd(params["isab0"]["mab1"])
    p3 = mabd(params["isab1"]["mab0"]); p4 = mabd(params["isab1"]["mab1"])
    p5 = mabd(params["pma"]["mab"])
    I0 = params["isab0"]["I"][0]; I1 = params["isab1"]["I"][0]; Sd = params["pma"]["S"][0]
    fcw, fcb = params["fc_out"]
    dV = p1["wo"].shape[0]

    # OPT: hoist the batch-independent query projections (I0, I1, S are constants).
    q_i0 = I0 @ p1["wq"] + p1["bq"]      # (num_inds, dV) f32
    q_i1 = I1 @ p3["wq"] + p3["bq"]
    q_s = Sd @ p5["wq"] + p5["bq"]       # (num_seeds, dV) f32

    # bf16 weight slab: fused [Wk|Wv|Wq_next] blocks for shared inputs, then Wo's and fc_out.
    x_kvq = jnp.pad(jnp.concatenate([p1["wkv"], p2["wq"]], 1),
                    ((0, d_in_pad - p1["wkv"].shape[0]), (0, 0)))
    y_kvq = jnp.concatenate([p3["wkv"], p4["wq"]], 1)
    wb, wofs = _pack_blocks(
        [("x_kvq", x_kvq), ("y_kvq", y_kvq),
         ("wkv2", p2["wkv"]), ("wkv4", p4["wkv"]), ("wkv5", p5["wkv"]),
         ("wo1", p1["wo"]), ("wo2", p2["wo"]), ("wo3", p3["wo"]),
         ("wo4", p4["wo"]), ("wo5", p5["wo"]), ("fcw", fcw)],
        width=128, out_dtype=jnp.bfloat16, align=16)

    # f32 slab: fused bias rows + hoisted constant query projections.
    fb, fofs = _pack_blocks(
        [("b_x_kvq", jnp.concatenate([p1["bkv"], p2["bq"]], 1)),
         ("b_y_kvq", jnp.concatenate([p3["bkv"], p4["bq"]], 1)),
         ("bkv2", p2["bkv"]), ("bkv4", p4["bkv"]), ("bkv5", p5["bkv"]),
         ("bo1", p1["bo"]), ("bo2", p2["bo"]), ("bo3", p3["bo"]),
         ("bo4", p4["bo"]), ("bo5", p5["bo"]), ("fcb", fcb),
         ("q_i0", q_i0), ("q_i1", q_i1), ("q_s", q_s)],
        width=128, out_dtype=jnp.float32, align=8)
    return wb, wofs, fb, fofs, dV


@functools.partial(jax.jit, static_argnames=("num_heads",))
def modelnet_forward(params, X, *, num_heads):
    """X: (B, N, dim_input) -> squeeze of (B, num_outputs, dim_output)."""
    B, N, d_in = X.shape
    d_in_pad = -(-d_in // 8) * 8
    num_inds = params["isab0"]["I"].shape[1]
    num_seeds = params["pma"]["S"].shape[1]
    dim_hidden = params["pma"]["S"].shape[2]
    dim_output = params["fc_out"][0].shape[1]
    dh = dim_hidden // num_heads

    wb, wofs, fb, fofs, dV = _prepare_operands(params, d_in_pad)
    assert dV == dim_hidden

    # Batch folded into matmul rows; input pre-cast to bf16 and zero-padded to 8 feature lanes.
    Xp = jnp.pad(X.reshape(B * N, d_in), ((0, 0), (0, d_in_pad - d_in))).astype(jnp.bfloat16)

    kernel = functools.partial(
        _modelnet_kernel, B=B, H=num_heads, dh=dh, num_inds=num_inds,
        num_seeds=num_seeds, dim_output=dim_output, wofs=wofs, fofs=fofs)
    out = pl.pallas_call(
        kernel,
        out_shape=jax.ShapeDtypeStruct((B * num_seeds, dim_output), jnp.float32),
        # Single grid-less invocation: X + the two packed parameter slabs (~110 KiB total)
        # are fully VMEM-resident -> 3 input DMAs instead of ~36 tiny per-tensor DMAs.
    )(Xp, wb, fb)
    return jnp.squeeze(out.reshape(B, num_seeds, dim_output))   # matches torch `.squeeze()`


# ----------------------------------------------------------------------------
# Parameter init (deterministic, xavier-uniform style, torch-like layout)
# ----------------------------------------------------------------------------
def init_linear_params(key, din, dout):
    k1, k2 = jax.random.split(key)
    lim_w = math.sqrt(6.0 / (din + dout))
    lim_b = 1.0 / math.sqrt(din)
    w = jax.random.uniform(k1, (din, dout), jnp.float32, -lim_w, lim_w)
    b = jax.random.uniform(k2, (1, dout), jnp.float32, -lim_b, lim_b)
    return w, b


def init_mab_params(key, dim_Q, dim_K, dim_V):
    kq, kk, kv, ko = jax.random.split(key, 4)
    return (*init_linear_params(kq, dim_Q, dim_V),
            *init_linear_params(kk, dim_K, dim_V),
            *init_linear_params(kv, dim_K, dim_V),
            *init_linear_params(ko, dim_V, dim_V))


def init_isab_params(key, dim_in, dim_out, num_inds):
    k1, k2, k3 = jax.random.split(key, 3)
    lim = math.sqrt(6.0 / (num_inds + dim_out))
    I = jax.random.uniform(k1, (1, num_inds, dim_out), jnp.float32, -lim, lim)
    return dict(I=I,
                mab0=init_mab_params(k2, dim_out, dim_in, dim_out),
                mab1=init_mab_params(k3, dim_in, dim_out, dim_out))


def init_pma_params(key, dim, num_seeds):
    k1, k2 = jax.random.split(key)
    lim = math.sqrt(6.0 / (num_seeds + dim))
    S = jax.random.uniform(k1, (1, num_seeds, dim), jnp.float32, -lim, lim)
    return dict(S=S, mab=init_mab_params(k2, dim, dim, dim))


def init_modelnet_params(key, dim_input, dim_hidden, dim_output, num_inds, num_outputs):
    k0, k1, k2, k3 = jax.random.split(key, 4)
    return dict(
        isab0=init_isab_params(k0, dim_input, dim_hidden, num_inds),
        isab1=init_isab_params(k1, dim_hidden, dim_hidden, num_inds),
        pma=init_pma_params(k2, dim_hidden, num_outputs),
        fc_out=init_linear_params(k3, dim_hidden, dim_output),
    )


# ----------------------------------------------------------------------------
# Main
# ----------------------------------------------------------------------------
if __name__ == "__main__":
    # Small, module-consistent shapes.
    B, N = 2, 8                  # batch of sets, 8 points per set
    dim_input = 3                # xyz points (ModelNet default)
    dim_hidden = 32
    num_heads = 4
    num_inds = 8
    num_outputs = 1
    dim_output = 16

    key = jax.random.PRNGKey(0)
    k_params, k_x = jax.random.split(key)
    params = init_modelnet_params(k_params, dim_input, dim_hidden, dim_output,
                                  num_inds, num_outputs)
    X = jax.random.normal(k_x, (B, N, dim_input), jnp.float32)

    out = modelnet_forward(params, X, num_heads=num_heads)
    out = jax.block_until_ready(out)
    assert out.shape == (B, dim_output), out.shape
    assert bool(jnp.all(jnp.isfinite(out))), "non-finite output"
    print("KERNEL_OK")
</pallas_src>

<mosaic_0001>
module attributes {stable_mosaic.version = 11 : i64} {
  func.func @_modelnet_kernel(%arg0: memref<16x8xbf16, #tpu.memory_space<vmem>>, %arg1: memref<336x128xbf16, #tpu.memory_space<vmem>>, %arg2: memref<40x128xf32, #tpu.memory_space<vmem>>, %arg3: memref<2x16xf32, #tpu.memory_space<vmem>>) attributes {dimension_semantics = [], scalar_prefetch = 0 : i64, scratch_operands = 0 : i64, tpu.core_type = #tpu.core_type<tc>} {
    %c0 = arith.constant 0 : index
    %c0_0 = arith.constant 0 : index
    %0 = vector.load %arg0[%c0, %c0_0] : memref<16x8xbf16, #tpu.memory_space<vmem>>, vector<16x8xbf16>
    %c0_1 = arith.constant 0 : index
    %c0_2 = arith.constant 0 : index
    %1 = vector.load %arg1[%c0_1, %c0_2] : memref<336x128xbf16, #tpu.memory_space<vmem>>, vector<8x96xbf16>
    %cst = arith.constant dense<0.000000e+00> : vector<16x96xf32>
    %2 = tpu.matmul %0, %1, %cst {dimension_numbers = #tpu.dot_dimension_numbers<[1], [0], [0], [1], [0, 0, 1, 1], [], []>} : vector<16x8xbf16>, vector<8x96xbf16>, vector<16x96xf32> -> vector<16x96xf32>
    %c0_3 = arith.constant 0 : index
    %c0_4 = arith.constant 0 : index
    %3 = vector.load %arg2[%c0_3, %c0_4] : memref<40x128xf32, #tpu.memory_space<vmem>>, vector<1x96xf32>
    %4 = vector.broadcast %3 : vector<1x96xf32> to vector<16x96xf32>
    %5 = arith.addf %2, %4 : vector<16x96xf32>
    %c16 = arith.constant 16 : index
    %c0_5 = arith.constant 0 : index
    %6 = vector.load %arg2[%c16, %c0_5] : memref<40x128xf32, #tpu.memory_space<vmem>>, vector<8x32xf32>
    %7 = vector.extract_strided_slice %5 {offsets = [0, 0], sizes = [16, 64], strides = [1, 1]} : vector<16x96xf32> to vector<16x64xf32>
    %c144 = arith.constant 144 : index
    %c0_6 = arith.constant 0 : index
    %8 = vector.load %arg1[%c144, %c0_6] : memref<336x128xbf16, #tpu.memory_space<vmem>>, vector<32x32xbf16>
    %c5 = arith.constant 5 : index
    %c0_7 = arith.constant 0 : index
    %9 = vector.load %arg2[%c5, %c0_7] : memref<40x128xf32, #tpu.memory_space<vmem>>, vector<1x32xf32>
    %10 = vector.extract_strided_slice %7 {offsets = [0, 0], sizes = [16, 32], strides = [1, 1]} : vector<16x64xf32> to vector<16x32xf32>
    %11 = vector.shape_cast %10 : vector<16x32xf32> to vector<2x8x32xf32>
    %12 = vector.extract_strided_slice %7 {offsets = [0, 32], sizes = [16, 32], strides = [1, 1]} : vector<16x64xf32> to vector<16x32xf32>
    %13 = vector.shape_cast %12 : vector<16x32xf32> to vector<2x8x32xf32>
    %14 = vector.extract_strided_slice %11 {offsets = [0, 0, 0], sizes = [2, 8, 8], strides = [1, 1, 1]} : vector<2x8x32xf32> to vector<2x8x8xf32>
    %15 = vector.extract_strided_slice %11 {offsets = [0, 0, 8], sizes = [2, 8, 8], strides = [1, 1, 1]} : vector<2x8x32xf32> to vector<2x8x8xf32>
    %16 = vector.extract_strided_slice %11 {offsets = [0, 0, 16], sizes = [2, 8, 8], strides = [1, 1, 1]} : vector<2x8x32xf32> to vector<2x8x8xf32>
    %17 = vector.extract_strided_slice %11 {offsets = [0, 0, 24], sizes = [2, 8, 8], strides = [1, 1, 1]} : vector<2x8x32xf32> to vector<2x8x8xf32>
    %18 = tpu.concatenate %14, %15, %16, %17 in 0 : vector<2x8x8xf32>, vector<2x8x8xf32>, vector<2x8x8xf32>, vector<2x8x8xf32> -> vector<8x8x8xf32>
    %19 = arith.truncf %18 : vector<8x8x8xf32> to vector<8x8x8xbf16>
    %20 = vector.extract_strided_slice %13 {offsets = [0, 0, 0], sizes = [2, 8, 8], strides = [1, 1, 1]} : vector<2x8x32xf32> to vector<2x8x8xf32>
    %21 = vector.extract_strided_slice %13 {offsets = [0, 0, 8], sizes = [2, 8, 8], strides = [1, 1, 1]} : vector<2x8x32xf32> to vector<2x8x8xf32>
    %22 = vector.extract_strided_slice %13 {offsets = [0, 0, 16], sizes = [2, 8, 8], strides = [1, 1, 1]} : vector<2x8x32xf32> to vector<2x8x8xf32>
    %23 = vector.extract_strided_slice %13 {offsets = [0, 0, 24], sizes = [2, 8, 8], strides = [1, 1, 1]} : vector<2x8x32xf32> to vector<2x8x8xf32>
    %24 = tpu.concatenate %20, %21, %22, %23 in 0 : vector<2x8x8xf32>, vector<2x8x8xf32>, vector<2x8x8xf32>, vector<2x8x8xf32> -> vector<8x8x8xf32>
    %25 = arith.truncf %24 : vector<8x8x8xf32> to vector<8x8x8xbf16>
    %26 = vector.shape_cast %6 : vector<8x32xf32> to vector<1x8x32xf32>
    %27 = vector.shape_cast %26 : vector<1x8x32xf32> to vector<1x8x32xf32>
    %28 = vector.broadcast %27 : vector<1x8x32xf32> to vector<2x8x32xf32>
    %29 = vector.extract_strided_slice %28 {offsets = [0, 0, 0], sizes = [2, 8, 8], strides = [1, 1, 1]} : vector<2x8x32xf32> to vector<2x8x8xf32>
    %30 = vector.extract_strided_slice %28 {offsets = [0, 0, 8], sizes = [2, 8, 8], strides = [1, 1, 1]} : vector<2x8x32xf32> to vector<2x8x8xf32>
    %31 = vector.extract_strided_slice %28 {offsets = [0, 0, 16], sizes = [2, 8, 8], strides = [1, 1, 1]} : vector<2x8x32xf32> to vector<2x8x8xf32>
    %32 = vector.extract_strided_slice %28 {offsets = [0, 0, 24], sizes = [2, 8, 8], strides = [1, 1, 1]} : vector<2x8x32xf32> to vector<2x8x8xf32>
    %33 = tpu.concatenate %29, %30, %31, %32 in 0 : vector<2x8x8xf32>, vector<2x8x8xf32>, vector<2x8x8xf32>, vector<2x8x8xf32> -> vector<8x8x8xf32>
    %34 = arith.truncf %33 : vector<8x8x8xf32> to vector<8x8x8xbf16>
    "tpu.trace_start"() <{level = 10 : i32, message = "xqd,xkd->xqk"}> : () -> ()
    %cst_8 = arith.constant dense<0.000000e+00> : vector<8x8x8xf32>
    %35 = tpu.matmul %34, %19, %cst_8 {dimension_numbers = #tpu.dot_dimension_numbers<[2], [2], [1], [1], [0, 0, 0, 1, 1, 1], [0], [0]>} : vector<8x8x8xbf16>, vector<8x8x8xbf16>, vector<8x8x8xf32> -> vector<8x8x8xf32>
    "tpu.trace_stop"() : () -> ()
    %cst_9 = arith.constant 0.176776692 : f32
    %36 = vector.broadcast %cst_9 : f32 to vector<8x8x8xf32>
    %37 = arith.mulf %35, %36 : vector<8x8x8xf32>
    %cst_10 = arith.constant dense<0xFF800000> : vector<8x8xf32>
    %38 = vector.multi_reduction <maximumf>, %37, %cst_10 [2] : vector<8x8x8xf32> to vector<8x8xf32>
    %39 = vector.shape_cast %38 : vector<8x8xf32> to vector<8x8x1xf32>
    %40 = vector.broadcast %39 : vector<8x8x1xf32> to vector<8x8x8xf32>
    %41 = arith.subf %37, %40 : vector<8x8x8xf32>
    %42 = math.exp %41 : vector<8x8x8xf32>
    %cst_11 = arith.constant dense<0.000000e+00> : vector<8x8xf32>
    %43 = vector.multi_reduction <add>, %42, %cst_11 [2] : vector<8x8x8xf32> to vector<8x8xf32>
    %44 = vector.shape_cast %43 : vector<8x8xf32> to vector<8x8x1xf32>
    %45 = vector.broadcast %44 : vector<8x8x1xf32> to vector<8x8x8xf32>
    %46 = arith.divf %42, %45 : vector<8x8x8xf32>
    %47 = arith.truncf %46 : vector<8x8x8xf32> to vector<8x8x8xbf16>
    "tpu.trace_start"() <{level = 10 : i32, message = "xqk,xkd->xqd"}> : () -> ()
    %cst_12 = arith.constant dense<0.000000e+00> : vector<8x8x8xf32>
    %48 = tpu.matmul %47, %25, %cst_12 {dimension_numbers = #tpu.dot_dimension_numbers<[2], [1], [1], [2], [0, 0, 0, 1, 1, 2], [0], [0]>} : vector<8x8x8xbf16>, vector<8x8x8xbf16>, vector<8x8x8xf32> -> vector<8x8x8xf32>
    "tpu.trace_stop"() : () -> ()
    %49 = arith.addf %33, %48 : vector<8x8x8xf32>
    %50 = vector.extract_strided_slice %49 {offsets = [0, 0, 0], sizes = [2, 8, 8], strides = [1, 1, 1]} : vector<8x8x8xf32> to vector<2x8x8xf32>
    %51 = vector.extract_strided_slice %49 {offsets = [2, 0, 0], sizes = [2, 8, 8], strides = [1, 1, 1]} : vector<8x8x8xf32> to vector<2x8x8xf32>
    %52 = vector.extract_strided_slice %49 {offsets = [4, 0, 0], sizes = [2, 8, 8], strides = [1, 1, 1]} : vector<8x8x8xf32> to vector<2x8x8xf32>
    %53 = vector.extract_strided_slice %49 {offsets = [6, 0, 0], sizes = [2, 8, 8], strides = [1, 1, 1]} : vector<8x8x8xf32> to vector<2x8x8xf32>
    %54 = tpu.concatenate %50, %51, %52, %53 in 2 : vector<2x8x8xf32>, vector<2x8x8xf32>, vector<2x8x8xf32>, vector<2x8x8xf32> -> vector<2x8x32xf32>
    %55 = vector.shape_cast %54 : vector<2x8x32xf32> to vector<16x32xf32>
    %56 = arith.truncf %55 : vector<16x32xf32> to vector<16x32xbf16>
    %cst_13 = arith.constant dense<0.000000e+00> : vector<16x32xf32>
    %57 = tpu.matmul %56, %8, %cst_13 {dimension_numbers = #tpu.dot_dimension_numbers<[1], [0], [0], [1], [0, 0, 1, 1], [], []>} : vector<16x32xbf16>, vector<32x32xbf16>, vector<16x32xf32> -> vector<16x32xf32>
    %58 = vector.broadcast %9 : vector<1x32xf32> to vector<16x32xf32>
    %59 = arith.addf %57, %58 : vector<16x32xf32>
    %cst_14 = arith.constant 0.000000e+00 : f32
    %60 = vector.broadcast %cst_14 : f32 to vector<16x32xf32>
    %61 = arith.maximumf %59, %60 : vector<16x32xf32>
    %62 = arith.addf %55, %61 : vector<16x32xf32>
    %63 = arith.truncf %62 : vector<16x32xf32> to vector<16x32xbf16>
    %c48 = arith.constant 48 : index
    %c0_15 = arith.constant 0 : index
    %64 = vector.load %arg1[%c48, %c0_15] : memref<336x128xbf16, #tpu.memory_space<vmem>>, vector<32x64xbf16>
    %cst_16 = arith.constant dense<0.000000e+00> : vector<16x64xf32>
    %65 = tpu.matmul %63, %64, %cst_16 {dimension_numbers = #tpu.dot_dimension_numbers<[1], [0], [0], [1], [0, 0, 1, 1], [], []>} : vector<16x32xbf16>, vector<32x64xbf16>, vector<16x64xf32> -> vector<16x64xf32>
    %c2 = arith.constant 2 : index
    %c0_17 = arith.constant 0 : index
    %66 = vector.load %arg2[%c2, %c0_17] : memref<40x128xf32, #tpu.memory_space<vmem>>, vector<1x64xf32>
    %67 = vector.broadcast %66 : vector<1x64xf32> to vector<16x64xf32>
    %68 = arith.addf %65, %67 : vector<16x64xf32>
    %69 = vector.extract_strided_slice %5 {offsets = [0, 64], sizes = [16, 32], strides = [1, 1]} : vector<16x96xf32> to vector<16x32xf32>
    %c176 = arith.constant 176 : index
    %c0_18 = arith.constant 0 : index
    %70 = vector.load %arg1[%c176, %c0_18] : memref<336x128xbf16, #tpu.memory_space<vmem>>, vector<32x32xbf16>
    %c6 = arith.constant 6 : index
    %c0_19 = arith.constant 0 : index
    %71 = vector.load %arg2[%c6, %c0_19] : memref<40x128xf32, #tpu.memory_space<vmem>>, vector<1x32xf32>
    %72 = vector.extract_strided_slice %68 {offsets = [0, 0], sizes = [16, 32], strides = [1, 1]} : vector<16x64xf32> to vector<16x32xf32>
    %73 = vector.shape_cast %72 : vector<16x32xf32> to vector<2x8x32xf32>
    %74 = vector.extract_strided_slice %68 {offsets = [0, 32], sizes = [16, 32], strides = [1, 1]} : vector<16x64xf32> to vector<16x32xf32>
    %75 = vector.shape_cast %74 : vector<16x32xf32> to vector<2x8x32xf32>
    %76 = vector.extract_strided_slice %73 {offsets = [0, 0, 0], sizes = [2, 8, 8], strides = [1, 1, 1]} : vector<2x8x32xf32> to vector<2x8x8xf32>
    %77 = vector.extract_strided_slice %73 {offsets = [0, 0, 8], sizes = [2, 8, 8], strides = [1, 1, 1]} : vector<2x8x32xf32> to vector<2x8x8xf32>
    %78 = vector.extract_strided_slice %73 {offsets = [0, 0, 16], sizes = [2, 8, 8], strides = [1, 1, 1]} : vector<2x8x32xf32> to vector<2x8x8xf32>
    %79 = vector.extract_strided_slice %73 {offsets = [0, 0, 24], sizes = [2, 8, 8], strides = [1, 1, 1]} : vector<2x8x32xf32> to vector<2x8x8xf32>
    %80 = tpu.concatenate %76, %77, %78, %79 in 0 : vector<2x8x8xf32>, vector<2x8x8xf32>, vector<2x8x8xf32>, vector<2x8x8xf32> -> vector<8x8x8xf32>
    %81 = arith.truncf %80 : vector<8x8x8xf32> to vector<8x8x8xbf16>
    %82 = vector.extract_strided_slice %75 {offsets = [0, 0, 0], sizes = [2, 8, 8], strides = [1, 1, 1]} : vector<2x8x32xf32> to vector<2x8x8xf32>
    %83 = vector.extract_strided_slice %75 {offsets = [0, 0, 8], sizes = [2, 8, 8], strides = [1, 1, 1]} : vector<2x8x32xf32> to vector<2x8x8xf32>
    %84 = vector.extract_strided_slice %75 {offsets = [0, 0, 16], sizes = [2, 8, 8], strides = [1, 1, 1]} : vector<2x8x32xf32> to vector<2x8x8xf32>
    %85 = vector.extract_strided_slice %75 {offsets = [0, 0, 24], sizes = [2, 8, 8], strides = [1, 1, 1]} : vector<2x8x32xf32> to vector<2x8x8xf32>
    %86 = tpu.concatenate %82, %83, %84, %85 in 0 : vector<2x8x8xf32>, vector<2x8x8xf32>, vector<2x8x8xf32>, vector<2x8x8xf32> -> vector<8x8x8xf32>
    %87 = arith.truncf %86 : vector<8x8x8xf32> to vector<8x8x8xbf16>
    %88 = vector.shape_cast %69 : vector<16x32xf32> to vector<2x8x32xf32>
    %89 = vector.extract_strided_slice %88 {offsets = [0, 0, 0], sizes = [2, 8, 8], strides = [1, 1, 1]} : vector<2x8x32xf32> to vector<2x8x8xf32>
    %90 = vector.extract_strided_slice %88 {offsets = [0, 0, 8], sizes = [2, 8, 8], strides = [1, 1, 1]} : vector<2x8x32xf32> to vector<2x8x8xf32>
    %91 = vector.extract_strided_slice %88 {offsets = [0, 0, 16], sizes = [2, 8, 8], strides = [1, 1, 1]} : vector<2x8x32xf32> to vector<2x8x8xf32>
    %92 = vector.extract_strided_slice %88 {offsets = [0, 0, 24], sizes = [2, 8, 8], strides = [1, 1, 1]} : vector<2x8x32xf32> to vector<2x8x8xf32>
    %93 = tpu.concatenate %89, %90, %91, %92 in 0 : vector<2x8x8xf32>, vector<2x8x8xf32>, vector<2x8x8xf32>, vector<2x8x8xf32> -> vector<8x8x8xf32>
    %94 = arith.truncf %93 : vector<8x8x8xf32> to vector<8x8x8xbf16>
    "tpu.trace_start"() <{level = 10 : i32, message = "xqd,xkd->xqk"}> : () -> ()
    %cst_20 = arith.constant dense<0.000000e+00> : vector<8x8x8xf32>
    %95 = tpu.matmul %94, %81, %cst_20 {dimension_numbers = #tpu.dot_dimension_numbers<[2], [2], [1], [1], [0, 0, 0, 1, 1, 1], [0], [0]>} : vector<8x8x8xbf16>, vector<8x8x8xbf16>, vector<8x8x8xf32> -> vector<8x8x8xf32>
    "tpu.trace_stop"() : () -> ()
    %cst_21 = arith.constant 0.176776692 : f32
    %96 = vector.broadcast %cst_21 : f32 to vector<8x8x8xf32>
    %97 = arith.mulf %95, %96 : vector<8x8x8xf32>
    %cst_22 = arith.constant dense<0xFF800000> : vector<8x8xf32>
    %98 = vector.multi_reduction <maximumf>, %97, %cst_22 [2] : vector<8x8x8xf32> to vector<8x8xf32>
    %99 = vector.shape_cast %98 : vector<8x8xf32> to vector<8x8x1xf32>
    %100 = vector.broadcast %99 : vector<8x8x1xf32> to vector<8x8x8xf32>
    %101 = arith.subf %97, %100 : vector<8x8x8xf32>
    %102 = math.exp %101 : vector<8x8x8xf32>
    %cst_23 = arith.constant dense<0.000000e+00> : vector<8x8xf32>
    %103 = vector.multi_reduction <add>, %102, %cst_23 [2] : vector<8x8x8xf32> to vector<8x8xf32>
    %104 = vector.shape_cast %103 : vector<8x8xf32> to vector<8x8x1xf32>
    %105 = vector.broadcast %104 : vector<8x8x1xf32> to vector<8x8x8xf32>
    %106 = arith.divf %102, %105 : vector<8x8x8xf32>
    %107 = arith.truncf %106 : vector<8x8x8xf32> to vector<8x8x8xbf16>
    "tpu.trace_start"() <{level = 10 : i32, message = "xqk,xkd->xqd"}> : () -> ()
    %cst_24 = arith.constant dense<0.000000e+00> : vector<8x8x8xf32>
    %108 = tpu.matmul %107, %87, %cst_24 {dimension_numbers = #tpu.dot_dimension_numbers<[2], [1], [1], [2], [0, 0, 0, 1, 1, 2], [0], [0]>} : vector<8x8x8xbf16>, vector<8x8x8xbf16>, vector<8x8x8xf32> -> vector<8x8x8xf32>
    "tpu.trace_stop"() : () -> ()
    %109 = arith.addf %93, %108 : vector<8x8x8xf32>
    %110 = vector.extract_strided_slice %109 {offsets = [0, 0, 0], sizes = [2, 8, 8], strides = [1, 1, 1]} : vector<8x8x8xf32> to vector<2x8x8xf32>
    %111 = vector.extract_strided_slice %109 {offsets = [2, 0, 0], sizes = [2, 8, 8], strides = [1, 1, 1]} : vector<8x8x8xf32> to vector<2x8x8xf32>
    %112 = vector.extract_strided_slice %109 {offsets = [4, 0, 0], sizes = [2, 8, 8], strides = [1, 1, 1]} : vector<8x8x8xf32> to vector<2x8x8xf32>
    %113 = vector.extract_strided_slice %109 {offsets = [6, 0, 0], sizes = [2, 8, 8], strides = [1, 1, 1]} : vector<8x8x8xf32> to vector<2x8x8xf32>
    %114 = tpu.concatenate %110, %111, %112, %113 in 2 : vector<2x8x8xf32>, vector<2x8x8xf32>, vector<2x8x8xf32>, vector<2x8x8xf32> -> vector<2x8x32xf32>
    %115 = vector.shape_cast %114 : vector<2x8x32xf32> to vector<16x32xf32>
    %116 = arith.truncf %115 : vector<16x32xf32> to vector<16x32xbf16>
    %cst_25 = arith.constant dense<0.000000e+00> : vector<16x32xf32>
    %117 = tpu.matmul %116, %70, %cst_25 {dimension_numbers = #tpu.dot_dimension_numbers<[1], [0], [0], [1], [0, 0, 1, 1], [], []>} : vector<16x32xbf16>, vector<32x32xbf16>, vector<16x32xf32> -> vector<16x32xf32>
    %118 = vector.broadcast %71 : vector<1x32xf32> to vector<16x32xf32>
    %119 = arith.addf %117, %118 : vector<16x32xf32>
    %cst_26 = arith.constant 0.000000e+00 : f32
    %120 = vector.broadcast %cst_26 : f32 to vector<16x32xf32>
    %121 = arith.maximumf %119, %120 : vector<16x32xf32>
    %122 = arith.addf %115, %121 : vector<16x32xf32>
    %123 = arith.truncf %122 : vector<16x32xf32> to vector<16x32xbf16>
    %c16_27 = arith.constant 16 : index
    %c0_28 = arith.constant 0 : index
    %124 = vector.load %arg1[%c16_27, %c0_28] : memref<336x128xbf16, #tpu.memory_space<vmem>>, vector<32x96xbf16>
    %cst_29 = arith.constant dense<0.000000e+00> : vector<16x96xf32>
    %125 = tpu.matmul %123, %124, %cst_29 {dimension_numbers = #tpu.dot_dimension_numbers<[1], [0], [0], [1], [0, 0, 1, 1], [], []>} : vector<16x32xbf16>, vector<32x96xbf16>, vector<16x96xf32> -> vector<16x96xf32>
    %c1 = arith.constant 1 : index
    %c0_30 = arith.constant 0 : index
    %126 = vector.load %arg2[%c1, %c0_30] : memref<40x128xf32, #tpu.memory_space<vmem>>, vector<1x96xf32>
    %127 = vector.broadcast %126 : vector<1x96xf32> to vector<16x96xf32>
    %128 = arith.addf %125, %127 : vector<16x96xf32>
    %c24 = arith.constant 24 : index
    %c0_31 = arith.constant 0 : index
    %129 = vector.load %arg2[%c24, %c0_31] : memref<40x128xf32, #tpu.memory_space<vmem>>, vector<8x32xf32>
    %130 = vector.extract_strided_slice %128 {offsets = [0, 0], sizes = [16, 64], strides = [1, 1]} : vector<16x96xf32> to vector<16x64xf32>
    %c208 = arith.constant 208 : index
    %c0_32 = arith.constant 0 : index
    %131 = vector.load %arg1[%c208, %c0_32] : memref<336x128xbf16, #tpu.memory_space<vmem>>, vector<32x32xbf16>
    %c7 = arith.constant 7 : index
    %c0_33 = arith.constant 0 : index
    %132 = vector.load %arg2[%c7, %c0_33] : memref<40x128xf32, #tpu.memory_space<vmem>>, vector<1x32xf32>
    %133 = vector.extract_strided_slice %130 {offsets = [0, 0], sizes = [16, 32], strides = [1, 1]} : vector<16x64xf32> to vector<16x32xf32>
    %134 = vector.shape_cast %133 : vector<16x32xf32> to vector<2x8x32xf32>
    %135 = vector.extract_strided_slice %130 {offsets = [0, 32], sizes = [16, 32], strides = [1, 1]} : vector<16x64xf32> to vector<16x32xf32>
    %136 = vector.shape_cast %135 : vector<16x32xf32> to vector<2x8x32xf32>
    %137 = vector.extract_strided_slice %134 {offsets = [0, 0, 0], sizes = [2, 8, 8], strides = [1, 1, 1]} : vector<2x8x32xf32> to vector<2x8x8xf32>
    %138 = vector.extract_strided_slice %134 {offsets = [0, 0, 8], sizes = [2, 8, 8], strides = [1, 1, 1]} : vector<2x8x32xf32> to vector<2x8x8xf32>
    %139 = vector.extract_strided_slice %134 {offsets = [0, 0, 16], sizes = [2, 8, 8], strides = [1, 1, 1]} : vector<2x8x32xf32> to vector<2x8x8xf32>
    %140 = vector.extract_strided_slice %134 {offsets = [0, 0, 24], sizes = [2, 8, 8], strides = [1, 1, 1]} : vector<2x8x32xf32> to vector<2x8x8xf32>
    %141 = tpu.concatenate %137, %138, %139, %140 in 0 : vector<2x8x8xf32>, vector<2x8x8xf32>, vector<2x8x8xf32>, vector<2x8x8xf32> -> vector<8x8x8xf32>
    %142 = arith.truncf %141 : vector<8x8x8xf32> to vector<8x8x8xbf16>
    %143 = vector.extract_strided_slice %136 {offsets = [0, 0, 0], sizes = [2, 8, 8], strides = [1, 1, 1]} : vector<2x8x32xf32> to vector<2x8x8xf32>
    %144 = vector.extract_strided_slice %136 {offsets = [0, 0, 8], sizes = [2, 8, 8], strides = [1, 1, 1]} : vector<2x8x32xf32> to vector<2x8x8xf32>
    %145 = vector.extract_strided_slice %136 {offsets = [0, 0, 16], sizes = [2, 8, 8], strides = [1, 1, 1]} : vector<2x8x32xf32> to vector<2x8x8xf32>
    %146 = vector.extract_strided_slice %136 {offsets = [0, 0, 24], sizes = [2, 8, 8], strides = [1, 1, 1]} : vector<2x8x32xf32> to vector<2x8x8xf32>
    %147 = tpu.concatenate %143, %144, %145, %146 in 0 : vector<2x8x8xf32>, vector<2x8x8xf32>, vector<2x8x8xf32>, vector<2x8x8xf32> -> vector<8x8x8xf32>
    %148 = arith.truncf %147 : vector<8x8x8xf32> to vector<8x8x8xbf16>
    %149 = vector.shape_cast %129 : vector<8x32xf32> to vector<1x8x32xf32>
    %150 = vector.shape_cast %149 : vector<1x8x32xf32> to vector<1x8x32xf32>
    %151 = vector.broadcast %150 : vector<1x8x32xf32> to vector<2x8x32xf32>
    %152 = vector.extract_strided_slice %151 {offsets = [0, 0, 0], sizes = [2, 8, 8], strides = [1, 1, 1]} : vector<2x8x32xf32> to vector<2x8x8xf32>
    %153 = vector.extract_strided_slice %151 {offsets = [0, 0, 8], sizes = [2, 8, 8], strides = [1, 1, 1]} : vector<2x8x32xf32> to vector<2x8x8xf32>
    %154 = vector.extract_strided_slice %151 {offsets = [0, 0, 16], sizes = [2, 8, 8], strides = [1, 1, 1]} : vector<2x8x32xf32> to vector<2x8x8xf32>
    %155 = vector.extract_strided_slice %151 {offsets = [0, 0, 24], sizes = [2, 8, 8], strides = [1, 1, 1]} : vector<2x8x32xf32> to vector<2x8x8xf32>
    %156 = tpu.concatenate %152, %153, %154, %155 in 0 : vector<2x8x8xf32>, vector<2x8x8xf32>, vector<2x8x8xf32>, vector<2x8x8xf32> -> vector<8x8x8xf32>
    %157 = arith.truncf %156 : vector<8x8x8xf32> to vector<8x8x8xbf16>
    "tpu.trace_start"() <{level = 10 : i32, message = "xqd,xkd->xqk"}> : () -> ()
    %cst_34 = arith.constant dense<0.000000e+00> : vector<8x8x8xf32>
    %158 = tpu.matmul %157, %142, %cst_34 {dimension_numbers = #tpu.dot_dimension_numbers<[2], [2], [1], [1], [0, 0, 0, 1, 1, 1], [0], [0]>} : vector<8x8x8xbf16>, vector<8x8x8xbf16>, vector<8x8x8xf32> -> vector<8x8x8xf32>
    "tpu.trace_stop"() : () -> ()
    %cst_35 = arith.constant 0.176776692 : f32
    %159 = vector.broadcast %cst_35 : f32 to vector<8x8x8xf32>
    %160 = arith.mulf %158, %159 : vector<8x8x8xf32>
    %cst_36 = arith.constant dense<0xFF800000> : vector<8x8xf32>
    %161 = vector.multi_reduction <maximumf>, %160, %cst_36 [2] : vector<8x8x8xf32> to vector<8x8xf32>
    %162 = vector.shape_cast %161 : vector<8x8xf32> to vector<8x8x1xf32>
    %163 = vector.broadcast %162 : vector<8x8x1xf32> to vector<8x8x8xf32>
    %164 = arith.subf %160, %163 : vector<8x8x8xf32>
    %165 = math.exp %164 : vector<8x8x8xf32>
    %cst_37 = arith.constant dense<0.000000e+00> : vector<8x8xf32>
    %166 = vector.multi_reduction <add>, %165, %cst_37 [2] : vector<8x8x8xf32> to vector<8x8xf32>
    %167 = vector.shape_cast %166 : vector<8x8xf32> to vector<8x8x1xf32>
    %168 = vector.broadcast %167 : vector<8x8x1xf32> to vector<8x8x8xf32>
    %169 = arith.divf %165, %168 : vector<8x8x8xf32>
    %170 = arith.truncf %169 : vector<8x8x8xf32> to vector<8x8x8xbf16>
    "tpu.trace_start"() <{level = 10 : i32, message = "xqk,xkd->xqd"}> : () -> ()
    %cst_38 = arith.constant dense<0.000000e+00> : vector<8x8x8xf32>
    %171 = tpu.matmul %170, %148, %cst_38 {dimension_numbers = #tpu.dot_dimension_numbers<[2], [1], [1], [2], [0, 0, 0, 1, 1, 2], [0], [0]>} : vector<8x8x8xbf16>, vector<8x8x8xbf16>, vector<8x8x8xf32> -> vector<8x8x8xf32>
    "tpu.trace_stop"() : () -> ()
    %172 = arith.addf %156, %171 : vector<8x8x8xf32>
    %173 = vector.extract_strided_slice %172 {offsets = [0, 0, 0], sizes = [2, 8, 8], strides = [1, 1, 1]} : vector<8x8x8xf32> to vector<2x8x8xf32>
    %174 = vector.extract_strided_slice %172 {offsets = [2, 0, 0], sizes = [2, 8, 8], strides = [1, 1, 1]} : vector<8x8x8xf32> to vector<2x8x8xf32>
    %175 = vector.extract_strided_slice %172 {offsets = [4, 0, 0], sizes = [2, 8, 8], strides = [1, 1, 1]} : vector<8x8x8xf32> to vector<2x8x8xf32>
    %176 = vector.extract_strided_slice %172 {offsets = [6, 0, 0], sizes = [2, 8, 8], strides = [1, 1, 1]} : vector<8x8x8xf32> to vector<2x8x8xf32>
    %177 = tpu.concatenate %173, %174, %175, %176 in 2 : vector<2x8x8xf32>, vector<2x8x8xf32>, vector<2x8x8xf32>, vector<2x8x8xf32> -> vector<2x8x32xf32>
    %178 = vector.shape_cast %177 : vector<2x8x32xf32> to vector<16x32xf32>
    %179 = arith.truncf %178 : vector<16x32xf32> to vector<16x32xbf16>
    %cst_39 = arith.constant dense<0.000000e+00> : vector<16x32xf32>
    %180 = tpu.matmul %179, %131, %cst_39 {dimension_numbers = #tpu.dot_dimension_numbers<[1], [0], [0], [1], [0, 0, 1, 1], [], []>} : vector<16x32xbf16>, vector<32x32xbf16>, vector<16x32xf32> -> vector<16x32xf32>
    %181 = vector.broadcast %132 : vector<1x32xf32> to vector<16x32xf32>
    %182 = arith.addf %180, %181 : vector<16x32xf32>
    %cst_40 = arith.constant 0.000000e+00 : f32
    %183 = vector.broadcast %cst_40 : f32 to vector<16x32xf32>
    %184 = arith.maximumf %182, %183 : vector<16x32xf32>
    %185 = arith.addf %178, %184 : vector<16x32xf32>
    %186 = arith.truncf %185 : vector<16x32xf32> to vector<16x32xbf16>
    %c80 = arith.constant 80 : index
    %c0_41 = arith.constant 0 : index
    %187 = vector.load %arg1[%c80, %c0_41] : memref<336x128xbf16, #tpu.memory_space<vmem>>, vector<32x64xbf16>
    %cst_42 = arith.constant dense<0.000000e+00> : vector<16x64xf32>
    %188 = tpu.matmul %186, %187, %cst_42 {dimension_numbers = #tpu.dot_dimension_numbers<[1], [0], [0], [1], [0, 0, 1, 1], [], []>} : vector<16x32xbf16>, vector<32x64xbf16>, vector<16x64xf32> -> vector<16x64xf32>
    %c3 = arith.constant 3 : index
    %c0_43 = arith.constant 0 : index
    %189 = vector.load %arg2[%c3, %c0_43] : memref<40x128xf32, #tpu.memory_space<vmem>>, vector<1x64xf32>
    %190 = vector.broadcast %189 : vector<1x64xf32> to vector<16x64xf32>
    %191 = arith.addf %188, %190 : vector<16x64xf32>
    %192 = vector.extract_strided_slice %128 {offsets = [0, 64], sizes = [16, 32], strides = [1, 1]} : vector<16x96xf32> to vector<16x32xf32>
    %c240 = arith.constant 240 : index
    %c0_44 = arith.constant 0 : index
    %193 = vector.load %arg1[%c240, %c0_44] : memref<336x128xbf16, #tpu.memory_space<vmem>>, vector<32x32xbf16>
    %c8 = arith.constant 8 : index
    %c0_45 = arith.constant 0 : index
    %194 = vector.load %arg2[%c8, %c0_45] : memref<40x128xf32, #tpu.memory_space<vmem>>, vector<1x32xf32>
    %195 = vector.extract_strided_slice %191 {offsets = [0, 0], sizes = [16, 32], strides = [1, 1]} : vector<16x64xf32> to vector<16x32xf32>
    %196 = vector.shape_cast %195 : vector<16x32xf32> to vector<2x8x32xf32>
    %197 = vector.extract_strided_slice %191 {offsets = [0, 32], sizes = [16, 32], strides = [1, 1]} : vector<16x64xf32> to vector<16x32xf32>
    %198 = vector.shape_cast %197 : vector<16x32xf32> to vector<2x8x32xf32>
    %199 = vector.extract_strided_slice %196 {offsets = [0, 0, 0], sizes = [2, 8, 8], strides = [1, 1, 1]} : vector<2x8x32xf32> to vector<2x8x8xf32>
    %200 = vector.extract_strided_slice %196 {offsets = [0, 0, 8], sizes = [2, 8, 8], strides = [1, 1, 1]} : vector<2x8x32xf32> to vector<2x8x8xf32>
    %201 = vector.extract_strided_slice %196 {offsets = [0, 0, 16], sizes = [2, 8, 8], strides = [1, 1, 1]} : vector<2x8x32xf32> to vector<2x8x8xf32>
    %202 = vector.extract_strided_slice %196 {offsets = [0, 0, 24], sizes = [2, 8, 8], strides = [1, 1, 1]} : vector<2x8x32xf32> to vector<2x8x8xf32>
    %203 = tpu.concatenate %199, %200, %201, %202 in 0 : vector<2x8x8xf32>, vector<2x8x8xf32>, vector<2x8x8xf32>, vector<2x8x8xf32> -> vector<8x8x8xf32>
    %204 = arith.truncf %203 : vector<8x8x8xf32> to vector<8x8x8xbf16>
    %205 = vector.extract_strided_slice %198 {offsets = [0, 0, 0], sizes = [2, 8, 8], strides = [1, 1, 1]} : vector<2x8x32xf32> to vector<2x8x8xf32>
    %206 = vector.extract_strided_slice %198 {offsets = [0, 0, 8], sizes = [2, 8, 8], strides = [1, 1, 1]} : vector<2x8x32xf32> to vector<2x8x8xf32>
    %207 = vector.extract_strided_slice %198 {offsets = [0, 0, 16], sizes = [2, 8, 8], strides = [1, 1, 1]} : vector<2x8x32xf32> to vector<2x8x8xf32>
    %208 = vector.extract_strided_slice %198 {offsets = [0, 0, 24], sizes = [2, 8, 8], strides = [1, 1, 1]} : vector<2x8x32xf32> to vector<2x8x8xf32>
    %209 = tpu.concatenate %205, %206, %207, %208 in 0 : vector<2x8x8xf32>, vector<2x8x8xf32>, vector<2x8x8xf32>, vector<2x8x8xf32> -> vector<8x8x8xf32>
    %210 = arith.truncf %209 : vector<8x8x8xf32> to vector<8x8x8xbf16>
    %211 = vector.shape_cast %192 : vector<16x32xf32> to vector<2x8x32xf32>
    %212 = vector.extract_strided_slice %211 {offsets = [0, 0, 0], sizes = [2, 8, 8], strides = [1, 1, 1]} : vector<2x8x32xf32> to vector<2x8x8xf32>
    %213 = vector.extract_strided_slice %211 {offsets = [0, 0, 8], sizes = [2, 8, 8], strides = [1, 1, 1]} : vector<2x8x32xf32> to vector<2x8x8xf32>
    %214 = vector.extract_strided_slice %211 {offsets = [0, 0, 16], sizes = [2, 8, 8], strides = [1, 1, 1]} : vector<2x8x32xf32> to vector<2x8x8xf32>
    %215 = vector.extract_strided_slice %211 {offsets = [0, 0, 24], sizes = [2, 8, 8], strides = [1, 1, 1]} : vector<2x8x32xf32> to vector<2x8x8xf32>
    %216 = tpu.concatenate %212, %213, %214, %215 in 0 : vector<2x8x8xf32>, vector<2x8x8xf32>, vector<2x8x8xf32>, vector<2x8x8xf32> -> vector<8x8x8xf32>
    %217 = arith.truncf %216 : vector<8x8x8xf32> to vector<8x8x8xbf16>
    "tpu.trace_start"() <{level = 10 : i32, message = "xqd,xkd->xqk"}> : () -> ()
    %cst_46 = arith.constant dense<0.000000e+00> : vector<8x8x8xf32>
    %218 = tpu.matmul %217, %204, %cst_46 {dimension_numbers = #tpu.dot_dimension_numbers<[2], [2], [1], [1], [0, 0, 0, 1, 1, 1], [0], [0]>} : vector<8x8x8xbf16>, vector<8x8x8xbf16>, vector<8x8x8xf32> -> vector<8x8x8xf32>
    "tpu.trace_stop"() : () -> ()
    %cst_47 = arith.constant 0.176776692 : f32
    %219 = vector.broadcast %cst_47 : f32 to vector<8x8x8xf32>
    %220 = arith.mulf %218, %219 : vector<8x8x8xf32>
    %cst_48 = arith.constant dense<0xFF800000> : vector<8x8xf32>
    %221 = vector.multi_reduction <maximumf>, %220, %cst_48 [2] : vector<8x8x8xf32> to vector<8x8xf32>
    %222 = vector.shape_cast %221 : vector<8x8xf32> to vector<8x8x1xf32>
    %223 = vector.broadcast %222 : vector<8x8x1xf32> to vector<8x8x8xf32>
    %224 = arith.subf %220, %223 : vector<8x8x8xf32>
    %225 = math.exp %224 : vector<8x8x8xf32>
    %cst_49 = arith.constant dense<0.000000e+00> : vector<8x8xf32>
    %226 = vector.multi_reduction <add>, %225, %cst_49 [2] : vector<8x8x8xf32> to vector<8x8xf32>
    %227 = vector.shape_cast %226 : vector<8x8xf32> to vector<8x8x1xf32>
    %228 = vector.broadcast %227 : vector<8x8x1xf32> to vector<8x8x8xf32>
    %229 = arith.divf %225, %228 : vector<8x8x8xf32>
    %230 = arith.truncf %229 : vector<8x8x8xf32> to vector<8x8x8xbf16>
    "tpu.trace_start"() <{level = 10 : i32, message = "xqk,xkd->xqd"}> : () -> ()
    %cst_50 = arith.constant dense<0.000000e+00> : vector<8x8x8xf32>
    %231 = tpu.matmul %230, %210, %cst_50 {dimension_numbers = #tpu.dot_dimension_numbers<[2], [1], [1], [2], [0, 0, 0, 1, 1, 2], [0], [0]>} : vector<8x8x8xbf16>, vector<8x8x8xbf16>, vector<8x8x8xf32> -> vector<8x8x8xf32>
    "tpu.trace_stop"() : () -> ()
    %232 = arith.addf %216, %231 : vector<8x8x8xf32>
    %233 = vector.extract_strided_slice %232 {offsets = [0, 0, 0], sizes = [2, 8, 8], strides = [1, 1, 1]} : vector<8x8x8xf32> to vector<2x8x8xf32>
    %234 = vector.extract_strided_slice %232 {offsets = [2, 0, 0], sizes = [2, 8, 8], strides = [1, 1, 1]} : vector<8x8x8xf32> to vector<2x8x8xf32>
    %235 = vector.extract_strided_slice %232 {offsets = [4, 0, 0], sizes = [2, 8, 8], strides = [1, 1, 1]} : vector<8x8x8xf32> to vector<2x8x8xf32>
    %236 = vector.extract_strided_slice %232 {offsets = [6, 0, 0], sizes = [2, 8, 8], strides = [1, 1, 1]} : vector<8x8x8xf32> to vector<2x8x8xf32>
    %237 = tpu.concatenate %233, %234, %235, %236 in 2 : vector<2x8x8xf32>, vector<2x8x8xf32>, vector<2x8x8xf32>, vector<2x8x8xf32> -> vector<2x8x32xf32>
    %238 = vector.shape_cast %237 : vector<2x8x32xf32> to vector<16x32xf32>
    %239 = arith.truncf %238 : vector<16x32xf32> to vector<16x32xbf16>
    %cst_51 = arith.constant dense<0.000000e+00> : vector<16x32xf32>
    %240 = tpu.matmul %239, %193, %cst_51 {dimension_numbers = #tpu.dot_dimension_numbers<[1], [0], [0], [1], [0, 0, 1, 1], [], []>} : vector<16x32xbf16>, vector<32x32xbf16>, vector<16x32xf32> -> vector<16x32xf32>
    %241 = vector.broadcast %194 : vector<1x32xf32> to vector<16x32xf32>
    %242 = arith.addf %240, %241 : vector<16x32xf32>
    %cst_52 = arith.constant 0.000000e+00 : f32
    %243 = vector.broadcast %cst_52 : f32 to vector<16x32xf32>
    %244 = arith.maximumf %242, %243 : vector<16x32xf32>
    %245 = arith.addf %238, %244 : vector<16x32xf32>
    %246 = arith.truncf %245 : vector<16x32xf32> to vector<16x32xbf16>
    %c112 = arith.constant 112 : index
    %c0_53 = arith.constant 0 : index
    %247 = vector.load %arg1[%c112, %c0_53] : memref<336x128xbf16, #tpu.memory_space<vmem>>, vector<32x64xbf16>
    %cst_54 = arith.constant dense<0.000000e+00> : vector<16x64xf32>
    %248 = tpu.matmul %246, %247, %cst_54 {dimension_numbers = #tpu.dot_dimension_numbers<[1], [0], [0], [1], [0, 0, 1, 1], [], []>} : vector<16x32xbf16>, vector<32x64xbf16>, vector<16x64xf32> -> vector<16x64xf32>
    %c4 = arith.constant 4 : index
    %c0_55 = arith.constant 0 : index
    %249 = vector.load %arg2[%c4, %c0_55] : memref<40x128xf32, #tpu.memory_space<vmem>>, vector<1x64xf32>
    %250 = vector.broadcast %249 : vector<1x64xf32> to vector<16x64xf32>
    %251 = arith.addf %248, %250 : vector<16x64xf32>
    %c32 = arith.constant 32 : index
    %c0_56 = arith.constant 0 : index
    %252 = vector.load %arg2[%c32, %c0_56] : memref<40x128xf32, #tpu.memory_space<vmem>>, vector<1x32xf32>
    %c272 = arith.constant 272 : index
    %c0_57 = arith.constant 0 : index
    %253 = vector.load %arg1[%c272, %c0_57] : memref<336x128xbf16, #tpu.memory_space<vmem>>, vector<32x32xbf16>
    %c9 = arith.constant 9 : index
    %c0_58 = arith.constant 0 : index
    %254 = vector.load %arg2[%c9, %c0_58] : memref<40x128xf32, #tpu.memory_space<vmem>>, vector<1x32xf32>
    %255 = vector.extract_strided_slice %251 {offsets = [0, 0], sizes = [16, 32], strides = [1, 1]} : vector<16x64xf32> to vector<16x32xf32>
    %256 = vector.shape_cast %255 : vector<16x32xf32> to vector<2x8x32xf32>
    %257 = vector.extract_strided_slice %251 {offsets = [0, 32], sizes = [16, 32], strides = [1, 1]} : vector<16x64xf32> to vector<16x32xf32>
    %258 = vector.shape_cast %257 : vector<16x32xf32> to vector<2x8x32xf32>
    %259 = vector.extract_strided_slice %256 {offsets = [0, 0, 0], sizes = [2, 8, 8], strides = [1, 1, 1]} : vector<2x8x32xf32> to vector<2x8x8xf32>
    %260 = vector.extract_strided_slice %256 {offsets = [0, 0, 8], sizes = [2, 8, 8], strides = [1, 1, 1]} : vector<2x8x32xf32> to vector<2x8x8xf32>
    %261 = vector.extract_strided_slice %256 {offsets = [0, 0, 16], sizes = [2, 8, 8], strides = [1, 1, 1]} : vector<2x8x32xf32> to vector<2x8x8xf32>
    %262 = vector.extract_strided_slice %256 {offsets = [0, 0, 24], sizes = [2, 8, 8], strides = [1, 1, 1]} : vector<2x8x32xf32> to vector<2x8x8xf32>
    %263 = tpu.concatenate %259, %260, %261, %262 in 0 : vector<2x8x8xf32>, vector<2x8x8xf32>, vector<2x8x8xf32>, vector<2x8x8xf32> -> vector<8x8x8xf32>
    %264 = arith.truncf %263 : vector<8x8x8xf32> to vector<8x8x8xbf16>
    %265 = vector.extract_strided_slice %258 {offsets = [0, 0, 0], sizes = [2, 8, 8], strides = [1, 1, 1]} : vector<2x8x32xf32> to vector<2x8x8xf32>
    %266 = vector.extract_strided_slice %258 {offsets = [0, 0, 8], sizes = [2, 8, 8], strides = [1, 1, 1]} : vector<2x8x32xf32> to vector<2x8x8xf32>
    %267 = vector.extract_strided_slice %258 {offsets = [0, 0, 16], sizes = [2, 8, 8], strides = [1, 1, 1]} : vector<2x8x32xf32> to vector<2x8x8xf32>
    %268 = vector.extract_strided_slice %258 {offsets = [0, 0, 24], sizes = [2, 8, 8], strides = [1, 1, 1]} : vector<2x8x32xf32> to vector<2x8x8xf32>
    %269 = tpu.concatenate %265, %266, %267, %268 in 0 : vector<2x8x8xf32>, vector<2x8x8xf32>, vector<2x8x8xf32>, vector<2x8x8xf32> -> vector<8x8x8xf32>
    %270 = arith.truncf %269 : vector<8x8x8xf32> to vector<8x8x8xbf16>
    %271 = vector.shape_cast %252 : vector<1x32xf32> to vector<1x1x32xf32>
    %272 = vector.shape_cast %271 : vector<1x1x32xf32> to vector<1x1x32xf32>
    %273 = vector.broadcast %272 : vector<1x1x32xf32> to vector<2x1x32xf32>
    %274 = vector.extract_strided_slice %273 {offsets = [0, 0, 0], sizes = [2, 1, 8], strides = [1, 1, 1]} : vector<2x1x32xf32> to vector<2x1x8xf32>
    %275 = vector.extract_strided_slice %273 {offsets = [0, 0, 8], sizes = [2, 1, 8], strides = [1, 1, 1]} : vector<2x1x32xf32> to vector<2x1x8xf32>
    %276 = vector.extract_strided_slice %273 {offsets = [0, 0, 16], sizes = [2, 1, 8], strides = [1, 1, 1]} : vector<2x1x32xf32> to vector<2x1x8xf32>
    %277 = vector.extract_strided_slice %273 {offsets = [0, 0, 24], sizes = [2, 1, 8], strides = [1, 1, 1]} : vector<2x1x32xf32> to vector<2x1x8xf32>
    %278 = tpu.concatenate %274, %275, %276, %277 in 0 : vector<2x1x8xf32>, vector<2x1x8xf32>, vector<2x1x8xf32>, vector<2x1x8xf32> -> vector<8x1x8xf32>
    %279 = arith.truncf %278 : vector<8x1x8xf32> to vector<8x1x8xbf16>
    "tpu.trace_start"() <{level = 10 : i32, message = "xqd,xkd->xqk"}> : () -> ()
    %cst_59 = arith.constant dense<0.000000e+00> : vector<8x1x8xf32>
    %280 = tpu.matmul %279, %264, %cst_59 {dimension_numbers = #tpu.dot_dimension_numbers<[2], [2], [1], [1], [0, 0, 0, 1, 1, 1], [0], [0]>} : vector<8x1x8xbf16>, vector<8x8x8xbf16>, vector<8x1x8xf32> -> vector<8x1x8xf32>
    "tpu.trace_stop"() : () -> ()
    %cst_60 = arith.constant 0.176776692 : f32
    %281 = vector.broadcast %cst_60 : f32 to vector<8x1x8xf32>
    %282 = arith.mulf %280, %281 : vector<8x1x8xf32>
    %cst_61 = arith.constant dense<0xFF800000> : vector<8x1xf32>
    %283 = vector.multi_reduction <maximumf>, %282, %cst_61 [2] : vector<8x1x8xf32> to vector<8x1xf32>
    %284 = vector.shape_cast %283 : vector<8x1xf32> to vector<8x1x1xf32>
    %285 = vector.broadcast %284 : vector<8x1x1xf32> to vector<8x1x8xf32>
    %286 = arith.subf %282, %285 : vector<8x1x8xf32>
    %287 = math.exp %286 : vector<8x1x8xf32>
    %cst_62 = arith.constant dense<0.000000e+00> : vector<8x1xf32>
    %288 = vector.multi_reduction <add>, %287, %cst_62 [2] : vector<8x1x8xf32> to vector<8x1xf32>
    %289 = vector.shape_cast %288 : vector<8x1xf32> to vector<8x1x1xf32>
    %290 = vector.broadcast %289 : vector<8x1x1xf32> to vector<8x1x8xf32>
    %291 = arith.divf %287, %290 : vector<8x1x8xf32>
    %292 = arith.truncf %291 : vector<8x1x8xf32> to vector<8x1x8xbf16>
    "tpu.trace_start"() <{level = 10 : i32, message = "xqk,xkd->xqd"}> : () -> ()
    %cst_63 = arith.constant dense<0.000000e+00> : vector<8x1x8xf32>
    %293 = tpu.matmul %292, %270, %cst_63 {dimension_numbers = #tpu.dot_dimension_numbers<[2], [1], [1], [2], [0, 0, 0, 1, 1, 2], [0], [0]>} : vector<8x1x8xbf16>, vector<8x8x8xbf16>, vector<8x1x8xf32> -> vector<8x1x8xf32>
    "tpu.trace_stop"() : () -> ()
    %294 = arith.addf %278, %293 : vector<8x1x8xf32>
    %295 = vector.extract_strided_slice %294 {offsets = [0, 0, 0], sizes = [2, 1, 8], strides = [1, 1, 1]} : vector<8x1x8xf32> to vector<2x1x8xf32>
    %296 = vector.extract_strided_slice %294 {offsets = [2, 0, 0], sizes = [2, 1, 8], strides = [1, 1, 1]} : vector<8x1x8xf32> to vector<2x1x8xf32>
    %297 = vector.extract_strided_slice %294 {offsets = [4, 0, 0], sizes = [2, 1, 8], strides = [1, 1, 1]} : vector<8x1x8xf32> to vector<2x1x8xf32>
    %298 = vector.extract_strided_slice %294 {offsets = [6, 0, 0], sizes = [2, 1, 8], strides = [1, 1, 1]} : vector<8x1x8xf32> to vector<2x1x8xf32>
    %299 = tpu.concatenate %295, %296, %297, %298 in 2 : vector<2x1x8xf32>, vector<2x1x8xf32>, vector<2x1x8xf32>, vector<2x1x8xf32> -> vector<2x1x32xf32>
    %300 = vector.shape_cast %299 : vector<2x1x32xf32> to vector<2x32xf32>
    %301 = arith.truncf %300 : vector<2x32xf32> to vector<2x32xbf16>
    %cst_64 = arith.constant dense<0.000000e+00> : vector<2x32xf32>
    %302 = tpu.matmul %301, %253, %cst_64 {dimension_numbers = #tpu.dot_dimension_numbers<[1], [0], [0], [1], [0, 0, 1, 1], [], []>} : vector<2x32xbf16>, vector<32x32xbf16>, vector<2x32xf32> -> vector<2x32xf32>
    %303 = vector.broadcast %254 : vector<1x32xf32> to vector<2x32xf32>
    %304 = arith.addf %302, %303 : vector<2x32xf32>
    %cst_65 = arith.constant 0.000000e+00 : f32
    %305 = vector.broadcast %cst_65 : f32 to vector<2x32xf32>
    %306 = arith.maximumf %304, %305 : vector<2x32xf32>
    %307 = arith.addf %300, %306 : vector<2x32xf32>
    %308 = arith.truncf %307 : vector<2x32xf32> to vector<2x32xbf16>
    %c304 = arith.constant 304 : index
    %c0_66 = arith.constant 0 : index
    %309 = vector.load %arg1[%c304, %c0_66] : memref<336x128xbf16, #tpu.memory_space<vmem>>, vector<32x16xbf16>
    %cst_67 = arith.constant dense<0.000000e+00> : vector<2x16xf32>
    %310 = tpu.matmul %308, %309, %cst_67 {dimension_numbers = #tpu.dot_dimension_numbers<[1], [0], [0], [1], [0, 0, 1, 1], [], []>} : vector<2x32xbf16>, vector<32x16xbf16>, vector<2x16xf32> -> vector<2x16xf32>
    %c10 = arith.constant 10 : index
    %c0_68 = arith.constant 0 : index
    %311 = vector.load %arg2[%c10, %c0_68] : memref<40x128xf32, #tpu.memory_space<vmem>>, vector<1x16xf32>
    %312 = vector.broadcast %311 : vector<1x16xf32> to vector<2x16xf32>
    %313 = arith.addf %310, %312 : vector<2x16xf32>
    %c0_69 = arith.constant 0 : index
    %c0_70 = arith.constant 0 : index
    %314 = vector.load %arg3[%c0_69, %c0_70] : memref<2x16xf32, #tpu.memory_space<vmem>>, vector<2x16xf32>
    tpu.vector_store %arg3[%c0_69, %c0_70], %313 {strides = array<i32>} : memref<2x16xf32, #tpu.memory_space<vmem>>, vector<2x16xf32>,
    return
  }
}

</mosaic_0001>

<bundles_post_ra>
// kernel: modelnet_forward.1
= control target key start
LH: loop header
LB: loop body
LE: loop exit
PB: predicated region body
PF: predicated region fallthrough
CT: control target
= control target key end

     0   :  { %vm33_vm0 = vcmask 1043456   ;;  %v6695_v1 = vmov 0.0   ;;  %vm6696_vm1 = vmmov 0   ;;  %vm29_vm2 = vcmask 64512   ;;  %s8071_s0 = inlined_call_operand.vmem [shape: bf16[16,8], index: 0, kind: input, shape index: {}]   ;;  %s8072_s1 = inlined_call_operand.vmem [shape: bf16[336,128], index: 1, kind: input, shape index: {}]   ;;  %s8073_s2 = inlined_call_operand.vmem [shape: f32[40,128], index: 2, kind: input, shape index: {}]   ;;  %s8074_s3 = inlined_call_operand.hbm [shape: f32[2,16], index: 3, kind: output, shape index: {}]  }
   0x1   :  { %v18_v0 = vld [vmem:[%s8072_s1] sm:$0xf]  ;;  %5882 = vmatprep.subr.bf16.mxu0 %v6695_v1  ;;  %5884 = vmatprep.mubr.msk.bf16.mxu0 %vm6696_vm1, %v6695_v1 }
   0x2   :  { %v35_v2 = vsel %vm33_vm0, %v18_v0, 0  ;;  %v6492_v3 = vld [vmem:[%s8071_s0] sm:$0xff]   ;;  %5888 = vmatprep.subr.bf16.mxu1 %v6695_v1  ;;  %5890 = vmatprep.mubr.msk.bf16.mxu1 %vm6696_vm1, %v6695_v1 }
   0x3   :  { %5883 = vmatpush3.bf16.msra.mxu0 %v35_v2 }
   0x4   :  { %5894 = vmatprep.subr.bf16.mxu0 %v6695_v1 }
   0x6   :  { %5885 = vmatmul.mubr.msk.bf16.vlgmr.msra.gmra.mxu0 %vm29_vm2, %v6492_v3 }
   0x7   :  { %5896 = vmatprep.mubr.msk.bf16.mxu0 %vm6696_vm1, %v6695_v1 }
   0x8   :  { %8 = vsyncpa [#allocation3], 0  ;;  %v5567_v4 = vld [vmem:[%s8073_s2] ss:$0 sm:$0xff]  ;;  %s6697_s0 = smov 112   ;;  %s6698_s18 = smov 120  }
   0x9   :  { %v6766_v13 = vld [vmem:[%s8073_s2 + $0x10] sm:$0xff]  ;;  %s6699_s21 = smov 104   ;;  %s6700_s22 = smov 96   ;;  %vm1012_vm3 = vcmask 130048   ;;  %vm1015_vm4 = vcmask 195584   ;;  %vm1035_vm5 = vcmask 261120  }
   0xa   :  { %v122_v16 = vpack.c.bf16 %v6766_v13, %v6766_v13  ;;  %s6701_s23 = smov 8   ;;  %s6702_s24 = smov 16   ;;  %vm4875_vm6 = vcmask 57344   ;;  %vm5413_vm7 = vcmask 1041409   ;;  %vm5551_vm8 = vcmask 123904  }
   0xb   :  { %s6703_s27 = smov 24   ;;  %s6704_s30 = smov 64  }
   0xc   :  { %s6705_s12 = smov 72   ;;  %s6706_s17 = smov 80  }
   0xd   :  { %s6707_s19 = smov 88   ;;  %s6708_s26 = smov [#allocation2]  }
   0xe   :  { %s5559_s28 = sshll.u32 %s6708_s26, 4  ;;  %s5560_s28 = int_to_ptr.vmem [resolvable:$true] %s5559_s28 }
   0xf   :  { %s6673_s29 = scalar_lea.vmem %s5560_s28, 32  ;;  %p6678_p1 = scmp.lt.s32.totalorder %s5560_s28, %s5560_s28 }
  0x10   :  { %p6674_p0 = scmp.ne.s32.totalorder %s5560_s28, %s6673_s29  ;;  %p6679_p2 = scmp.lt.s32.totalorder %s6673_s29, %s6673_s29 }
  0x12   :  { %p6680_p3 = por %p6679_p2, %p6678_p1 }
  0x14   :  { %p6681_p4 = pnand %p6680_p3, %p6674_p0 }
  0xc6   :  { %v71_v5 = vpop.f32.mrf.mxu0 }
  0xc7   :  { %v6749_v6 = vadd.f32 %v5567_v4, %v71_v5 }
  0xc8   :  { %v5886_v7 = vpop.f32.mrf.mxu0 }
  0xc9   :  { %92 = vrot.lane.b32.xlu1 %v6749_v6, %s6697_s0  ;;  %86 = vrot.lane.b32.xlu0 %v6749_v6, %s6698_s18  ;;  %v6757_v8 = vpack.c.bf16 %v6749_v6, %v6749_v6 }
  0xca   :  { %v74_v9 = vpop.f32.mrf.mxu0 }
  0xcb   :  { %v6759_v10 = vadd.f32 %v5567_v4, %v74_v9  ;;  %v130_v11 = vsel %vm29_vm2, %v6757_v8, 0 }
  0xcc   :  { %v5887_v12 = vpop.f32.mrf.mxu0  ;;  %5889 = vmatpush3.bf16.xpose.msra.mxu1 %v130_v11 }
  0xcd   :  { %94 = vrot.lane.b32.xlu1 %v6759_v10, %s6697_s0  ;;  %88 = vrot.lane.b32.xlu0 %v6759_v10, %s6698_s18  ;;  %v6774_v14 = vpack.c.bf16 %v6759_v10, %v6759_v10 }
  0xce   :  { %5900 = vmatprep.subr.bf16.mxu1 %v6695_v1 }
  0xcf   :  { %v173_v15 = vsel %vm29_vm2, %v6774_v14, 0 }
  0xd0   :  { %5895 = vmatpush3.bf16.xpose.msra.mxu0 %v173_v15 }
  0xd1   :  { %98 = vrot.lane.b32.xlu1 %v6749_v6, %s6699_s21  ;;  %113 = vrot.lane.b32.xlu0 %v6766_v13, %s6698_s18 }
  0xd2   :  { %5906 = vmatprep.subr.bf16.mxu0 %v6695_v1 }
  0xd3   :  { %5891 = vmatmul.mubr.msk.bf16.vlgmr.msra.gmra.mxu1 %vm29_vm2, %v122_v16 }
  0xd4   :  { %5902 = vmatprep.mubr.msk.bf16.mxu1 %vm6696_vm1, %v6695_v1 }
  0xd5   :  { %116 = vrot.lane.b32.xlu1 %v6766_v13, %s6697_s0  ;;  %100 = vrot.lane.b32.xlu0 %v6759_v10, %s6699_s21 }
  0xd7   :  { %5897 = vmatmul.mubr.msk.bf16.vlgmr.msra.gmra.mxu0 %vm29_vm2, %v122_v16 }
  0xd8   :  { %5908 = vmatprep.mubr.msk.bf16.mxu0 %vm6696_vm1, %v6695_v1 }
  0xd9   :  { %119 = vrot.lane.b32.xlu0 %v6766_v13, %s6699_s21  ;;  %636 = vrot.lane.b32.xlu1 %v6774_v14, %s6700_s22 }
  0xdd   :  { %587 = vrot.lane.b32.xlu0 %v6757_v8, %s6700_s22 }
 0x13b   :  { %v6802_v17 = vpop.permute.xlu1 %92  ;;  %v6804_v18 = vpop.permute.xlu0 %86 }
 0x13c   :  { %v6808_v19 = vpack.c.bf16 %v6804_v18, %v6804_v18  ;;  %v6823_v24 = vpack.c.bf16 %v6802_v17, %v6802_v17 }
 0x13e   :  { %v219_v20 = vsel %vm29_vm2, %v6808_v19, 0  ;;  %v308_v30 = vsel %vm29_vm2, %v6823_v24, 0 }
 0x13f   :  { %5901 = vmatpush3.bf16.xpose.msra.mxu1 %v219_v20  ;;  %v6812_v21 = vpop.permute.xlu1 %94  ;;  %v6814_v22 = vpop.permute.xlu0 %88 }
 0x140   :  { %v6818_v23 = vpack.c.bf16 %v6814_v22, %v6814_v22  ;;  %5912 = vmatprep.subr.bf16.mxu1 %v6695_v1  ;;  %v6836_v29 = vpack.c.bf16 %v6812_v21, %v6812_v21 }
 0x142   :  { %v262_v25 = vsel %vm29_vm2, %v6818_v23, 0  ;;  %v351_v35 = vsel %vm29_vm2, %v6836_v29, 0 }
 0x143   :  { %v6827_v26 = vpop.permute.xlu1 %98  ;;  %v6829_v27 = vpop.permute.xlu0 %113  ;;  %5907 = vmatpush3.bf16.xpose.msra.mxu0 %v262_v25 }
 0x144   :  { %v123_v28 = vpack.c.bf16 %v6829_v27, %v6829_v27  ;;  %5918 = vmatprep.subr.bf16.mxu0 %v6695_v1  ;;  %v6850_v33 = vpack.c.bf16 %v6827_v26, %v6827_v26 }
 0x146   :  { %5903 = vmatmul.mubr.msk.bf16.vlgmr.msra.gmra.mxu1 %vm29_vm2, %v123_v28  ;;  %v397_v38 = vsel %vm29_vm2, %v6850_v33, 0 }
 0x147   :  { %5913 = vmatpush3.bf16.xpose.msra.mxu1 %v308_v30  ;;  %v6841_v31 = vpop.permute.xlu0 %100  ;;  %5914 = vmatprep.mubr.msk.bf16.mxu1 %vm6696_vm1, %v6695_v1  ;;  %v6846_v32 = vpop.permute.xlu1 %116 }
 0x148   :  { %5924 = vmatprep.subr.bf16.mxu1 %v6695_v1  ;;  %v124_v34 = vpack.c.bf16 %v6846_v32, %v6846_v32  ;;  %v6864_v37 = vpack.c.bf16 %v6841_v31, %v6841_v31 }
 0x14a   :  { %5909 = vmatmul.mubr.msk.bf16.vlgmr.msra.gmra.mxu0 %vm29_vm2, %v123_v28  ;;  %v440_v40 = vsel %vm29_vm2, %v6864_v37, 0 }
 0x14b   :  { %5919 = vmatpush3.bf16.xpose.msra.mxu0 %v351_v35  ;;  %5920 = vmatprep.mubr.msk.bf16.mxu0 %vm6696_vm1, %v6695_v1  ;;  %v6860_v36 = vpop.permute.xlu0 %119  ;;  %v637_v43 = vpop.permute.xlu1 %636 }
 0x14c   :  { %5930 = vmatprep.subr.bf16.mxu0 %v6695_v1  ;;  %v125_v39 = vpack.c.bf16 %v6860_v36, %v6860_v36  ;;  %v642_v44 = vsel %vm33_vm0, %v637_v43, 0 }
 0x14e   :  { %5915 = vmatmul.mubr.msk.bf16.vlgmr.msra.gmra.mxu1 %vm29_vm2, %v124_v34 }
 0x14f   :  { %5925 = vmatpush3.bf16.xpose.msra.mxu1 %v397_v38  ;;  %5926 = vmatprep.mubr.msk.bf16.mxu1 %vm6696_vm1, %v6695_v1  ;;  %v588_v41 = vpop.permute.xlu0 %587 }
 0x150   :  { %5936 = vmatprep.subr.bf16.mxu1 %v6695_v1  ;;  %v593_v42 = vsel %vm33_vm0, %v588_v41, 0 }
 0x152   :  { %5921 = vmatmul.mubr.msk.bf16.vlgmr.msra.gmra.mxu0 %vm29_vm2, %v124_v34 }
 0x153   :  { %5931 = vmatpush3.bf16.xpose.msra.mxu0 %v440_v40  ;;  %5932 = vmatprep.mubr.msk.bf16.mxu0 %vm6696_vm1, %v6695_v1 }
 0x154   :  { %5942 = vmatprep.subr.bf16.mxu0 %v6695_v1 }
 0x156   :  { %5927 = vmatmul.mubr.msk.bf16.vlgmr.msra.gmra.mxu1 %vm29_vm2, %v125_v39 }
 0x157   :  { %5937 = vmatpush3.bf16.msra.mxu1 %v593_v42  ;;  %5938 = vmatprep.mubr.msk.bf16.mxu1 %vm6696_vm1, %v6695_v1 }
 0x158   :  { %5948 = vmatprep.subr.bf16.mxu1 %v6695_v1 }
 0x15a   :  { %5933 = vmatmul.mubr.msk.bf16.vlgmr.msra.gmra.mxu0 %vm29_vm2, %v125_v39 }
 0x15b   :  { %5943 = vmatpush3.bf16.msra.mxu0 %v642_v44  ;;  %5944 = vmatprep.mubr.msk.bf16.mxu0 %vm6696_vm1, %v6695_v1 }
 0x15c   :  { %5954 = vmatprep.subr.bf16.mxu0 %v6695_v1 }
 0x193   :  { %v166_v45 = vpop.f32.mrf.mxu1 }
 0x194   :  { %v482_v46 = vmul.f32 0.17677669, %v166_v45 }
 0x195   :  { %v5892_v47 = vpop.f32.mrf.mxu1 }
 0x196   :  { %v490_v48 = vsel %vm29_vm2, %v482_v46, -inf }
 0x197   :  { %491 = vmax.xlane.f32.xlu1 %v490_v48  ;;  %v209_v49 = vpop.f32.mrf.mxu0  ;;  %v169_v50 = vpop.f32.mrf.mxu1 }
 0x198   :  { %v483_v51 = vmul.f32 0.17677669, %v209_v49 }
 0x199   :  { %v5898_v52 = vpop.f32.mrf.mxu0  ;;  %v5893_v53 = vpop.f32.mrf.mxu1 }
 0x19a   :  { %v493_v54 = vsel %vm29_vm2, %v483_v51, -inf }
 0x19b   :  { %494 = vmax.xlane.f32.xlu0 %v493_v54  ;;  %v212_v55 = vpop.f32.mrf.mxu0 }
 0x19d   :  { %v5899_v56 = vpop.f32.mrf.mxu0 }
 0x206   :  { %v255_v57 = vpop.f32.mrf.mxu1 }
 0x207   :  { %v484_v58 = vmul.f32 0.17677669, %v255_v57 }
 0x208   :  { %v5904_v59 = vpop.f32.mrf.mxu1 }
 0x209   :  { %v496_v60 = vsel %vm29_vm2, %v484_v58, -inf }
 0x20a   :  { %v258_v61 = vpop.f32.mrf.mxu1  ;;  %497 = vmax.xlane.f32.xlu0 %v496_v60  ;;  %v298_v62 = vpop.f32.mrf.mxu0 }
 0x20b   :  { %v485_v63 = vmul.f32 0.17677669, %v298_v62 }
 0x20c   :  { %v5905_v0 = vpop.f32.mrf.mxu1  ;;  %v5910_v2 = vpop.f32.mrf.mxu0 }
 0x20d   :  { %v499_v3 = vsel %vm29_vm2, %v485_v63, -inf }
 0x20e   :  { %v344_v4 = vpop.f32.mrf.mxu1  ;;  %500 = vmax.xlane.f32.xlu1 %v499_v3  ;;  %v301_v5 = vpop.f32.mrf.mxu0 }
 0x20f   :  { %v6894_v7 = vmul.f32 0.17677669, %v344_v4 }
 0x210   :  { %v5911_v9 = vpop.f32.mrf.mxu0  ;;  %v5916_v11 = vpop.f32.mrf.mxu1 }
 0x211   :  { %v502_v12 = vsel %vm29_vm2, %v6894_v7, -inf }
 0x212   :  { %v347_v15 = vpop.f32.mrf.mxu1  ;;  %503 = vmax.xlane.f32.xlu0 %v502_v12  ;;  %v387_v16 = vpop.f32.mrf.mxu0 }
 0x213   :  { %v487_v20 = vmul.f32 0.17677669, %v387_v16 }
 0x214   :  { %v5917_v25 = vpop.f32.mrf.mxu1  ;;  %v5922_v28 = vpop.f32.mrf.mxu0 }
 0x215   :  { %v505_v30 = vsel %vm29_vm2, %v487_v20, -inf }
 0x216   :  { %v433_v34 = vpop.f32.mrf.mxu1  ;;  %506 = vmax.xlane.f32.xlu1 %v505_v30  ;;  %v390_v35 = vpop.f32.mrf.mxu0 }
 0x217   :  { %v6899_v38 = vmul.f32 0.17677669, %v433_v34 }
 0x218   :  { %v5923_v39 = vpop.f32.mrf.mxu0  ;;  %v5928_v40 = vpop.f32.mrf.mxu1 }
 0x219   :  { %v508_v41 = vsel %vm29_vm2, %v6899_v38, -inf }
 0x21a   :  { %509 = vmax.xlane.f32.xlu0 %v508_v41  ;;  %v476_v42 = vpop.f32.mrf.mxu0  ;;  %v436_v43 = vpop.f32.mrf.mxu1 }
 0x21b   :  { %v489_v44 = vmul.f32 0.17677669, %v476_v42 }
 0x21c   :  { %v5934_v45 = vpop.f32.mrf.mxu0  ;;  %v5929_v47 = vpop.f32.mrf.mxu1 }
 0x21d   :  { %v511_v48 = vsel %vm29_vm2, %v489_v44, -inf }
 0x21e   :  { %512 = vmax.xlane.f32.xlu1 %v511_v48  ;;  %v479_v49 = vpop.f32.mrf.mxu0 }
 0x220   :  { %v5935_v50 = vpop.f32.mrf.mxu0  ;;  %v492_v52 = vpop.xlane.xlu1 %491 }
 0x221   :  { %v514_v53 = vsub.f32 %v482_v46, %v492_v52 }
 0x223   :  { %v522_v55 = vmul.f32 1.442695, %v514_v53 }
 0x224   :  { %v495_v54 = vpop.xlane.xlu0 %494 }
 0x225   :  { %v515_v56 = vsub.f32 %v483_v51, %v495_v54  ;;  %6513 = vpow2.f32 %v522_v55 }
 0x227   :  { %v524_v57 = vmul.f32 1.442695, %v515_v56 }
 0x229   :  { %6515 = vpow2.f32 %v524_v57 }
 0x22f   :  { %685 = vrot.lane.b32.xlu1 %v6808_v19, %s6700_s22 }
 0x230   :  { %734 = vrot.lane.b32.xlu0 %v6818_v23, %s6700_s22 }
 0x232   :  { %v6514_v59 = vpop.eup %6513 }
 0x233   :  { %v538_v60 = vsel %vm29_vm2, %v6514_v59, 0.0 }
 0x236   :  { %v6516_v61 = vpop.eup %6515 }
 0x237   :  { %v541_v62 = vsel %vm29_vm2, %v6516_v61, 0.0 }
 0x24f   :  { %539 = vadd.xlane.f32.xlu0 %v538_v60 }
 0x253   :  { %542 = vadd.xlane.f32.xlu1 %v541_v62 }
 0x264   :  { %783 = vrot.lane.b32.xlu1 %v6823_v24, %s6700_s22 }
 0x293   :  { %v498_v0 = vpop.xlane.xlu0 %497 }
 0x294   :  { %v516_v2 = vsub.f32 %v484_v58, %v498_v0 }
 0x296   :  { %v526_v46 = vmul.f32 1.442695, %v516_v2 }
 0x297   :  { %v501_v3 = vpop.xlane.xlu1 %500 }
 0x298   :  { %6517 = vpow2.f32 %v526_v46  ;;  %v517_v51 = vsub.f32 %v485_v63, %v501_v3 }
 0x29a   :  { %v528_v4 = vmul.f32 1.442695, %v517_v51 }
 0x29b   :  { %v504_v39 = vpop.xlane.xlu0 %503 }
 0x29c   :  { %6519 = vpow2.f32 %v528_v4  ;;  %v518_v40 = vsub.f32 %v6894_v7, %v504_v39 }
 0x29e   :  { %v530_v42 = vmul.f32 1.442695, %v518_v40 }
 0x29f   :  { %v507_v5 = vpop.xlane.xlu1 %506 }
 0x2a0   :  { %v519_v9 = vsub.f32 %v487_v20, %v507_v5 }
 0x2a2   :  { %v532_v11 = vmul.f32 1.442695, %v519_v9 }
 0x2a3   :  { %v510_v41 = vpop.xlane.xlu0 %509 }
 0x2a4   :  { %6521 = vpow2.f32 %v532_v11  ;;  %v520_v43 = vsub.f32 %v6899_v38, %v510_v41 }
 0x2a5   :  { %v6912_v12 = vpop.eup %6517 }
 0x2a6   :  { %v544_v15 = vsel %vm29_vm2, %v6912_v12, 0.0 }
 0x2a7   :  { %545 = vadd.xlane.f32.xlu0 %v544_v15  ;;  %v513_v16 = vpop.xlane.xlu1 %512  ;;  %v735_v45 = vpop.permute.xlu0 %734 }
 0x2a8   :  { %v521_v25 = vsub.f32 %v489_v44, %v513_v16  ;;  %v534_v44 = vmul.f32 1.442695, %v520_v43  ;;  %v740_v0 = vsel %vm33_vm0, %v735_v45, 0 }
 0x2a9   :  { %v6916_v28 = vpop.eup %6519 }
 0x2aa   :  { %v536_v58 = vmul.f32 1.442695, %v521_v25  ;;  %v547_v63 = vsel %vm29_vm2, %v6916_v28, 0.0 }
 0x2ab   :  { %548 = vadd.xlane.f32.xlu1 %v547_v63  ;;  %v686_v48 = vpop.permute.xlu1 %685 }
 0x2ac   :  { %6523 = vpow2.f32 %v536_v58  ;;  %v691_v57 = vsel %vm33_vm0, %v686_v48, 0 }
 0x2ad   :  { %6525 = vpow2.f32 %v530_v42 }
 0x2ae   :  { %6527 = vpow2.f32 %v534_v44 }
 0x2b1   :  { %v6920_v30 = vpop.eup %6521 }
 0x2b2   :  { %v553_v20 = vsel %vm29_vm2, %v6920_v30, 0.0 }
 0x2b3   :  { %554 = vadd.xlane.f32.xlu1 %v553_v20 }
 0x2b9   :  { %v6924_v34 = vpop.eup %6523 }
 0x2ba   :  { %v559_v35 = vsel %vm29_vm2, %v6924_v34, 0.0  ;;  %v6934_v47 = vpop.eup %6525 }
 0x2bb   :  { %560 = vadd.xlane.f32.xlu1 %v559_v35  ;;  %v550_v50 = vsel %vm29_vm2, %v6934_v47, 0.0  ;;  %v6938_v7 = vpop.eup %6527 }
 0x2bc   :  { %v556_v38 = vsel %vm29_vm2, %v6938_v7, 0.0 }
 0x2bd   :  { %832 = vrot.lane.b32.xlu0 %v6836_v29, %s6700_s22 }
 0x2cc   :  { %881 = vrot.lane.b32.xlu1 %v6850_v33, %s6700_s22 }
 0x2d8   :  { %v540_v49 = vpop.xlane.xlu0 %539 }
 0x2d9   :  { %6529 = vrcp.f32 %v540_v49 }
 0x2dc   :  { %551 = vadd.xlane.f32.xlu0 %v550_v50  ;;  %v543_v52 = vpop.xlane.xlu1 %542 }
 0x2dd   :  { %6531 = vrcp.f32 %v543_v52 }
 0x2e0   :  { %557 = vadd.xlane.f32.xlu0 %v556_v38 }
 0x2e6   :  { %v6530_v53 = vpop.eup %6529 }
 0x2e7   :  { %v563_v54 = vmul.f32 %v6530_v53, %v6514_v59  ;;  %v784_v59 = vpop.permute.xlu1 %783 }
 0x2e8   :  { %v789_v9 = vsel %vm33_vm0, %v784_v59, 0 }
 0x2e9   :  { %v578_v55 = vpack.c.bf16 %v563_v54, %v563_v54 }
 0x2ea   :  { %v6532_v56 = vpop.eup %6531 }
 0x2eb   :  { %5939 = vmatmul.mubr.msk.bf16.vlgmr.msra.gmra.mxu1 %vm29_vm2, %v578_v55  ;;  %v565_v60 = vmul.f32 %v6532_v56, %v6516_v61 }
 0x2ec   :  { %5949 = vmatpush3.bf16.msra.mxu1 %v691_v57  ;;  %5950 = vmatprep.mubr.msk.bf16.mxu1 %vm6696_vm1, %v6695_v1 }
 0x2ed   :  { %v579_v62 = vpack.c.bf16 %v565_v60, %v565_v60  ;;  %5960 = vmatprep.subr.bf16.mxu1 %v6695_v1 }
 0x2ef   :  { %5945 = vmatmul.mubr.msk.bf16.vlgmr.msra.gmra.mxu0 %vm29_vm2, %v579_v62 }
 0x2f0   :  { %5955 = vmatpush3.bf16.msra.mxu0 %v740_v0  ;;  %5956 = vmatprep.mubr.msk.bf16.mxu0 %vm6696_vm1, %v6695_v1 }
 0x2f1   :  { %5966 = vmatprep.subr.bf16.mxu0 %v6695_v1 }
 0x2f6   :  { %930 = vrot.lane.b32.xlu0 %v6864_v37, %s6700_s22 }
 0x330   :  { %v546_v61 = vpop.xlane.xlu0 %545 }
 0x331   :  { %6533 = vrcp.f32 %v546_v61 }
 0x334   :  { %v549_v2 = vpop.xlane.xlu1 %548  ;;  %v833_v15 = vpop.permute.xlu0 %832 }
 0x335   :  { %6535 = vrcp.f32 %v549_v2  ;;  %v838_v25 = vsel %vm33_vm0, %v833_v15, 0 }
 0x33c   :  { %v555_v46 = vpop.xlane.xlu1 %554 }
 0x33d   :  { %6537 = vrcp.f32 %v555_v46 }
 0x33e   :  { %v6534_v3 = vpop.eup %6533 }
 0x33f   :  { %v567_v51 = vmul.f32 %v6534_v3, %v6912_v12 }
 0x341   :  { %v580_v4 = vpack.c.bf16 %v567_v51, %v567_v51 }
 0x342   :  { %v6536_v5 = vpop.eup %6535 }
 0x343   :  { %5951 = vmatmul.mubr.msk.bf16.vlgmr.msra.gmra.mxu1 %vm29_vm2, %v580_v4  ;;  %v569_v11 = vmul.f32 %v6536_v5, %v6916_v28 }
 0x344   :  { %5961 = vmatpush3.bf16.msra.mxu1 %v789_v9  ;;  %5962 = vmatprep.mubr.msk.bf16.mxu1 %vm6696_vm1, %v6695_v1  ;;  %v561_v63 = vpop.xlane.xlu1 %560 }
 0x345   :  { %v581_v16 = vpack.c.bf16 %v569_v11, %v569_v11  ;;  %5972 = vmatprep.subr.bf16.mxu1 %v6695_v1  ;;  %6539 = vrcp.f32 %v561_v63 }
 0x347   :  { %5957 = vmatmul.mubr.msk.bf16.vlgmr.msra.gmra.mxu0 %vm29_vm2, %v581_v16 }
 0x348   :  { %5967 = vmatpush3.bf16.msra.mxu0 %v838_v25  ;;  %5968 = vmatprep.mubr.msk.bf16.mxu0 %vm6696_vm1, %v6695_v1  ;;  %v882_v45 = vpop.permute.xlu1 %881  ;;  %v6493_v25 = vld [vmem:[%s8072_s1 + $0x50] sm:$0xff]  }
 0x349   :  { %5978 = vmatprep.subr.bf16.mxu0 %v6695_v1 }
 0x34a   :  { %v6538_v12 = vpop.eup %6537 }
 0x34b   :  { %v573_v28 = vmul.f32 %v6538_v12, %v6920_v30 }
 0x34d   :  { %v583_v58 = vpack.c.bf16 %v573_v28, %v573_v28 }
 0x34f   :  { %5969 = vmatmul.mubr.msk.bf16.vlgmr.msra.gmra.mxu0 %vm29_vm2, %v583_v58  ;;  %v6494_v58 = vld [vmem:[%s8072_s1 + $0x48] sm:$0xff]  }
 0x350   :  { %5980 = vmatprep.mubr.msk.bf16.mxu0 %vm6696_vm1, %v6695_v1 }
 0x352   :  { %v6540_v35 = vpop.eup %6539 }
 0x353   :  { %v577_v40 = vmul.f32 %v6540_v35, %v6924_v34  ;;  %v887_v34 = vsel %vm33_vm0, %v882_v45, 0 }
 0x355   :  { %v585_v30 = vpack.c.bf16 %v577_v40, %v577_v40 }
 0x365   :  { %v552_v20 = vpop.xlane.xlu0 %551 }
 0x366   :  { %6541 = vrcp.f32 %v552_v20 }
 0x369   :  { %v558_v39 = vpop.xlane.xlu0 %557 }
 0x36a   :  { %6543 = vrcp.f32 %v558_v39 }
 0x36d   :  { %v931_v41 = vpop.permute.xlu0 %930 }
 0x36e   :  { %v936_v42 = vsel %vm33_vm0, %v931_v41, 0 }
 0x36f   :  { %5979 = vmatpush3.bf16.msra.mxu0 %v936_v42 }
 0x370   :  { %5992 = vmatprep.subr.bf16.mxu0 %v6695_v1 }
 0x372   :  { %5981 = vmatmul.mubr.msk.bf16.vlgmr.msra.gmra.mxu0 %vm29_vm2, %v585_v30 }
 0x373   :  { %v6542_v43 = vpop.eup %6541  ;;  %5996 = vmatprep.mubr.msk.bf16.mxu0 %vm6696_vm1, %v6695_v1 }
 0x374   :  { %v571_v44 = vmul.f32 %v6542_v43, %v6934_v47 }
 0x376   :  { %v582_v48 = vpack.c.bf16 %v571_v44, %v571_v44 }
 0x377   :  { %v6544_v49 = vpop.eup %6543 }
 0x378   :  { %5963 = vmatmul.mubr.msk.bf16.vlgmr.msra.gmra.mxu1 %vm29_vm2, %v582_v48  ;;  %v575_v50 = vmul.f32 %v6544_v49, %v6938_v7 }
 0x379   :  { %5973 = vmatpush3.bf16.msra.mxu1 %v887_v34  ;;  %5974 = vmatprep.mubr.msk.bf16.mxu1 %vm6696_vm1, %v6695_v1 }
 0x37a   :  { %5984 = vmatprep.subr.bf16.mxu1 %v6695_v1  ;;  %v584_v52 = vpack.c.bf16 %v575_v50, %v575_v50 }
 0x380   :  { %5975 = vmatmul.mubr.msk.bf16.vlgmr.msra.gmra.mxu1 %vm29_vm2, %v584_v52 }
 0x381   :  { %5988 = vmatprep.mubr.msk.bf16.mxu1 %vm6696_vm1, %v6695_v1  ;;  %5985 = vmatpush3.bf16.msra.mxu1 %v6493_v25 }
 0x382   :  { %5986 = vmatprep.subr.bf16.mxu1 %v6695_v1 }
 0x385   :  { %5987 = vmatpush3.bf16.msra.mxu1 %v6494_v58 }
 0x386   :  { %6000 = vmatprep.subr.bf16.mxu1 %v6695_v1 }
 0x3ab   :  { %v629_v47 = vpop.f32.mrf.mxu1 }
 0x3ac   :  { %v978_v52 = vadd.f32 %v629_v47, %v6766_v13 }
 0x3ad   :  { %v5940_v38 = vpop.f32.mrf.mxu1 }
 0x3af   :  { %v632_v53 = vpop.f32.mrf.mxu1  ;;  %v678_v54 = vpop.f32.mrf.mxu0 }
 0x3b1   :  { %v5941_v55 = vpop.f32.mrf.mxu1  ;;  %v5946_v56 = vpop.f32.mrf.mxu0 }
 0x3b3   :  { %v681_v57 = vpop.f32.mrf.mxu0 }
 0x3b5   :  { %v5947_v60 = vpop.f32.mrf.mxu0 }
 0x403   :  { %v727_v62 = vpop.f32.mrf.mxu1 }
 0x404   :  { %v980_v0 = vadd.f32 %v727_v62, %v6829_v27 }
 0x405   :  { %v5952_v7 = vpop.f32.mrf.mxu1 }
 0x406   :  { %988 = vrot.lane.b32.xlu1 %v980_v0, %s6701_s23  ;;  %v5586_v0 = vld [vmem:[%s8073_s2 + $0x5] ss:$0 sm:$0xff] }
 0x407   :  { %v730_v59 = vpop.f32.mrf.mxu1  ;;  %v776_v61 = vpop.f32.mrf.mxu0 }
 0x408   :  { %v981_v2 = vadd.f32 %v776_v61, %v6829_v27 }
 0x409   :  { %v5953_v46 = vpop.f32.mrf.mxu1  ;;  %v5958_v3 = vpop.f32.mrf.mxu0 }
 0x40a   :  { %990 = vrot.lane.b32.xlu0 %v981_v2, %s6701_s23 }
 0x40b   :  { %v779_v51 = vpop.f32.mrf.mxu0 }
 0x40d   :  { %v5959_v4 = vpop.f32.mrf.mxu0 }
 0x40f   :  { %v874_v5 = vpop.f32.mrf.mxu0 }
 0x410   :  { %v983_v9 = vadd.f32 %v874_v5, %v6846_v32 }
 0x411   :  { %v5970_v11 = vpop.f32.mrf.mxu0 }
 0x412   :  { %998 = vrot.lane.b32.xlu0 %v983_v9, %s6702_s24 }
 0x413   :  { %v877_v15 = vpop.f32.mrf.mxu0 }
 0x414   :  { %v5590_v15 = vld [vmem:[%s8073_s2 + $0x2] ss:$0 sm:$0xff] }
 0x415   :  { %v5971_v16 = vpop.f32.mrf.mxu0 }
 0x432   :  { %v972_v27 = vpop.f32.mrf.mxu0 }
 0x433   :  { %v985_v12 = vadd.f32 %v972_v27, %v6860_v36 }
 0x434   :  { %v5982_v28 = vpop.f32.mrf.mxu0 }
 0x435   :  { %1006 = vrot.lane.b32.xlu0 %v985_v12, %s6703_s27 }
 0x436   :  { %v975_v63 = vpop.f32.mrf.mxu0 }
 0x438   :  { %v825_v20 = vpop.f32.mrf.mxu1  ;;  %v5983_v35 = vpop.f32.mrf.mxu0 }
 0x439   :  { %v982_v39 = vadd.f32 %v825_v20, %v6846_v32  ;;  %1183 = vrot.lane.b32.xlu0 %v6757_v8, %s6704_s30  ;;  %v979_v8 = vadd.f32 %v678_v54, %v6766_v13  ;;  %v6495_v13 = vld [vmem:[%s8072_s1 + $0x20] sm:$0xff]   ;;  %v6496_v54 = vld [vmem:[%s8072_s1 + $0x18] sm:$0xff]  }
 0x43a   :  { %v5964_v40 = vpop.f32.mrf.mxu1  ;;  %5993 = vmatpush3.bf16.msra.mxu0 %v6495_v13 }
 0x43b   :  { %996 = vrot.lane.b32.xlu1 %v982_v39, %s6702_s24  ;;  %5994 = vmatprep.subr.bf16.mxu0 %v6695_v1 }
 0x43c   :  { %v828_v41 = vpop.f32.mrf.mxu1 }
 0x43e   :  { %v5965_v42 = vpop.f32.mrf.mxu1  ;;  %5995 = vmatpush3.bf16.msra.mxu0 %v6496_v54 }
 0x43f   :  { %6006 = vmatprep.subr.bf16.mxu0 %v6695_v1 }
 0x440   :  { %v923_v30 = vpop.f32.mrf.mxu1 }
 0x441   :  { %v984_v43 = vadd.f32 %v923_v30, %v6860_v36 }
 0x442   :  { %v5976_v44 = vpop.f32.mrf.mxu1 }
 0x443   :  { %1004 = vrot.lane.b32.xlu1 %v984_v43, %s6703_s27 }
 0x444   :  { %v926_v45 = vpop.f32.mrf.mxu1 }
 0x446   :  { %v5977_v48 = vpop.f32.mrf.mxu1 }
 0x478   :  { %v989_v34 = vpop.permute.xlu1 %988 }
 0x479   :  { %v1010_v53 = vsel %vm29_vm2, %v978_v52, %v989_v34 }
 0x47c   :  { %v991_v49 = vpop.permute.xlu0 %990 }
 0x47d   :  { %v1011_v36 = vsel %vm29_vm2, %v979_v8, %v991_v49 }
 0x484   :  { %v999_v32 = vpop.permute.xlu0 %998 }
 0x485   :  { %v1014_v55 = vsel %vm1012_vm3, %v1011_v36, %v999_v32 }
 0x4a7   :  { %v1007_v38 = vpop.permute.xlu0 %1006 }
 0x4a8   :  { %v1017_v60 = vsel %vm1015_vm4, %v1014_v55, %v1007_v38 }
 0x4ab   :  { %v1184_v41 = vpop.permute.xlu0 %1183 }
 0x4ad   :  { %v997_v50 = vpop.permute.xlu1 %996 }
 0x4ae   :  { %v1013_v56 = vsel %vm1012_vm3, %v1010_v53, %v997_v50 }
 0x4b5   :  { %v1005_v57 = vpop.permute.xlu1 %1004 }
 0x4b6   :  { %v1016_v62 = vsel %vm1015_vm4, %v1013_v56, %v1005_v57 }
 0x4b7   :  { %v1018_v47 = vpack.c.bf16 %v1017_v60, %v1016_v62 }
 0x4b9   :  { %5989 = vmatmul.mubr.msk.bf16.vlgmr.msra.gmra.mxu1 %vm1035_vm5, %v1018_v47 }
 0x4ba   :  { %6002 = vmatprep.mubr.msk.bf16.mxu1 %vm6696_vm1, %v6695_v1 }
 0x579   :  { %v1073_v7 = vpop.f32.mrf.mxu1 }
 0x57a   :  { %v1074_v59 = vadd.f32 %v5586_v0, %v1073_v7 }
 0x57b   :  { %v5990_v61 = vpop.f32.mrf.mxu1 }
 0x57c   :  { %v1080_v46 = vmax.f32 %v1074_v59, 0.0 }
 0x57d   :  { %v1076_v2 = vpop.f32.mrf.mxu1 }
 0x57e   :  { %v1077_v3 = vadd.f32 %v5586_v0, %v1076_v2  ;;  %v1082_v5 = vadd.f32 %v1080_v46, %v1016_v62 }
 0x57f   :  { %v5991_v51 = vpop.f32.mrf.mxu1 }
 0x580   :  { %v1081_v4 = vmax.f32 %v1077_v3, 0.0 }
 0x582   :  { %v1083_v9 = vadd.f32 %v1081_v4, %v1017_v60 }
 0x584   :  { %v1084_v11 = vpack.c.bf16 %v1083_v9, %v1082_v5 }
 0x586   :  { %5997 = vmatmul.mubr.msk.bf16.vlgmr.msra.gmra.mxu0 %vm1035_vm5, %v1084_v11 }
 0x587   :  { %6008 = vmatprep.mubr.msk.bf16.mxu0 %vm6696_vm1, %v6695_v1 }
 0x646   :  { %v1143_v16 = vpop.f32.mrf.mxu0 }
 0x647   :  { %v1144_v25 = vadd.f32 %v5590_v15, %v1143_v16 }
 0x648   :  { %v5998_v27 = vpop.f32.mrf.mxu0 }
 0x649   :  { %v1175_v12 = vpack.c.bf16 %v1144_v25, %v1144_v25 }
 0x64a   :  { %v1146_v28 = vpop.f32.mrf.mxu0 }
 0x64b   :  { %v1147_v58 = vadd.f32 %v5590_v15, %v1146_v28  ;;  %v1189_v63 = vsel %vm29_vm2, %v1175_v12, 0 }
 0x64c   :  { %v5999_v20 = vpop.f32.mrf.mxu0  ;;  %6001 = vmatpush3.bf16.xpose.msra.mxu1 %v1189_v63 }
 0x64d   :  { %v6467_v35 = vpack.i.bf16 %v1147_v58, %v1144_v25  ;;  %v7037_v39 = vpack.c.bf16 %v1147_v58, %v1147_v58  ;;  %6012 = vmatprep.subr.bf16.mxu1 %v6695_v1 }
 0x64f   :  { %6468 = vrot.lane.b32.xlu0 %v6467_v35, %s6697_s0  ;;  %6463 = vrot.lane.b32.xlu1 %v6467_v35, %s6698_s18  ;;  %v1237_v40 = vsel %vm29_vm2, %v7037_v39, 0 }
 0x650   :  { %6007 = vmatpush3.bf16.xpose.msra.mxu0 %v1237_v40 }
 0x651   :  { %6018 = vmatprep.subr.bf16.mxu0 %v6695_v1 }
 0x653   :  { %6003 = vmatmul.mubr.msk.bf16.vlgmr.msra.gmra.mxu1 %vm29_vm2, %v1184_v41  ;;  %1327 = vrot.lane.b32.xlu0 %v6818_v23, %s6704_s30 }
 0x654   :  { %1231 = vrot.lane.b32.xlu1 %v6774_v14, %s6704_s30  ;;  %6014 = vmatprep.mubr.msk.bf16.mxu1 %vm6696_vm1, %v6695_v1 }
 0x657   :  { %1375 = vrot.lane.b32.xlu0 %v6823_v24, %s6704_s30 }
 0x658   :  { %1279 = vrot.lane.b32.xlu1 %v6808_v19, %s6704_s30 }
 0x65b   :  { %1471 = vrot.lane.b32.xlu0 %v6850_v33, %s6704_s30 }
 0x65c   :  { %6473 = vrot.lane.b32.xlu1 %v6467_v35, %s6699_s21 }
 0x660   :  { %1423 = vrot.lane.b32.xlu1 %v6836_v29, %s6704_s30 }
 0x664   :  { %1519 = vrot.lane.b32.xlu1 %v6864_v37, %s6704_s30 }
 0x668   :  { %1672 = vrot.lane.b32.xlu1 %v1175_v12, %s6700_s22 }
 0x6c1   :  { %v6464_v14 = vpop.permute.xlu1 %6463  ;;  %v6469_v24 = vpop.permute.xlu0 %6468 }
 0x6c2   :  { %v6466_v23 = vunpack.i.h.bf16 %v6464_v14  ;;  %v6465_v42 = vunpack.i.l.bf16 %v6464_v14  ;;  %v6470_v43 = vunpack.i.l.bf16 %v6469_v24  ;;  %v6471_v45 = vunpack.i.h.bf16 %v6469_v24 }
 0x6c4   :  { %v7064_v30 = vpack.c.bf16 %v6466_v23, %v6466_v23  ;;  %v7066_v19 = vpack.c.bf16 %v6465_v42, %v6465_v42  ;;  %v7077_v37 = vpack.c.bf16 %v6470_v43, %v6470_v43  ;;  %v7079_v49 = vpack.c.bf16 %v6471_v45, %v6471_v45 }
 0x6c5   :  { %v1328_v34 = vpop.permute.xlu0 %1327 }
 0x6c6   :  { %v1232_v33 = vpop.permute.xlu1 %1231  ;;  %v1285_v44 = vsel %vm29_vm2, %v7066_v19, 0  ;;  %v1333_v29 = vsel %vm29_vm2, %v7064_v30, 0  ;;  %v1381_v50 = vsel %vm29_vm2, %v7077_v37, 0  ;;  %v1429_v38 = vsel %vm29_vm2, %v7079_v49, 0 }
 0x6c7   :  { %6009 = vmatmul.mubr.msk.bf16.vlgmr.msra.gmra.mxu0 %vm29_vm2, %v1232_v33  ;;  %6013 = vmatpush3.bf16.xpose.msra.mxu1 %v1285_v44 }
 0x6c8   :  { %6019 = vmatpush3.bf16.xpose.msra.mxu0 %v1333_v29  ;;  %6020 = vmatprep.mubr.msk.bf16.mxu0 %vm6696_vm1, %v6695_v1 }
 0x6c9   :  { %6024 = vmatprep.subr.bf16.mxu1 %v6695_v1  ;;  %6030 = vmatprep.subr.bf16.mxu0 %v6695_v1  ;;  %v1376_v56 = vpop.permute.xlu0 %1375 }
 0x6ca   :  { %v1280_v48 = vpop.permute.xlu1 %1279 }
 0x6cd   :  { %v1472_v13 = vpop.permute.xlu0 %1471 }
 0x6ce   :  { %v6474_v32 = vpop.permute.xlu1 %6473  ;;  %6015 = vmatmul.mubr.msk.bf16.vlgmr.msra.gmra.mxu1 %vm29_vm2, %v1280_v48 }
 0x6cf   :  { %v6476_v52 = vunpack.i.h.bf16 %v6474_v32  ;;  %v6475_v8 = vunpack.i.l.bf16 %v6474_v32  ;;  %6021 = vmatmul.mubr.msk.bf16.vlgmr.msra.gmra.mxu0 %vm29_vm2, %v1328_v34  ;;  %6025 = vmatpush3.bf16.xpose.msra.mxu1 %v1381_v50 }
 0x6d0   :  { %6031 = vmatpush3.bf16.xpose.msra.mxu0 %v1429_v38  ;;  %6026 = vmatprep.mubr.msk.bf16.mxu1 %vm6696_vm1, %v6695_v1 }
 0x6d1   :  { %6032 = vmatprep.mubr.msk.bf16.mxu0 %vm6696_vm1, %v6695_v1  ;;  %6036 = vmatprep.subr.bf16.mxu1 %v6695_v1  ;;  %v7092_v53 = vpack.c.bf16 %v6475_v8, %v6475_v8  ;;  %v7095_v55 = vpack.c.bf16 %v6476_v52, %v6476_v52 }
 0x6d2   :  { %v1424_v36 = vpop.permute.xlu1 %1423  ;;  %6042 = vmatprep.subr.bf16.mxu0 %v6695_v1 }
 0x6d3   :  { %v1477_v60 = vsel %vm29_vm2, %v7092_v53, 0  ;;  %v1525_v62 = vsel %vm29_vm2, %v7095_v55, 0 }
 0x6d6   :  { %v1520_v57 = vpop.permute.xlu1 %1519  ;;  %6027 = vmatmul.mubr.msk.bf16.vlgmr.msra.gmra.mxu1 %vm29_vm2, %v1376_v56 }
 0x6d7   :  { %6033 = vmatmul.mubr.msk.bf16.vlgmr.msra.gmra.mxu0 %vm29_vm2, %v1424_v36  ;;  %6037 = vmatpush3.bf16.xpose.msra.mxu1 %v1477_v60 }
 0x6d8   :  { %6043 = vmatpush3.bf16.xpose.msra.mxu0 %v1525_v62  ;;  %6038 = vmatprep.mubr.msk.bf16.mxu1 %vm6696_vm1, %v6695_v1 }
 0x6d9   :  { %6044 = vmatprep.mubr.msk.bf16.mxu0 %vm6696_vm1, %v6695_v1  ;;  %6048 = vmatprep.subr.bf16.mxu1 %v6695_v1 }
 0x6da   :  { %6054 = vmatprep.subr.bf16.mxu0 %v6695_v1  ;;  %v1673_v47 = vpop.permute.xlu1 %1672 }
 0x6db   :  { %v1678_v54 = vsel %vm33_vm0, %v1673_v47, 0 }
 0x6de   :  { %6039 = vmatmul.mubr.msk.bf16.vlgmr.msra.gmra.mxu1 %vm29_vm2, %v1472_v13 }
 0x6df   :  { %6045 = vmatmul.mubr.msk.bf16.vlgmr.msra.gmra.mxu0 %vm29_vm2, %v1520_v57  ;;  %6049 = vmatpush3.bf16.msra.mxu1 %v1678_v54 }
 0x6e0   :  { %6050 = vmatprep.mubr.msk.bf16.mxu1 %vm6696_vm1, %v6695_v1  ;;  %6060 = vmatprep.subr.bf16.mxu1 %v6695_v1 }
 0x6e1   :  { %6056 = vmatprep.mubr.msk.bf16.mxu0 %vm6696_vm1, %v6695_v1 }
 0x713   :  { %v1225_v0 = vpop.f32.mrf.mxu1 }
 0x714   :  { %v1567_v7 = vmul.f32 0.17677669, %v1225_v0 }
 0x715   :  { %v6004_v59 = vpop.f32.mrf.mxu1 }
 0x716   :  { %v1575_v61 = vsel %vm29_vm2, %v1567_v7, -inf }
 0x717   :  { %v1228_v2 = vpop.f32.mrf.mxu1  ;;  %1576 = vmax.xlane.f32.xlu0 %v1575_v61 }
 0x719   :  { %v6005_v46 = vpop.f32.mrf.mxu1 }
 0x787   :  { %v1273_v3 = vpop.f32.mrf.mxu0 }
 0x788   :  { %v1568_v51 = vmul.f32 0.17677669, %v1273_v3 }
 0x789   :  { %v6010_v4 = vpop.f32.mrf.mxu0 }
 0x78a   :  { %v1578_v5 = vsel %vm29_vm2, %v1568_v51, -inf }
 0x78b   :  { %1579 = vmax.xlane.f32.xlu1 %v1578_v5  ;;  %v1276_v9 = vpop.f32.mrf.mxu0 }
 0x78d   :  { %v6011_v11 = vpop.f32.mrf.mxu0 }
 0x78e   :  { %v1321_v15 = vpop.f32.mrf.mxu1 }
 0x78f   :  { %v1569_v16 = vmul.f32 0.17677669, %v1321_v15  ;;  %v1369_v25 = vpop.f32.mrf.mxu0 }
 0x790   :  { %v6016_v27 = vpop.f32.mrf.mxu1  ;;  %v1570_v12 = vmul.f32 0.17677669, %v1369_v25 }
 0x791   :  { %v6022_v28 = vpop.f32.mrf.mxu0  ;;  %v1581_v58 = vsel %vm29_vm2, %v1569_v16, -inf }
 0x792   :  { %1582 = vmax.xlane.f32.xlu0 %v1581_v58  ;;  %v1324_v63 = vpop.f32.mrf.mxu1  ;;  %v1584_v41 = vsel %vm29_vm2, %v1570_v12, -inf }
 0x793   :  { %v1372_v20 = vpop.f32.mrf.mxu0 }
 0x794   :  { %v6017_v35 = vpop.f32.mrf.mxu1 }
 0x795   :  { %v6023_v40 = vpop.f32.mrf.mxu0 }
 0x796   :  { %v1417_v14 = vpop.f32.mrf.mxu1  ;;  %1585 = vmax.xlane.f32.xlu0 %v1584_v41 }
 0x797   :  { %v7121_v23 = vmul.f32 0.17677669, %v1417_v14  ;;  %v1465_v42 = vpop.f32.mrf.mxu0 }
 0x798   :  { %v7123_v24 = vmul.f32 0.17677669, %v1465_v42  ;;  %v6028_v43 = vpop.f32.mrf.mxu1 }
 0x799   :  { %v6034_v33 = vpop.f32.mrf.mxu0  ;;  %v1587_v44 = vsel %vm29_vm2, %v7121_v23, -inf }
 0x79a   :  { %v1420_v29 = vpop.f32.mrf.mxu1  ;;  %1588 = vmax.xlane.f32.xlu1 %v1587_v44  ;;  %v1590_v45 = vsel %vm29_vm2, %v7123_v24, -inf }
 0x79b   :  { %1591 = vmax.xlane.f32.xlu0 %v1590_v45  ;;  %v1468_v48 = vpop.f32.mrf.mxu0 }
 0x79c   :  { %v6029_v34 = vpop.f32.mrf.mxu1 }
 0x79d   :  { %v6035_v32 = vpop.f32.mrf.mxu0 }
 0x79e   :  { %v1513_v50 = vpop.f32.mrf.mxu1 }
 0x79f   :  { %v1573_v52 = vmul.f32 0.17677669, %v1513_v50  ;;  %v1561_v8 = vpop.f32.mrf.mxu0 }
 0x7a0   :  { %v1574_v38 = vmul.f32 0.17677669, %v1561_v8  ;;  %v6040_v36 = vpop.f32.mrf.mxu1  ;;  %v1577_v0 = vpop.xlane.xlu0 %1576 }
 0x7a1   :  { %v6046_v56 = vpop.f32.mrf.mxu0  ;;  %v1593_v57 = vsel %vm29_vm2, %v1573_v52, -inf  ;;  %v1599_v59 = vsub.f32 %v1567_v7, %v1577_v0 }
 0x7a2   :  { %v1516_v60 = vpop.f32.mrf.mxu1  ;;  %1594 = vmax.xlane.f32.xlu1 %v1593_v57  ;;  %v1596_v62 = vsel %vm29_vm2, %v1574_v38, -inf }
 0x7a3   :  { %1597 = vmax.xlane.f32.xlu0 %v1596_v62  ;;  %v1564_v47 = vpop.f32.mrf.mxu0  ;;  %v1607_v61 = vmul.f32 1.442695, %v1599_v59 }
 0x7a4   :  { %v6041_v13 = vpop.f32.mrf.mxu1 }
 0x7a5   :  { %v6047_v54 = vpop.f32.mrf.mxu0  ;;  %6545 = vpow2.f32 %v1607_v61 }
 0x7b2   :  { %v7137_v2 = vpop.eup %6545 }
 0x7b3   :  { %1770 = vrot.lane.b32.xlu1 %v7066_v19, %s6700_s22  ;;  %v1623_v46 = vsel %vm29_vm2, %v7137_v2, 0.0 }
 0x7b7   :  { %1819 = vrot.lane.b32.xlu1 %v7064_v30, %s6700_s22 }
 0x7b9   :  { %1721 = vrot.lane.b32.xlu0 %v7037_v39, %s6700_s22 }
 0x7db   :  { %1624 = vadd.xlane.f32.xlu1 %v1623_v46 }
 0x814   :  { %v1580_v3 = vpop.xlane.xlu1 %1579 }
 0x815   :  { %v1600_v4 = vsub.f32 %v1568_v51, %v1580_v3 }
 0x817   :  { %v1609_v5 = vmul.f32 1.442695, %v1600_v4 }
 0x819   :  { %6547 = vpow2.f32 %v1609_v5 }
 0x81b   :  { %v1583_v19 = vpop.xlane.xlu0 %1582 }
 0x81c   :  { %v1601_v9 = vsub.f32 %v1569_v16, %v1583_v19 }
 0x81e   :  { %v1611_v30 = vmul.f32 1.442695, %v1601_v9 }
 0x81f   :  { %v1586_v11 = vpop.xlane.xlu0 %1585 }
 0x820   :  { %6549 = vpow2.f32 %v1611_v30  ;;  %v1602_v39 = vsub.f32 %v1570_v12, %v1586_v11 }
 0x822   :  { %v1613_v15 = vmul.f32 1.442695, %v1602_v39 }
 0x823   :  { %v1589_v35 = vpop.xlane.xlu1 %1588 }
 0x824   :  { %6551 = vpow2.f32 %v1613_v15  ;;  %v1592_v27 = vpop.xlane.xlu0 %1591  ;;  %v1603_v40 = vsub.f32 %v7121_v23, %v1589_v35 }
 0x825   :  { %v1604_v14 = vsub.f32 %v7123_v24, %v1592_v27 }
 0x826   :  { %v7141_v7 = vpop.eup %6547  ;;  %v1615_v42 = vmul.f32 1.442695, %v1603_v40 }
 0x827   :  { %v1626_v25 = vsel %vm29_vm2, %v7141_v7, 0.0  ;;  %v1617_v33 = vmul.f32 1.442695, %v1604_v14 }
 0x828   :  { %1627 = vadd.xlane.f32.xlu0 %v1626_v25  ;;  %6553 = vpow2.f32 %v1615_v42 }
 0x829   :  { %6555 = vpow2.f32 %v1617_v33 }
 0x82b   :  { %v1595_v41 = vpop.xlane.xlu1 %1594 }
 0x82c   :  { %v1598_v28 = vpop.xlane.xlu0 %1597  ;;  %v1605_v43 = vsub.f32 %v1573_v52, %v1595_v41 }
 0x82d   :  { %v7145_v58 = vpop.eup %6549  ;;  %v1606_v29 = vsub.f32 %v1574_v38, %v1598_v28 }
 0x82e   :  { %v1629_v51 = vsel %vm29_vm2, %v7145_v58, 0.0  ;;  %v1619_v44 = vmul.f32 1.442695, %v1605_v43 }
 0x82f   :  { %1630 = vadd.xlane.f32.xlu1 %v1629_v51  ;;  %v1621_v45 = vmul.f32 1.442695, %v1606_v29  ;;  %v1771_v48 = vpop.permute.xlu1 %1770 }
 0x830   :  { %v1722_v16 = vpop.permute.xlu0 %1721  ;;  %6557 = vpow2.f32 %v1619_v44  ;;  %v1776_v60 = vsel %vm33_vm0, %v1771_v48, 0 }
 0x831   :  { %v7149_v63 = vpop.eup %6551  ;;  %v1727_v12 = vsel %vm33_vm0, %v1722_v16, 0  ;;  %6559 = vpow2.f32 %v1621_v45 }
 0x832   :  { %6055 = vmatpush3.bf16.msra.mxu0 %v1727_v12  ;;  %v1632_v20 = vsel %vm29_vm2, %v7149_v63, 0.0 }
 0x833   :  { %1633 = vadd.xlane.f32.xlu0 %v1632_v20  ;;  %6066 = vmatprep.subr.bf16.mxu0 %v6695_v1  ;;  %v1820_v34 = vpop.permute.xlu1 %1819 }
 0x834   :  { %v1825_v61 = vsel %vm33_vm0, %v1820_v34, 0 }
 0x840   :  { %1917 = vrot.lane.b32.xlu1 %v7079_v49, %s6700_s22  ;;  %v7161_v49 = vpop.eup %6553 }
 0x841   :  { %v1635_v23 = vsel %vm29_vm2, %v7161_v49, 0.0 }
 0x849   :  { %1868 = vrot.lane.b32.xlu0 %v7077_v37, %s6700_s22  ;;  %v7163_v37 = vpop.eup %6555 }
 0x84a   :  { %v7167_v24 = vpop.eup %6557  ;;  %v1638_v52 = vsel %vm29_vm2, %v7163_v37, 0.0 }
 0x84b   :  { %v1641_v50 = vsel %vm29_vm2, %v7167_v24, 0.0  ;;  %v7173_v8 = vpop.eup %6559 }
 0x84c   :  { %v1644_v38 = vsel %vm29_vm2, %v7173_v8, 0.0 }
 0x864   :  { %1636 = vadd.xlane.f32.xlu1 %v1635_v23  ;;  %v1625_v32 = vpop.xlane.xlu1 %1624 }
 0x865   :  { %6561 = vrcp.f32 %v1625_v32 }
 0x868   :  { %1642 = vadd.xlane.f32.xlu1 %v1641_v50  ;;  %1639 = vadd.xlane.f32.xlu0 %v1638_v52 }
 0x86c   :  { %1645 = vadd.xlane.f32.xlu0 %v1644_v38 }
 0x872   :  { %v6562_v36 = vpop.eup %6561 }
 0x873   :  { %v1648_v56 = vmul.f32 %v6562_v36, %v7137_v2 }
 0x875   :  { %v1663_v57 = vpack.c.bf16 %v1648_v56, %v1648_v56 }
 0x877   :  { %6051 = vmatmul.mubr.msk.bf16.vlgmr.msra.gmra.mxu1 %vm29_vm2, %v1663_v57 }
 0x878   :  { %6061 = vmatpush3.bf16.msra.mxu1 %v1776_v60  ;;  %6062 = vmatprep.mubr.msk.bf16.mxu1 %vm6696_vm1, %v6695_v1 }
 0x879   :  { %2015 = vrot.lane.b32.xlu1 %v7095_v55, %s6700_s22  ;;  %6072 = vmatprep.subr.bf16.mxu1 %v6695_v1 }
 0x882   :  { %1966 = vrot.lane.b32.xlu0 %v7092_v53, %s6700_s22 }
 0x8b1   :  { %v1628_v62 = vpop.xlane.xlu0 %1627 }
 0x8b2   :  { %6563 = vrcp.f32 %v1628_v62 }
 0x8b8   :  { %v1631_v47 = vpop.xlane.xlu1 %1630 }
 0x8b9   :  { %6565 = vrcp.f32 %v1631_v47 }
 0x8bc   :  { %v1634_v13 = vpop.xlane.xlu0 %1633  ;;  %v1918_v19 = vpop.permute.xlu1 %1917 }
 0x8bd   :  { %6567 = vrcp.f32 %v1634_v13  ;;  %v1923_v30 = vsel %vm33_vm0, %v1918_v19, 0 }
 0x8bf   :  { %v6564_v54 = vpop.eup %6563 }
 0x8c0   :  { %v1650_v0 = vmul.f32 %v6564_v54, %v7141_v7  ;;  %v1869_v2 = vpop.permute.xlu0 %1868 }
 0x8c1   :  { %v1874_v4 = vsel %vm33_vm0, %v1869_v2, 0 }
 0x8c2   :  { %v1664_v59 = vpack.c.bf16 %v1650_v0, %v1650_v0 }
 0x8c4   :  { %6057 = vmatmul.mubr.msk.bf16.vlgmr.msra.gmra.mxu0 %vm29_vm2, %v1664_v59 }
 0x8c5   :  { %6067 = vmatpush3.bf16.msra.mxu0 %v1825_v61  ;;  %6068 = vmatprep.mubr.msk.bf16.mxu0 %vm6696_vm1, %v6695_v1 }
 0x8c6   :  { %v6566_v55 = vpop.eup %6565  ;;  %6078 = vmatprep.subr.bf16.mxu0 %v6695_v1 }
 0x8c7   :  { %v1652_v53 = vmul.f32 %v6566_v55, %v7145_v58 }
 0x8c9   :  { %v1665_v46 = vpack.c.bf16 %v1652_v53, %v1652_v53 }
 0x8ca   :  { %v6568_v3 = vpop.eup %6567 }
 0x8cb   :  { %6063 = vmatmul.mubr.msk.bf16.vlgmr.msra.gmra.mxu1 %vm29_vm2, %v1665_v46  ;;  %v1654_v5 = vmul.f32 %v6568_v3, %v7149_v63 }
 0x8cc   :  { %6073 = vmatpush3.bf16.msra.mxu1 %v1874_v4  ;;  %6074 = vmatprep.mubr.msk.bf16.mxu1 %vm6696_vm1, %v6695_v1 }
 0x8cd   :  { %v1666_v9 = vpack.c.bf16 %v1654_v5, %v1654_v5  ;;  %6084 = vmatprep.subr.bf16.mxu1 %v6695_v1 }
 0x8cf   :  { %6069 = vmatmul.mubr.msk.bf16.vlgmr.msra.gmra.mxu0 %vm29_vm2, %v1666_v9 }
 0x8d0   :  { %6079 = vmatpush3.bf16.msra.mxu0 %v1923_v30  ;;  %6080 = vmatprep.mubr.msk.bf16.mxu0 %vm6696_vm1, %v6695_v1 }
 0x8d1   :  { %6090 = vmatprep.subr.bf16.mxu0 %v6695_v1 }
 0x8ed   :  { %v1637_v11 = vpop.xlane.xlu1 %1636 }
 0x8ee   :  { %6569 = vrcp.f32 %v1637_v11 }
 0x8f1   :  { %v1643_v39 = vpop.xlane.xlu1 %1642  ;;  %v1640_v15 = vpop.xlane.xlu0 %1639 }
 0x8f2   :  { %6571 = vrcp.f32 %v1643_v39 }
 0x8f3   :  { %6573 = vrcp.f32 %v1640_v15 }
 0x8f5   :  { %v1646_v7 = vpop.xlane.xlu0 %1645  ;;  %v2016_v20 = vpop.permute.xlu1 %2015 }
 0x8f6   :  { %6575 = vrcp.f32 %v1646_v7  ;;  %v2021_v14 = vsel %vm33_vm0, %v2016_v20, 0 }
 0x8f9   :  { %v1967_v28 = vpop.permute.xlu0 %1966 }
 0x8fa   :  { %v1972_v63 = vsel %vm33_vm0, %v1967_v28, 0 }
 0x8fb   :  { %v6570_v25 = vpop.eup %6569 }
 0x8fc   :  { %v1656_v27 = vmul.f32 %v6570_v25, %v7161_v49  ;;  %v6497_v25 = vld [vmem:[%s8072_s1 + $0x60] sm:$0xff]  }
 0x8fe   :  { %v1667_v58 = vpack.c.bf16 %v1656_v27, %v1656_v27 }
 0x8ff   :  { %v6572_v51 = vpop.eup %6571 }
 0x900   :  { %v6574_v16 = vpop.eup %6573  ;;  %6075 = vmatmul.mubr.msk.bf16.vlgmr.msra.gmra.mxu1 %vm29_vm2, %v1667_v58  ;;  %v1660_v35 = vmul.f32 %v6572_v51, %v7167_v24 }
 0x901   :  { %6085 = vmatpush3.bf16.msra.mxu1 %v1972_v63  ;;  %v1658_v12 = vmul.f32 %v6574_v16, %v7163_v37  ;;  %6086 = vmatprep.mubr.msk.bf16.mxu1 %vm6696_vm1, %v6695_v1 }
 0x902   :  { %6096 = vmatprep.subr.bf16.mxu1 %v6695_v1  ;;  %v1669_v42 = vpack.c.bf16 %v1660_v35, %v1660_v35 }
 0x903   :  { %v1668_v40 = vpack.c.bf16 %v1658_v12, %v1658_v12  ;;  %v6576_v41 = vpop.eup %6575 }
 0x904   :  { %v1662_v43 = vmul.f32 %v6576_v41, %v7173_v8 }
 0x905   :  { %6081 = vmatmul.mubr.msk.bf16.vlgmr.msra.gmra.mxu0 %vm29_vm2, %v1668_v40 }
 0x906   :  { %6091 = vmatpush3.bf16.msra.mxu0 %v2021_v14  ;;  %6092 = vmatprep.mubr.msk.bf16.mxu0 %vm6696_vm1, %v6695_v1  ;;  %v1670_v33 = vpack.c.bf16 %v1662_v43, %v1662_v43 }
 0x907   :  { %6104 = vmatprep.subr.bf16.mxu0 %v6695_v1 }
 0x908   :  { %6087 = vmatmul.mubr.msk.bf16.vlgmr.msra.gmra.mxu1 %vm29_vm2, %v1669_v42 }
 0x909   :  { %6100 = vmatprep.mubr.msk.bf16.mxu1 %vm6696_vm1, %v6695_v1  ;;  %6097 = vmatpush3.bf16.msra.mxu1 %v6497_v25 }
 0x90a   :  { %6098 = vmatprep.subr.bf16.mxu1 %v6695_v1 }
 0x90d   :  { %6093 = vmatmul.mubr.msk.bf16.vlgmr.msra.gmra.mxu0 %vm29_vm2, %v1670_v33 }
 0x90e   :  { %6108 = vmatprep.mubr.msk.bf16.mxu0 %vm6696_vm1, %v6695_v1 }
 0x937   :  { %v1714_v44 = vpop.f32.mrf.mxu1 }
 0x938   :  { %2071 = vrot.lane.b32.xlu0 %v1714_v44, %s6704_s30 }
 0x939   :  { %v6052_v29 = vpop.f32.mrf.mxu1 }
 0x93b   :  { %v1717_v45 = vpop.f32.mrf.mxu1 }
 0x93c   :  { %v6499_v45 = vld [vmem:[%s8072_s1 + $0x10] sm:$0xff]  }
 0x93d   :  { %v6053_v48 = vpop.f32.mrf.mxu1  ;;  %6105 = vmatpush3.bf16.msra.mxu0 %v6499_v45 }
 0x93e   :  { %6106 = vmatprep.subr.bf16.mxu0 %v6695_v1  ;;  %v6500_v48 = vld [vmem:[%s8072_s1 + $0x8] sm:$0xff]  }
 0x941   :  { %6107 = vmatpush3.bf16.msra.mxu0 %v6500_v48 }
 0x942   :  { %6118 = vmatprep.subr.bf16.mxu0 %v6695_v1 }
 0x984   :  { %v1763_v49 = vpop.f32.mrf.mxu0 }
 0x985   :  { %2073 = vrot.lane.b32.xlu1 %v1763_v49, %s6704_s30  ;;  %v5610_v49 = vld [vmem:[%s8073_s2 + $0x6] ss:$0 sm:$0xff] }
 0x986   :  { %v6058_v34 = vpop.f32.mrf.mxu0 }
 0x988   :  { %v1766_v37 = vpop.f32.mrf.mxu0 }
 0x98a   :  { %v6059_v23 = vpop.f32.mrf.mxu0 }
 0x98b   :  { %v1812_v24 = vpop.f32.mrf.mxu1 }
 0x98c   :  { %2075 = vrot.lane.b32.xlu0 %v1812_v24, %s6704_s30 }
 0x98d   :  { %v6064_v32 = vpop.f32.mrf.mxu1 }
 0x98f   :  { %v1815_v50 = vpop.f32.mrf.mxu1  ;;  %v1861_v52 = vpop.f32.mrf.mxu0 }
 0x990   :  { %2077 = vrot.lane.b32.xlu1 %v1861_v52, %s6704_s30 }
 0x991   :  { %v6065_v8 = vpop.f32.mrf.mxu1  ;;  %v6070_v38 = vpop.f32.mrf.mxu0 }
 0x993   :  { %v1864_v36 = vpop.f32.mrf.mxu0 }
 0x995   :  { %v6071_v56 = vpop.f32.mrf.mxu0 }
 0x9aa   :  { %v2072_v0 = vpop.permute.xlu0 %2071 }
 0x9ab   :  { %v2095_v53 = vadd.f32 %v2072_v0, %v6749_v6 }
 0x9c0   :  { %v1910_v57 = vpop.f32.mrf.mxu1 }
 0x9c1   :  { %2079 = vrot.lane.b32.xlu0 %v1910_v57, %s6704_s30  ;;  %v5614_v57 = vld [vmem:[%s8073_s2 + $0x1] ss:$0 sm:$0xff] }
 0x9c2   :  { %v6076_v60 = vpop.f32.mrf.mxu1 }
 0x9c4   :  { %v1913_v62 = vpop.f32.mrf.mxu1 }
 0x9c5   :  { %v1959_v47 = vpop.f32.mrf.mxu0 }
 0x9c6   :  { %2081 = vrot.lane.b32.xlu1 %v1959_v47, %s6704_s30  ;;  %v6077_v13 = vpop.f32.mrf.mxu1 }
 0x9c7   :  { %v6082_v54 = vpop.f32.mrf.mxu0 }
 0x9c8   :  { %v2008_v59 = vpop.f32.mrf.mxu1 }
 0x9c9   :  { %v1962_v61 = vpop.f32.mrf.mxu0  ;;  %2083 = vrot.lane.b32.xlu0 %v2008_v59, %s6704_s30 }
 0x9ca   :  { %v6088_v55 = vpop.f32.mrf.mxu1 }
 0x9cb   :  { %v6083_v2 = vpop.f32.mrf.mxu0  ;;  %v7298_v55 = vld [vmem:[%s8073_s2 + $0x18] sm:$0xff] }
 0x9cc   :  { %v2011_v46 = vpop.f32.mrf.mxu1 }
 0x9cd   :  { %v2057_v3 = vpop.f32.mrf.mxu0  ;;  %2105 = vrot.lane.b32.xlu0 %v2095_v53, %s6704_s30  ;;  %v2316_v46 = vpack.c.bf16 %v7298_v55, %v7298_v55 }
 0x9ce   :  { %2085 = vrot.lane.b32.xlu1 %v2057_v3, %s6704_s30  ;;  %v6089_v4 = vpop.f32.mrf.mxu1 }
 0x9cf   :  { %v6094_v5 = vpop.f32.mrf.mxu0 }
 0x9d1   :  { %v2060_v19 = vpop.f32.mrf.mxu0 }
 0x9d3   :  { %v6095_v9 = vpop.f32.mrf.mxu0 }
 0x9f7   :  { %v2074_v30 = vpop.permute.xlu1 %2073 }
 0x9f8   :  { %v2096_v11 = vadd.f32 %v2074_v30, %v6759_v10 }
 0x9fa   :  { %2107 = vrot.lane.b32.xlu1 %v2096_v11, %s6704_s30 }
 0x9fe   :  { %v2076_v39 = vpop.permute.xlu0 %2075 }
 0x9ff   :  { %v2097_v15 = vadd.f32 %v2076_v39, %v6804_v18  ;;  %v6498_v18 = vld [vmem:[%s8072_s1 + $0x58] sm:$0xff]  }
 0xa00   :  { %6099 = vmatpush3.bf16.msra.mxu1 %v6498_v18 }
 0xa01   :  { %2113 = vrot.lane.b32.xlu0 %v2097_v15, %s6705_s12  ;;  %6112 = vmatprep.subr.bf16.mxu1 %v6695_v1 }
 0xa02   :  { %v2078_v6 = vpop.permute.xlu1 %2077 }
 0xa03   :  { %v2098_v7 = vadd.f32 %v2078_v6, %v6814_v22 }
 0xa05   :  { %2115 = vrot.lane.b32.xlu1 %v2098_v7, %s6705_s12 }
 0xa33   :  { %v2080_v27 = vpop.permute.xlu0 %2079 }
 0xa34   :  { %v2099_v10 = vadd.f32 %v2080_v27, %v6802_v17 }
 0xa36   :  { %2121 = vrot.lane.b32.xlu0 %v2099_v10, %s6706_s17 }
 0xa38   :  { %v2082_v22 = vpop.permute.xlu1 %2081 }
 0xa39   :  { %v2100_v28 = vadd.f32 %v2082_v22, %v6812_v21 }
 0xa3b   :  { %2123 = vrot.lane.b32.xlu1 %v2100_v28, %s6706_s17  ;;  %v2084_v58 = vpop.permute.xlu0 %2083 }
 0xa3c   :  { %v2101_v17 = vadd.f32 %v2084_v58, %v6827_v26 }
 0xa3e   :  { %2129 = vrot.lane.b32.xlu0 %v2101_v17, %s6707_s19 }
 0xa3f   :  { %v2106_v63 = vpop.permute.xlu0 %2105 }
 0xa40   :  { %v2086_v51 = vpop.permute.xlu1 %2085 }
 0xa41   :  { %v2102_v16 = vadd.f32 %v2086_v51, %v6841_v31 }
 0xa43   :  { %2131 = vrot.lane.b32.xlu1 %v2102_v16, %s6707_s19 }
 0xa6c   :  { %v2108_v12 = vpop.permute.xlu1 %2107 }
 0xa73   :  { %v2114_v20 = vpop.permute.xlu0 %2113 }
 0xa74   :  { %v2135_v14 = vsel %vm29_vm2, %v2106_v63, %v2114_v20 }
 0xa77   :  { %v2116_v35 = vpop.permute.xlu1 %2115 }
 0xa78   :  { %v2136_v42 = vsel %vm29_vm2, %v2108_v12, %v2116_v35 }
 0xaa8   :  { %v2122_v40 = vpop.permute.xlu0 %2121 }
 0xaa9   :  { %v2137_v26 = vsel %vm1012_vm3, %v2135_v14, %v2122_v40 }
 0xaad   :  { %v2124_v41 = vpop.permute.xlu1 %2123 }
 0xaae   :  { %v2138_v43 = vsel %vm1012_vm3, %v2136_v42, %v2124_v41 }
 0xab0   :  { %v2130_v21 = vpop.permute.xlu0 %2129 }
 0xab1   :  { %v2139_v31 = vsel %vm1015_vm4, %v2137_v26, %v2130_v21 }
 0xab5   :  { %v2132_v33 = vpop.permute.xlu1 %2131 }
 0xab6   :  { %v2140_v44 = vsel %vm1015_vm4, %v2138_v43, %v2132_v33 }
 0xab7   :  { %v2141_v29 = vpack.c.bf16 %v2140_v44, %v2139_v31 }
 0xab9   :  { %6101 = vmatmul.mubr.msk.bf16.vlgmr.msra.gmra.mxu1 %vm1035_vm5, %v2141_v29 }
 0xaba   :  { %6114 = vmatprep.mubr.msk.bf16.mxu1 %vm6696_vm1, %v6695_v1 }
 0xb79   :  { %v2195_v34 = vpop.f32.mrf.mxu1 }
 0xb7a   :  { %v2196_v37 = vadd.f32 %v5610_v49, %v2195_v34 }
 0xb7b   :  { %v6102_v23 = vpop.f32.mrf.mxu1 }
 0xb7c   :  { %v2202_v32 = vmax.f32 %v2196_v37, 0.0 }
 0xb7d   :  { %v2198_v24 = vpop.f32.mrf.mxu1 }
 0xb7e   :  { %v2199_v50 = vadd.f32 %v5610_v49, %v2198_v24  ;;  %v2204_v38 = vadd.f32 %v2202_v32, %v2139_v31 }
 0xb7f   :  { %v6103_v52 = vpop.f32.mrf.mxu1 }
 0xb80   :  { %v2203_v8 = vmax.f32 %v2199_v50, 0.0 }
 0xb82   :  { %v2205_v36 = vadd.f32 %v2203_v8, %v2140_v44 }
 0xb84   :  { %v2206_v56 = vpack.c.bf16 %v2205_v36, %v2204_v38 }
 0xb86   :  { %6109 = vmatmul.mubr.msk.bf16.vlgmr.msra.gmra.mxu0 %vm1035_vm5, %v2206_v56 }
 0xb87   :  { %6120 = vmatprep.mubr.msk.bf16.mxu0 %vm6696_vm1, %v6695_v1 }
 0xc46   :  { %v2265_v60 = vpop.f32.mrf.mxu0 }
 0xc47   :  { %v7283_v62 = vadd.f32 %v5614_v57, %v2265_v60 }
 0xc48   :  { %v6110_v47 = vpop.f32.mrf.mxu0 }
 0xc49   :  { %2280 = vrot.lane.b32.xlu0 %v7283_v62, %s6698_s18  ;;  %v7289_v13 = vpack.c.bf16 %v7283_v62, %v7283_v62 }
 0xc4a   :  { %v2268_v54 = vpop.f32.mrf.mxu0 }
 0xc4b   :  { %v7291_v0 = vadd.f32 %v5614_v57, %v2268_v54  ;;  %v2324_v59 = vsel %vm29_vm2, %v7289_v13, 0 }
 0xc4c   :  { %v6111_v61 = vpop.f32.mrf.mxu0  ;;  %6113 = vmatpush3.bf16.xpose.msra.mxu1 %v2324_v59 }
 0xc4d   :  { %2286 = vrot.lane.b32.xlu0 %v7283_v62, %s6697_s0  ;;  %2282 = vrot.lane.b32.xlu1 %v7291_v0, %s6698_s18  ;;  %v7306_v53 = vpack.c.bf16 %v7291_v0, %v7291_v0 }
 0xc4e   :  { %6124 = vmatprep.subr.bf16.mxu1 %v6695_v1 }
 0xc4f   :  { %v2367_v2 = vsel %vm29_vm2, %v7306_v53, 0 }
 0xc50   :  { %6119 = vmatpush3.bf16.xpose.msra.mxu0 %v2367_v2 }
 0xc51   :  { %2307 = vrot.lane.b32.xlu0 %v7298_v55, %s6698_s18  ;;  %2288 = vrot.lane.b32.xlu1 %v7291_v0, %s6697_s0 }
 0xc52   :  { %6130 = vmatprep.subr.bf16.mxu0 %v6695_v1 }
 0xc53   :  { %6115 = vmatmul.mubr.msk.bf16.vlgmr.msra.gmra.mxu1 %vm29_vm2, %v2316_v46 }
 0xc54   :  { %6126 = vmatprep.mubr.msk.bf16.mxu1 %vm6696_vm1, %v6695_v1 }
 0xc55   :  { %2294 = vrot.lane.b32.xlu0 %v7291_v0, %s6699_s21  ;;  %2292 = vrot.lane.b32.xlu1 %v7283_v62, %s6699_s21 }
 0xc57   :  { %6121 = vmatmul.mubr.msk.bf16.vlgmr.msra.gmra.mxu0 %vm29_vm2, %v2316_v46 }
 0xc58   :  { %6132 = vmatprep.mubr.msk.bf16.mxu0 %vm6696_vm1, %v6695_v1 }
 0xc59   :  { %2313 = vrot.lane.b32.xlu0 %v7298_v55, %s6699_s21  ;;  %2310 = vrot.lane.b32.xlu1 %v7298_v55, %s6697_s0 }
 0xc5d   :  { %2781 = vrot.lane.b32.xlu0 %v7289_v13, %s6700_s22  ;;  %2830 = vrot.lane.b32.xlu1 %v7306_v53, %s6700_s22 }
 0xcbb   :  { %v7336_v3 = vpop.permute.xlu0 %2280 }
 0xcbc   :  { %v7340_v4 = vpack.c.bf16 %v7336_v3, %v7336_v3 }
 0xcbe   :  { %v2413_v5 = vsel %vm29_vm2, %v7340_v4, 0 }
 0xcbf   :  { %v7344_v19 = vpop.permute.xlu0 %2286  ;;  %6125 = vmatpush3.bf16.xpose.msra.mxu1 %v2413_v5  ;;  %v7346_v9 = vpop.permute.xlu1 %2282 }
 0xcc0   :  { %v7350_v30 = vpack.c.bf16 %v7346_v9, %v7346_v9  ;;  %6136 = vmatprep.subr.bf16.mxu1 %v6695_v1  ;;  %v7355_v11 = vpack.c.bf16 %v7344_v19, %v7344_v19 }
 0xcc2   :  { %v2456_v39 = vsel %vm29_vm2, %v7350_v30, 0  ;;  %v2502_v27 = vsel %vm29_vm2, %v7355_v11, 0 }
 0xcc3   :  { %v7359_v15 = vpop.permute.xlu0 %2307  ;;  %v7361_v6 = vpop.permute.xlu1 %2288  ;;  %6131 = vmatpush3.bf16.xpose.msra.mxu0 %v2456_v39 }
 0xcc4   :  { %v2317_v7 = vpack.c.bf16 %v7359_v15, %v7359_v15  ;;  %6142 = vmatprep.subr.bf16.mxu0 %v6695_v1  ;;  %v7368_v25 = vpack.c.bf16 %v7361_v6, %v7361_v6 }
 0xcc6   :  { %6127 = vmatmul.mubr.msk.bf16.vlgmr.msra.gmra.mxu1 %vm29_vm2, %v2317_v7  ;;  %v2545_v28 = vsel %vm29_vm2, %v7368_v25, 0 }
 0xcc7   :  { %6137 = vmatpush3.bf16.xpose.msra.mxu1 %v2502_v27  ;;  %v7373_v10 = vpop.permute.xlu0 %2294  ;;  %v7375_v18 = vpop.permute.xlu1 %2292  ;;  %6138 = vmatprep.mubr.msk.bf16.mxu1 %vm6696_vm1, %v6695_v1 }
 0xcc8   :  { %6148 = vmatprep.subr.bf16.mxu1 %v6695_v1  ;;  %v7382_v22 = vpack.c.bf16 %v7375_v18, %v7375_v18  ;;  %v7398_v16 = vpack.c.bf16 %v7373_v10, %v7373_v10 }
 0xcca   :  { %6133 = vmatmul.mubr.msk.bf16.vlgmr.msra.gmra.mxu0 %vm29_vm2, %v2317_v7  ;;  %v2591_v63 = vsel %vm29_vm2, %v7382_v22, 0  ;;  %v2634_v20 = vsel %vm29_vm2, %v7398_v16, 0 }
 0xccb   :  { %v7387_v58 = vpop.permute.xlu1 %2310  ;;  %6143 = vmatpush3.bf16.xpose.msra.mxu0 %v2545_v28  ;;  %6144 = vmatprep.mubr.msk.bf16.mxu0 %vm6696_vm1, %v6695_v1  ;;  %v7394_v51 = vpop.permute.xlu0 %2313 }
 0xccc   :  { %v2318_v17 = vpack.c.bf16 %v7387_v58, %v7387_v58  ;;  %6154 = vmatprep.subr.bf16.mxu0 %v6695_v1  ;;  %v2319_v12 = vpack.c.bf16 %v7394_v51, %v7394_v51 }
 0xcce   :  { %6139 = vmatmul.mubr.msk.bf16.vlgmr.msra.gmra.mxu1 %vm29_vm2, %v2318_v17 }
 0xccf   :  { %6149 = vmatpush3.bf16.xpose.msra.mxu1 %v2591_v63  ;;  %6150 = vmatprep.mubr.msk.bf16.mxu1 %vm6696_vm1, %v6695_v1  ;;  %v2782_v35 = vpop.permute.xlu0 %2781  ;;  %v2831_v41 = vpop.permute.xlu1 %2830 }
 0xcd0   :  { %6160 = vmatprep.subr.bf16.mxu1 %v6695_v1  ;;  %v2787_v40 = vsel %vm33_vm0, %v2782_v35, 0  ;;  %v2836_v21 = vsel %vm33_vm0, %v2831_v41, 0 }
 0xcd2   :  { %6145 = vmatmul.mubr.msk.bf16.vlgmr.msra.gmra.mxu0 %vm29_vm2, %v2318_v17 }
 0xcd3   :  { %6155 = vmatpush3.bf16.xpose.msra.mxu0 %v2634_v20  ;;  %6156 = vmatprep.mubr.msk.bf16.mxu0 %vm6696_vm1, %v6695_v1 }
 0xcd4   :  { %6166 = vmatprep.subr.bf16.mxu0 %v6695_v1 }
 0xcd6   :  { %6151 = vmatmul.mubr.msk.bf16.vlgmr.msra.gmra.mxu1 %vm29_vm2, %v2319_v12 }
 0xcd7   :  { %6161 = vmatpush3.bf16.msra.mxu1 %v2787_v40  ;;  %6162 = vmatprep.mubr.msk.bf16.mxu1 %vm6696_vm1, %v6695_v1 }
 0xcd8   :  { %6172 = vmatprep.subr.bf16.mxu1 %v6695_v1 }
 0xcda   :  { %6157 = vmatmul.mubr.msk.bf16.vlgmr.msra.gmra.mxu0 %vm29_vm2, %v2319_v12 }
 0xcdb   :  { %6167 = vmatpush3.bf16.msra.mxu0 %v2836_v21  ;;  %6168 = vmatprep.mubr.msk.bf16.mxu0 %vm6696_vm1, %v6695_v1 }
 0xcdc   :  { %6178 = vmatprep.subr.bf16.mxu0 %v6695_v1 }
 0xd13   :  { %v2360_v14 = vpop.f32.mrf.mxu1 }
 0xd14   :  { %v2676_v42 = vmul.f32 0.17677669, %v2360_v14 }
 0xd15   :  { %v6116_v26 = vpop.f32.mrf.mxu1 }
 0xd16   :  { %v2684_v43 = vsel %vm29_vm2, %v2676_v42, -inf }
 0xd17   :  { %2685 = vmax.xlane.f32.xlu1 %v2684_v43  ;;  %v2403_v33 = vpop.f32.mrf.mxu0  ;;  %v2363_v31 = vpop.f32.mrf.mxu1 }
 0xd18   :  { %v2677_v44 = vmul.f32 0.17677669, %v2403_v33 }
 0xd19   :  { %v6122_v29 = vpop.f32.mrf.mxu0  ;;  %v6117_v45 = vpop.f32.mrf.mxu1 }
 0xd1a   :  { %v2687_v48 = vsel %vm29_vm2, %v2677_v44, -inf }
 0xd1b   :  { %2688 = vmax.xlane.f32.xlu0 %v2687_v48  ;;  %v2406_v49 = vpop.f32.mrf.mxu0 }
 0xd1d   :  { %v6123_v34 = vpop.f32.mrf.mxu0 }
 0xd86   :  { %v2449_v37 = vpop.f32.mrf.mxu1 }
 0xd87   :  { %v2678_v23 = vmul.f32 0.17677669, %v2449_v37 }
 0xd88   :  { %v6128_v24 = vpop.f32.mrf.mxu1 }
 0xd89   :  { %v2690_v32 = vsel %vm29_vm2, %v2678_v23, -inf }
 0xd8a   :  { %v2452_v50 = vpop.f32.mrf.mxu1  ;;  %2691 = vmax.xlane.f32.xlu0 %v2690_v32  ;;  %v2492_v52 = vpop.f32.mrf.mxu0 }
 0xd8b   :  { %v2679_v8 = vmul.f32 0.17677669, %v2492_v52 }
 0xd8c   :  { %v6129_v38 = vpop.f32.mrf.mxu1  ;;  %v6134_v36 = vpop.f32.mrf.mxu0 }
 0xd8d   :  { %v2693_v56 = vsel %vm29_vm2, %v2679_v8, -inf }
 0xd8e   :  { %v2538_v57 = vpop.f32.mrf.mxu1  ;;  %2694 = vmax.xlane.f32.xlu1 %v2693_v56  ;;  %v2495_v60 = vpop.f32.mrf.mxu0 }
 0xd8f   :  { %v7428_v47 = vmul.f32 0.17677669, %v2538_v57 }
 0xd90   :  { %v6135_v54 = vpop.f32.mrf.mxu0  ;;  %v6140_v59 = vpop.f32.mrf.mxu1 }
 0xd91   :  { %v2696_v61 = vsel %vm29_vm2, %v7428_v47, -inf }
 0xd92   :  { %v2541_v2 = vpop.f32.mrf.mxu1  ;;  %2697 = vmax.xlane.f32.xlu0 %v2696_v61  ;;  %v2581_v46 = vpop.f32.mrf.mxu0 }
 0xd93   :  { %v2681_v5 = vmul.f32 0.17677669, %v2581_v46 }
 0xd94   :  { %v6141_v39 = vpop.f32.mrf.mxu1  ;;  %v6146_v7 = vpop.f32.mrf.mxu0 }
 0xd95   :  { %v2699_v27 = vsel %vm29_vm2, %v2681_v5, -inf }
 0xd96   :  { %v2627_v28 = vpop.f32.mrf.mxu1  ;;  %2700 = vmax.xlane.f32.xlu1 %v2699_v27  ;;  %v2584_v17 = vpop.f32.mrf.mxu0 }
 0xd97   :  { %v7433_v63 = vmul.f32 0.17677669, %v2627_v28 }
 0xd98   :  { %v6147_v12 = vpop.f32.mrf.mxu0  ;;  %v6152_v20 = vpop.f32.mrf.mxu1 }
 0xd99   :  { %v2702_v35 = vsel %vm29_vm2, %v7433_v63, -inf }
 0xd9a   :  { %2703 = vmax.xlane.f32.xlu0 %v2702_v35  ;;  %v2670_v40 = vpop.f32.mrf.mxu0  ;;  %v2630_v41 = vpop.f32.mrf.mxu1 }
 0xd9b   :  { %v2683_v21 = vmul.f32 0.17677669, %v2670_v40 }
 0xd9c   :  { %v6158_v14 = vpop.f32.mrf.mxu0  ;;  %v6153_v26 = vpop.f32.mrf.mxu1 }
 0xd9d   :  { %v2705_v43 = vsel %vm29_vm2, %v2683_v21, -inf }
 0xd9e   :  { %2706 = vmax.xlane.f32.xlu1 %v2705_v43  ;;  %v2673_v33 = vpop.f32.mrf.mxu0 }
 0xda0   :  { %v6159_v31 = vpop.f32.mrf.mxu0  ;;  %v2686_v29 = vpop.xlane.xlu1 %2685 }
 0xda1   :  { %v2708_v45 = vsub.f32 %v2676_v42, %v2686_v29 }
 0xda3   :  { %v2716_v49 = vmul.f32 1.442695, %v2708_v45 }
 0xda4   :  { %v2689_v48 = vpop.xlane.xlu0 %2688 }
 0xda5   :  { %v2709_v34 = vsub.f32 %v2677_v44, %v2689_v48  ;;  %6577 = vpow2.f32 %v2716_v49 }
 0xda7   :  { %v2718_v37 = vmul.f32 1.442695, %v2709_v34 }
 0xda9   :  { %6579 = vpow2.f32 %v2718_v37 }
 0xdaf   :  { %2879 = vrot.lane.b32.xlu1 %v7340_v4, %s6700_s22 }
 0xdb0   :  { %2928 = vrot.lane.b32.xlu0 %v7350_v30, %s6700_s22 }
 0xdb2   :  { %v6578_v24 = vpop.eup %6577 }
 0xdb3   :  { %v2732_v32 = vsel %vm29_vm2, %v6578_v24, 0.0 }
 0xdb6   :  { %v6580_v50 = vpop.eup %6579 }
 0xdb7   :  { %v2735_v52 = vsel %vm29_vm2, %v6580_v50, 0.0 }
 0xdcf   :  { %2733 = vadd.xlane.f32.xlu0 %v2732_v32 }
 0xdd3   :  { %2736 = vadd.xlane.f32.xlu1 %v2735_v52 }
 0xde4   :  { %2977 = vrot.lane.b32.xlu1 %v7355_v11, %s6700_s22 }
 0xe13   :  { %v2692_v38 = vpop.xlane.xlu0 %2691 }
 0xe14   :  { %v2710_v36 = vsub.f32 %v2678_v23, %v2692_v38 }
 0xe16   :  { %v2720_v42 = vmul.f32 1.442695, %v2710_v36 }
 0xe17   :  { %v2695_v56 = vpop.xlane.xlu1 %2694 }
 0xe18   :  { %6581 = vpow2.f32 %v2720_v42  ;;  %v2711_v44 = vsub.f32 %v2679_v8, %v2695_v56 }
 0xe1a   :  { %v2722_v57 = vmul.f32 1.442695, %v2711_v44 }
 0xe1b   :  { %v2698_v12 = vpop.xlane.xlu0 %2697 }
 0xe1c   :  { %6583 = vpow2.f32 %v2722_v57  ;;  %v2712_v20 = vsub.f32 %v7428_v47, %v2698_v12 }
 0xe1e   :  { %v2724_v40 = vmul.f32 1.442695, %v2712_v20 }
 0xe1f   :  { %v2701_v60 = vpop.xlane.xlu1 %2700 }
 0xe20   :  { %v2713_v54 = vsub.f32 %v2681_v5, %v2701_v60 }
 0xe22   :  { %v2726_v59 = vmul.f32 1.442695, %v2713_v54 }
 0xe23   :  { %v2704_v35 = vpop.xlane.xlu0 %2703 }
 0xe24   :  { %6585 = vpow2.f32 %v2726_v59  ;;  %v2714_v41 = vsub.f32 %v7433_v63, %v2704_v35 }
 0xe25   :  { %v7446_v61 = vpop.eup %6581 }
 0xe26   :  { %v2738_v2 = vsel %vm29_vm2, %v7446_v61, 0.0 }
 0xe27   :  { %2739 = vadd.xlane.f32.xlu0 %v2738_v2  ;;  %v2707_v46 = vpop.xlane.xlu1 %2706  ;;  %v2929_v14 = vpop.permute.xlu0 %2928 }
 0xe28   :  { %v2715_v39 = vsub.f32 %v2683_v21, %v2707_v46  ;;  %v2728_v21 = vmul.f32 1.442695, %v2714_v41  ;;  %v2934_v38 = vsel %vm33_vm0, %v2929_v14, 0 }
 0xe29   :  { %v7450_v7 = vpop.eup %6583 }
 0xe2a   :  { %v2730_v23 = vmul.f32 1.442695, %v2715_v39  ;;  %v2741_v8 = vsel %vm29_vm2, %v7450_v7, 0.0 }
 0xe2b   :  { %2742 = vadd.xlane.f32.xlu1 %v2741_v8  ;;  %v2880_v43 = vpop.permute.xlu1 %2879 }
 0xe2c   :  { %6587 = vpow2.f32 %v2730_v23  ;;  %v2885_v37 = vsel %vm33_vm0, %v2880_v43, 0 }
 0xe2d   :  { %6589 = vpow2.f32 %v2724_v40 }
 0xe2e   :  { %6591 = vpow2.f32 %v2728_v21 }
 0xe31   :  { %v7454_v27 = vpop.eup %6585 }
 0xe32   :  { %v2747_v5 = vsel %vm29_vm2, %v7454_v27, 0.0 }
 0xe33   :  { %2748 = vadd.xlane.f32.xlu1 %v2747_v5 }
 0xe39   :  { %v7458_v28 = vpop.eup %6587 }
 0xe3a   :  { %v2753_v17 = vsel %vm29_vm2, %v7458_v28, 0.0  ;;  %v7468_v26 = vpop.eup %6589 }
 0xe3b   :  { %2754 = vadd.xlane.f32.xlu1 %v2753_v17  ;;  %v2744_v31 = vsel %vm29_vm2, %v7468_v26, 0.0  ;;  %v7472_v47 = vpop.eup %6591 }
 0xe3c   :  { %v2750_v63 = vsel %vm29_vm2, %v7472_v47, 0.0 }
 0xe3d   :  { %3026 = vrot.lane.b32.xlu0 %v7368_v25, %s6700_s22 }
 0xe4c   :  { %3075 = vrot.lane.b32.xlu1 %v7382_v22, %s6700_s22 }
 0xe58   :  { %v2734_v33 = vpop.xlane.xlu0 %2733 }
 0xe59   :  { %6593 = vrcp.f32 %v2734_v33 }
 0xe5c   :  { %2745 = vadd.xlane.f32.xlu0 %v2744_v31  ;;  %v2737_v29 = vpop.xlane.xlu1 %2736 }
 0xe5d   :  { %6595 = vrcp.f32 %v2737_v29 }
 0xe60   :  { %2751 = vadd.xlane.f32.xlu0 %v2750_v63 }
 0xe66   :  { %v6594_v45 = vpop.eup %6593 }
 0xe67   :  { %v2757_v48 = vmul.f32 %v6594_v45, %v6578_v24  ;;  %v2978_v24 = vpop.permute.xlu1 %2977 }
 0xe68   :  { %v2983_v54 = vsel %vm33_vm0, %v2978_v24, 0 }
 0xe69   :  { %v2772_v49 = vpack.c.bf16 %v2757_v48, %v2757_v48 }
 0xe6a   :  { %v6596_v34 = vpop.eup %6595 }
 0xe6b   :  { %6163 = vmatmul.mubr.msk.bf16.vlgmr.msra.gmra.mxu1 %vm29_vm2, %v2772_v49  ;;  %v2759_v32 = vmul.f32 %v6596_v34, %v6580_v50 }
 0xe6c   :  { %6173 = vmatpush3.bf16.msra.mxu1 %v2885_v37  ;;  %6174 = vmatprep.mubr.msk.bf16.mxu1 %vm6696_vm1, %v6695_v1 }
 0xe6d   :  { %v2773_v52 = vpack.c.bf16 %v2759_v32, %v2759_v32  ;;  %6184 = vmatprep.subr.bf16.mxu1 %v6695_v1 }
 0xe6f   :  { %6169 = vmatmul.mubr.msk.bf16.vlgmr.msra.gmra.mxu0 %vm29_vm2, %v2773_v52 }
 0xe70   :  { %6179 = vmatpush3.bf16.msra.mxu0 %v2934_v38  ;;  %6180 = vmatprep.mubr.msk.bf16.mxu0 %vm6696_vm1, %v6695_v1 }
 0xe71   :  { %6190 = vmatprep.subr.bf16.mxu0 %v6695_v1 }
 0xe76   :  { %3124 = vrot.lane.b32.xlu0 %v7398_v16, %s6700_s22 }
 0xeb0   :  { %v2740_v50 = vpop.xlane.xlu0 %2739 }
 0xeb1   :  { %6597 = vrcp.f32 %v2740_v50 }
 0xeb4   :  { %v2743_v36 = vpop.xlane.xlu1 %2742  ;;  %v3027_v2 = vpop.permute.xlu0 %3026 }
 0xeb5   :  { %6599 = vrcp.f32 %v2743_v36  ;;  %v3032_v39 = vsel %vm33_vm0, %v3027_v2, 0 }
 0xebc   :  { %v2749_v42 = vpop.xlane.xlu1 %2748 }
 0xebd   :  { %6601 = vrcp.f32 %v2749_v42 }
 0xebe   :  { %v6598_v56 = vpop.eup %6597 }
 0xebf   :  { %v2761_v44 = vmul.f32 %v6598_v56, %v7446_v61 }
 0xec1   :  { %v2774_v57 = vpack.c.bf16 %v2761_v44, %v2761_v44 }
 0xec2   :  { %v6600_v60 = vpop.eup %6599 }
 0xec3   :  { %6175 = vmatmul.mubr.msk.bf16.vlgmr.msra.gmra.mxu1 %vm29_vm2, %v2774_v57  ;;  %v2763_v59 = vmul.f32 %v6600_v60, %v7450_v7 }
 0xec4   :  { %6185 = vmatpush3.bf16.msra.mxu1 %v2983_v54  ;;  %6186 = vmatprep.mubr.msk.bf16.mxu1 %vm6696_vm1, %v6695_v1  ;;  %v2755_v8 = vpop.xlane.xlu1 %2754 }
 0xec5   :  { %v2775_v46 = vpack.c.bf16 %v2763_v59, %v2763_v59  ;;  %6196 = vmatprep.subr.bf16.mxu1 %v6695_v1  ;;  %6603 = vrcp.f32 %v2755_v8 }
 0xec7   :  { %6181 = vmatmul.mubr.msk.bf16.vlgmr.msra.gmra.mxu0 %vm29_vm2, %v2775_v46 }
 0xec8   :  { %6191 = vmatpush3.bf16.msra.mxu0 %v3032_v39  ;;  %6192 = vmatprep.mubr.msk.bf16.mxu0 %vm6696_vm1, %v6695_v1  ;;  %v3076_v14 = vpop.permute.xlu1 %3075  ;;  %v6501_v39 = vld [vmem:[%s8072_s1 + $0x70] sm:$0xff]  }
 0xec9   :  { %6202 = vmatprep.subr.bf16.mxu0 %v6695_v1 }
 0xeca   :  { %v6602_v61 = vpop.eup %6601 }
 0xecb   :  { %v2767_v7 = vmul.f32 %v6602_v61, %v7454_v27 }
 0xecd   :  { %v2777_v23 = vpack.c.bf16 %v2767_v7, %v2767_v7 }
 0xecf   :  { %6193 = vmatmul.mubr.msk.bf16.vlgmr.msra.gmra.mxu0 %vm29_vm2, %v2777_v23  ;;  %v6502_v23 = vld [vmem:[%s8072_s1 + $0x68] sm:$0xff]  }
 0xed0   :  { %6204 = vmatprep.mubr.msk.bf16.mxu0 %vm6696_vm1, %v6695_v1 }
 0xed2   :  { %v6604_v17 = vpop.eup %6603 }
 0xed3   :  { %v2771_v20 = vmul.f32 %v6604_v17, %v7458_v28  ;;  %v3081_v28 = vsel %vm33_vm0, %v3076_v14, 0 }
 0xed5   :  { %v2779_v27 = vpack.c.bf16 %v2771_v20, %v2771_v20 }
 0xee5   :  { %v2746_v5 = vpop.xlane.xlu0 %2745 }
 0xee6   :  { %6605 = vrcp.f32 %v2746_v5 }
 0xee9   :  { %v2752_v12 = vpop.xlane.xlu0 %2751 }
 0xeea   :  { %6607 = vrcp.f32 %v2752_v12 }
 0xeed   :  { %v3125_v35 = vpop.permute.xlu0 %3124 }
 0xeee   :  { %v3130_v40 = vsel %vm33_vm0, %v3125_v35, 0 }
 0xeef   :  { %6203 = vmatpush3.bf16.msra.mxu0 %v3130_v40 }
 0xef0   :  { %6216 = vmatprep.subr.bf16.mxu0 %v6695_v1 }
 0xef2   :  { %6205 = vmatmul.mubr.msk.bf16.vlgmr.msra.gmra.mxu0 %vm29_vm2, %v2779_v27 }
 0xef3   :  { %v6606_v41 = vpop.eup %6605  ;;  %6220 = vmatprep.mubr.msk.bf16.mxu0 %vm6696_vm1, %v6695_v1 }
 0xef4   :  { %v2765_v21 = vmul.f32 %v6606_v41, %v7468_v26 }
 0xef6   :  { %v2776_v43 = vpack.c.bf16 %v2765_v21, %v2765_v21 }
 0xef7   :  { %v6608_v33 = vpop.eup %6607 }
 0xef8   :  { %6187 = vmatmul.mubr.msk.bf16.vlgmr.msra.gmra.mxu1 %vm29_vm2, %v2776_v43  ;;  %v2769_v31 = vmul.f32 %v6608_v33, %v7472_v47 }
 0xef9   :  { %6197 = vmatpush3.bf16.msra.mxu1 %v3081_v28  ;;  %6198 = vmatprep.mubr.msk.bf16.mxu1 %vm6696_vm1, %v6695_v1 }
 0xefa   :  { %6208 = vmatprep.subr.bf16.mxu1 %v6695_v1  ;;  %v2778_v29 = vpack.c.bf16 %v2769_v31, %v2769_v31 }
 0xf00   :  { %6199 = vmatmul.mubr.msk.bf16.vlgmr.msra.gmra.mxu1 %vm29_vm2, %v2778_v29 }
 0xf01   :  { %6212 = vmatprep.mubr.msk.bf16.mxu1 %vm6696_vm1, %v6695_v1  ;;  %6209 = vmatpush3.bf16.msra.mxu1 %v6501_v39 }
 0xf02   :  { %6210 = vmatprep.subr.bf16.mxu1 %v6695_v1 }
 0xf05   :  { %6211 = vmatpush3.bf16.msra.mxu1 %v6502_v23 }
 0xf06   :  { %6224 = vmatprep.subr.bf16.mxu1 %v6695_v1 }
 0xf2b   :  { %v2823_v26 = vpop.f32.mrf.mxu1 }
 0xf2c   :  { %v3172_v29 = vadd.f32 %v2823_v26, %v7298_v55  ;;  %v6504_v26 = vld [vmem:[%s8072_s1 + $0x28] sm:$0xff]  }
 0xf2d   :  { %v6164_v63 = vpop.f32.mrf.mxu1 }
 0xf2f   :  { %v2826_v45 = vpop.f32.mrf.mxu1  ;;  %v2872_v48 = vpop.f32.mrf.mxu0 }
 0xf31   :  { %v6165_v49 = vpop.f32.mrf.mxu1  ;;  %v6170_v34 = vpop.f32.mrf.mxu0 }
 0xf33   :  { %v2875_v37 = vpop.f32.mrf.mxu0 }
 0xf35   :  { %v6171_v32 = vpop.f32.mrf.mxu0 }
 0xf83   :  { %v2921_v52 = vpop.f32.mrf.mxu1 }
 0xf84   :  { %v3174_v38 = vadd.f32 %v2921_v52, %v7359_v15 }
 0xf85   :  { %v6176_v47 = vpop.f32.mrf.mxu1 }
 0xf86   :  { %3182 = vrot.lane.b32.xlu1 %v3174_v38, %s6701_s23 }
 0xf87   :  { %v2924_v24 = vpop.f32.mrf.mxu1  ;;  %v2970_v50 = vpop.f32.mrf.mxu0 }
 0xf88   :  { %v3175_v36 = vadd.f32 %v2970_v50, %v7359_v15 }
 0xf89   :  { %v6177_v42 = vpop.f32.mrf.mxu1  ;;  %v6182_v56 = vpop.f32.mrf.mxu0 }
 0xf8a   :  { %3184 = vrot.lane.b32.xlu0 %v3175_v36, %s6701_s23 }
 0xf8b   :  { %v2973_v44 = vpop.f32.mrf.mxu0 }
 0xf8d   :  { %v6183_v57 = vpop.f32.mrf.mxu0 }
 0xf8f   :  { %v3068_v60 = vpop.f32.mrf.mxu0 }
 0xf90   :  { %v3177_v54 = vadd.f32 %v3068_v60, %v7387_v58 }
 0xf91   :  { %v6194_v59 = vpop.f32.mrf.mxu0 }
 0xf92   :  { %3192 = vrot.lane.b32.xlu0 %v3177_v54, %s6702_s24 }
 0xf93   :  { %v3071_v2 = vpop.f32.mrf.mxu0 }
 0xf94   :  { %v5638_v2 = vld [vmem:[%s8073_s2 + $0x3] ss:$0 sm:$0xff] }
 0xf95   :  { %v6195_v46 = vpop.f32.mrf.mxu0 }
 0xfb2   :  { %v3166_v15 = vpop.f32.mrf.mxu0 }
 0xfb3   :  { %v3179_v61 = vadd.f32 %v3166_v15, %v7394_v51 }
 0xfb4   :  { %v6206_v7 = vpop.f32.mrf.mxu0 }
 0xfb5   :  { %3200 = vrot.lane.b32.xlu0 %v3179_v61, %s6703_s27 }
 0xfb6   :  { %v3169_v8 = vpop.f32.mrf.mxu0 }
 0xfb8   :  { %v3019_v5 = vpop.f32.mrf.mxu1  ;;  %v6207_v17 = vpop.f32.mrf.mxu0 }
 0xfb9   :  { %v3176_v12 = vadd.f32 %v3019_v5, %v7387_v58  ;;  %3374 = vrot.lane.b32.xlu0 %v7289_v13, %s6704_s30  ;;  %v3173_v13 = vadd.f32 %v2872_v48, %v7298_v55  ;;  %v6503_v55 = vld [vmem:[%s8072_s1 + $0x30] sm:$0xff]   ;;  %v5634_v48 = vld [vmem:[%s8073_s2 + $0x7] ss:$0 sm:$0xff] }
 0xfba   :  { %v6188_v20 = vpop.f32.mrf.mxu1  ;;  %6217 = vmatpush3.bf16.msra.mxu0 %v6503_v55 }
 0xfbb   :  { %3190 = vrot.lane.b32.xlu1 %v3176_v12, %s6702_s24  ;;  %6218 = vmatprep.subr.bf16.mxu0 %v6695_v1 }
 0xfbc   :  { %v3022_v35 = vpop.f32.mrf.mxu1 }
 0xfbe   :  { %v6189_v40 = vpop.f32.mrf.mxu1  ;;  %6219 = vmatpush3.bf16.msra.mxu0 %v6504_v26 }
 0xfbf   :  { %6230 = vmatprep.subr.bf16.mxu0 %v6695_v1 }
 0xfc0   :  { %v3117_v27 = vpop.f32.mrf.mxu1 }
 0xfc1   :  { %v3178_v41 = vadd.f32 %v3117_v27, %v7394_v51 }
 0xfc2   :  { %v6200_v21 = vpop.f32.mrf.mxu1 }
 0xfc3   :  { %3198 = vrot.lane.b32.xlu1 %v3178_v41, %s6703_s27 }
 0xfc4   :  { %v3120_v14 = vpop.f32.mrf.mxu1 }
 0xfc6   :  { %v6201_v43 = vpop.f32.mrf.mxu1 }
 0xff8   :  { %v3183_v28 = vpop.permute.xlu1 %3182 }
 0xff9   :  { %v3204_v45 = vsel %vm29_vm2, %v3172_v29, %v3183_v28 }
 0xffc   :  { %v3185_v33 = vpop.permute.xlu0 %3184 }
 0xffd   :  { %v3205_v49 = vsel %vm29_vm2, %v3173_v13, %v3185_v33 }
0x1004   :  { %v3193_v31 = vpop.permute.xlu0 %3192 }
0x1005   :  { %v3207_v51 = vsel %vm1012_vm3, %v3205_v49, %v3193_v31 }
0x1027   :  { %v3201_v63 = vpop.permute.xlu0 %3200 }
0x1028   :  { %v3209_v32 = vsel %vm1015_vm4, %v3207_v51, %v3201_v63 }
0x102b   :  { %v3375_v35 = vpop.permute.xlu0 %3374 }
0x102d   :  { %v3191_v58 = vpop.permute.xlu1 %3190 }
0x102e   :  { %v3206_v34 = vsel %vm1012_vm3, %v3204_v45, %v3191_v58 }
0x1035   :  { %v3199_v37 = vpop.permute.xlu1 %3198 }
0x1036   :  { %v3208_v52 = vsel %vm1015_vm4, %v3206_v34, %v3199_v37 }
0x1037   :  { %v3210_v38 = vpack.c.bf16 %v3209_v32, %v3208_v52 }
0x1039   :  { %6213 = vmatmul.mubr.msk.bf16.vlgmr.msra.gmra.mxu1 %vm1035_vm5, %v3210_v38 }
0x103a   :  { %6226 = vmatprep.mubr.msk.bf16.mxu1 %vm6696_vm1, %v6695_v1 }
0x10f9   :  { %v3264_v47 = vpop.f32.mrf.mxu1 }
0x10fa   :  { %v3265_v24 = vadd.f32 %v5634_v48, %v3264_v47 }
0x10fb   :  { %v6214_v50 = vpop.f32.mrf.mxu1 }
0x10fc   :  { %v3271_v42 = vmax.f32 %v3265_v24, 0.0 }
0x10fd   :  { %v3267_v36 = vpop.f32.mrf.mxu1 }
0x10fe   :  { %v3268_v56 = vadd.f32 %v5634_v48, %v3267_v36  ;;  %v3273_v60 = vadd.f32 %v3271_v42, %v3208_v52 }
0x10ff   :  { %v6215_v44 = vpop.f32.mrf.mxu1 }
0x1100   :  { %v3272_v57 = vmax.f32 %v3268_v56, 0.0 }
0x1102   :  { %v3274_v54 = vadd.f32 %v3272_v57, %v3209_v32 }
0x1104   :  { %v3275_v59 = vpack.c.bf16 %v3274_v54, %v3273_v60 }
0x1106   :  { %6221 = vmatmul.mubr.msk.bf16.vlgmr.msra.gmra.mxu0 %vm1035_vm5, %v3275_v59 }
0x1107   :  { %6232 = vmatprep.mubr.msk.bf16.mxu0 %vm6696_vm1, %v6695_v1 }
0x11c6   :  { %v3334_v46 = vpop.f32.mrf.mxu0 }
0x11c7   :  { %v3335_v39 = vadd.f32 %v5638_v2, %v3334_v46 }
0x11c8   :  { %v6222_v15 = vpop.f32.mrf.mxu0 }
0x11c9   :  { %v3366_v61 = vpack.c.bf16 %v3335_v39, %v3335_v39 }
0x11ca   :  { %v3337_v7 = vpop.f32.mrf.mxu0 }
0x11cb   :  { %v3338_v23 = vadd.f32 %v5638_v2, %v3337_v7  ;;  %v3380_v8 = vsel %vm29_vm2, %v3366_v61, 0 }
0x11cc   :  { %v6223_v5 = vpop.f32.mrf.mxu0  ;;  %6225 = vmatpush3.bf16.xpose.msra.mxu1 %v3380_v8 }
0x11cd   :  { %v6482_v17 = vpack.i.bf16 %v3338_v23, %v3335_v39  ;;  %v7571_v12 = vpack.c.bf16 %v3338_v23, %v3338_v23  ;;  %6236 = vmatprep.subr.bf16.mxu1 %v6695_v1 }
0x11cf   :  { %6483 = vrot.lane.b32.xlu0 %v6482_v17, %s6697_s0  ;;  %6478 = vrot.lane.b32.xlu1 %v6482_v17, %s6698_s18  ;;  %v3428_v20 = vsel %vm29_vm2, %v7571_v12, 0 }
0x11d0   :  { %6231 = vmatpush3.bf16.xpose.msra.mxu0 %v3428_v20 }
0x11d1   :  { %6242 = vmatprep.subr.bf16.mxu0 %v6695_v1 }
0x11d3   :  { %6227 = vmatmul.mubr.msk.bf16.vlgmr.msra.gmra.mxu1 %vm29_vm2, %v3375_v35  ;;  %3518 = vrot.lane.b32.xlu0 %v7350_v30, %s6704_s30 }
0x11d4   :  { %3422 = vrot.lane.b32.xlu1 %v7306_v53, %s6704_s30  ;;  %6238 = vmatprep.mubr.msk.bf16.mxu1 %vm6696_vm1, %v6695_v1 }
0x11d7   :  { %3566 = vrot.lane.b32.xlu0 %v7355_v11, %s6704_s30 }
0x11d8   :  { %3470 = vrot.lane.b32.xlu1 %v7340_v4, %s6704_s30 }
0x11db   :  { %3662 = vrot.lane.b32.xlu0 %v7382_v22, %s6704_s30 }
0x11dc   :  { %6488 = vrot.lane.b32.xlu1 %v6482_v17, %s6699_s21 }
0x11e0   :  { %3614 = vrot.lane.b32.xlu1 %v7368_v25, %s6704_s30 }
0x11e4   :  { %3710 = vrot.lane.b32.xlu1 %v7398_v16, %s6704_s30 }
0x11e8   :  { %3863 = vrot.lane.b32.xlu1 %v3366_v61, %s6700_s22 }
0x1241   :  { %v6479_v53 = vpop.permute.xlu1 %6478  ;;  %v6484_v11 = vpop.permute.xlu0 %6483 }
0x1242   :  { %v6481_v30 = vunpack.i.h.bf16 %v6479_v53  ;;  %v6480_v40 = vunpack.i.l.bf16 %v6479_v53  ;;  %v6485_v41 = vunpack.i.l.bf16 %v6484_v11  ;;  %v6486_v14 = vunpack.i.h.bf16 %v6484_v11 }
0x1244   :  { %v7598_v27 = vpack.c.bf16 %v6481_v30, %v6481_v30  ;;  %v7600_v4 = vpack.c.bf16 %v6480_v40, %v6480_v40  ;;  %v7611_v16 = vpack.c.bf16 %v6485_v41, %v6485_v41  ;;  %v7613_v33 = vpack.c.bf16 %v6486_v14, %v6486_v14 }
0x1245   :  { %v3519_v28 = vpop.permute.xlu0 %3518 }
0x1246   :  { %v3423_v22 = vpop.permute.xlu1 %3422  ;;  %v3476_v21 = vsel %vm29_vm2, %v7600_v4, 0  ;;  %v3524_v25 = vsel %vm29_vm2, %v7598_v27, 0  ;;  %v3572_v58 = vsel %vm29_vm2, %v7611_v16, 0  ;;  %v3620_v63 = vsel %vm29_vm2, %v7613_v33, 0 }
0x1247   :  { %6233 = vmatmul.mubr.msk.bf16.vlgmr.msra.gmra.mxu0 %vm29_vm2, %v3423_v22  ;;  %6237 = vmatpush3.bf16.xpose.msra.mxu1 %v3476_v21 }
0x1248   :  { %6243 = vmatpush3.bf16.xpose.msra.mxu0 %v3524_v25  ;;  %6244 = vmatprep.mubr.msk.bf16.mxu0 %vm6696_vm1, %v6695_v1 }
0x1249   :  { %6248 = vmatprep.subr.bf16.mxu1 %v6695_v1  ;;  %6254 = vmatprep.subr.bf16.mxu0 %v6695_v1  ;;  %v3567_v34 = vpop.permute.xlu0 %3566 }
0x124a   :  { %v3471_v43 = vpop.permute.xlu1 %3470 }
0x124d   :  { %v3663_v55 = vpop.permute.xlu0 %3662 }
0x124e   :  { %v6489_v31 = vpop.permute.xlu1 %6488  ;;  %6239 = vmatmul.mubr.msk.bf16.vlgmr.msra.gmra.mxu1 %vm29_vm2, %v3471_v43 }
0x124f   :  { %v6491_v29 = vunpack.i.h.bf16 %v6489_v31  ;;  %v6490_v13 = vunpack.i.l.bf16 %v6489_v31  ;;  %6245 = vmatmul.mubr.msk.bf16.vlgmr.msra.gmra.mxu0 %vm29_vm2, %v3519_v28  ;;  %6249 = vmatpush3.bf16.xpose.msra.mxu1 %v3572_v58 }
0x1250   :  { %6255 = vmatpush3.bf16.xpose.msra.mxu0 %v3620_v63  ;;  %6250 = vmatprep.mubr.msk.bf16.mxu1 %vm6696_vm1, %v6695_v1 }
0x1251   :  { %6256 = vmatprep.mubr.msk.bf16.mxu0 %vm6696_vm1, %v6695_v1  ;;  %6260 = vmatprep.subr.bf16.mxu1 %v6695_v1  ;;  %v7626_v45 = vpack.c.bf16 %v6490_v13, %v6490_v13  ;;  %v7629_v51 = vpack.c.bf16 %v6491_v29, %v6491_v29 }
0x1252   :  { %v3615_v49 = vpop.permute.xlu1 %3614  ;;  %6266 = vmatprep.subr.bf16.mxu0 %v6695_v1 }
0x1253   :  { %v3668_v32 = vsel %vm29_vm2, %v7626_v45, 0  ;;  %v3716_v52 = vsel %vm29_vm2, %v7629_v51, 0 }
0x1256   :  { %v3711_v37 = vpop.permute.xlu1 %3710  ;;  %6251 = vmatmul.mubr.msk.bf16.vlgmr.msra.gmra.mxu1 %vm29_vm2, %v3567_v34 }
0x1257   :  { %6257 = vmatmul.mubr.msk.bf16.vlgmr.msra.gmra.mxu0 %vm29_vm2, %v3615_v49  ;;  %6261 = vmatpush3.bf16.xpose.msra.mxu1 %v3668_v32 }
0x1258   :  { %6267 = vmatpush3.bf16.xpose.msra.mxu0 %v3716_v52  ;;  %6262 = vmatprep.mubr.msk.bf16.mxu1 %vm6696_vm1, %v6695_v1 }
0x1259   :  { %6268 = vmatprep.mubr.msk.bf16.mxu0 %vm6696_vm1, %v6695_v1  ;;  %6272 = vmatprep.subr.bf16.mxu1 %v6695_v1 }
0x125a   :  { %6278 = vmatprep.subr.bf16.mxu0 %v6695_v1  ;;  %v3864_v38 = vpop.permute.xlu1 %3863 }
0x125b   :  { %v3869_v26 = vsel %vm33_vm0, %v3864_v38, 0 }
0x125e   :  { %6263 = vmatmul.mubr.msk.bf16.vlgmr.msra.gmra.mxu1 %vm29_vm2, %v3663_v55 }
0x125f   :  { %6269 = vmatmul.mubr.msk.bf16.vlgmr.msra.gmra.mxu0 %vm29_vm2, %v3711_v37  ;;  %6273 = vmatpush3.bf16.msra.mxu1 %v3869_v26 }
0x1260   :  { %6274 = vmatprep.mubr.msk.bf16.mxu1 %vm6696_vm1, %v6695_v1  ;;  %6284 = vmatprep.subr.bf16.mxu1 %v6695_v1 }
0x1261   :  { %6280 = vmatprep.mubr.msk.bf16.mxu0 %vm6696_vm1, %v6695_v1 }
0x1293   :  { %v3416_v48 = vpop.f32.mrf.mxu1 }
0x1294   :  { %v3758_v47 = vmul.f32 0.17677669, %v3416_v48 }
0x1295   :  { %v6228_v24 = vpop.f32.mrf.mxu1 }
0x1296   :  { %v3766_v50 = vsel %vm29_vm2, %v3758_v47, -inf }
0x1297   :  { %v3419_v36 = vpop.f32.mrf.mxu1  ;;  %3767 = vmax.xlane.f32.xlu0 %v3766_v50 }
0x1299   :  { %v6229_v42 = vpop.f32.mrf.mxu1 }
0x1307   :  { %v3464_v56 = vpop.f32.mrf.mxu0 }
0x1308   :  { %v3759_v44 = vmul.f32 0.17677669, %v3464_v56 }
0x1309   :  { %v6234_v57 = vpop.f32.mrf.mxu0 }
0x130a   :  { %v3769_v60 = vsel %vm29_vm2, %v3759_v44, -inf }
0x130b   :  { %3770 = vmax.xlane.f32.xlu1 %v3769_v60  ;;  %v3467_v54 = vpop.f32.mrf.mxu0 }
0x130d   :  { %v6235_v59 = vpop.f32.mrf.mxu0 }
0x130e   :  { %v3512_v2 = vpop.f32.mrf.mxu1 }
0x130f   :  { %v3760_v46 = vmul.f32 0.17677669, %v3512_v2  ;;  %v3560_v39 = vpop.f32.mrf.mxu0 }
0x1310   :  { %v6240_v15 = vpop.f32.mrf.mxu1  ;;  %v3761_v61 = vmul.f32 0.17677669, %v3560_v39 }
0x1311   :  { %v6246_v7 = vpop.f32.mrf.mxu0  ;;  %v3772_v23 = vsel %vm29_vm2, %v3760_v46, -inf }
0x1312   :  { %3773 = vmax.xlane.f32.xlu0 %v3772_v23  ;;  %v3515_v8 = vpop.f32.mrf.mxu1  ;;  %v3775_v35 = vsel %vm29_vm2, %v3761_v61, -inf }
0x1313   :  { %v3563_v5 = vpop.f32.mrf.mxu0 }
0x1314   :  { %v6241_v17 = vpop.f32.mrf.mxu1 }
0x1315   :  { %v6247_v20 = vpop.f32.mrf.mxu0 }
0x1316   :  { %v3608_v53 = vpop.f32.mrf.mxu1  ;;  %3776 = vmax.xlane.f32.xlu0 %v3775_v35 }
0x1317   :  { %v7655_v30 = vmul.f32 0.17677669, %v3608_v53  ;;  %v3656_v40 = vpop.f32.mrf.mxu0 }
0x1318   :  { %v7657_v11 = vmul.f32 0.17677669, %v3656_v40  ;;  %v6252_v41 = vpop.f32.mrf.mxu1 }
0x1319   :  { %v6258_v22 = vpop.f32.mrf.mxu0  ;;  %v3778_v21 = vsel %vm29_vm2, %v7655_v30, -inf }
0x131a   :  { %v3611_v25 = vpop.f32.mrf.mxu1  ;;  %3779 = vmax.xlane.f32.xlu1 %v3778_v21  ;;  %v3781_v14 = vsel %vm29_vm2, %v7657_v11, -inf }
0x131b   :  { %3782 = vmax.xlane.f32.xlu0 %v3781_v14  ;;  %v3659_v43 = vpop.f32.mrf.mxu0 }
0x131c   :  { %v6253_v28 = vpop.f32.mrf.mxu1 }
0x131d   :  { %v6259_v31 = vpop.f32.mrf.mxu0 }
0x131e   :  { %v3704_v58 = vpop.f32.mrf.mxu1 }
0x131f   :  { %v3764_v29 = vmul.f32 0.17677669, %v3704_v58  ;;  %v3752_v13 = vpop.f32.mrf.mxu0 }
0x1320   :  { %v3765_v63 = vmul.f32 0.17677669, %v3752_v13  ;;  %v6264_v49 = vpop.f32.mrf.mxu1  ;;  %v3768_v48 = vpop.xlane.xlu0 %3767 }
0x1321   :  { %v6270_v34 = vpop.f32.mrf.mxu0  ;;  %v3784_v37 = vsel %vm29_vm2, %v3764_v29, -inf  ;;  %v3790_v24 = vsub.f32 %v3758_v47, %v3768_v48 }
0x1322   :  { %v3707_v32 = vpop.f32.mrf.mxu1  ;;  %3785 = vmax.xlane.f32.xlu1 %v3784_v37  ;;  %v3787_v52 = vsel %vm29_vm2, %v3765_v63, -inf }
0x1323   :  { %3788 = vmax.xlane.f32.xlu0 %v3787_v52  ;;  %v3755_v38 = vpop.f32.mrf.mxu0  ;;  %v3798_v50 = vmul.f32 1.442695, %v3790_v24 }
0x1324   :  { %v6265_v55 = vpop.f32.mrf.mxu1 }
0x1325   :  { %v6271_v26 = vpop.f32.mrf.mxu0  ;;  %6609 = vpow2.f32 %v3798_v50 }
0x1332   :  { %v7671_v36 = vpop.eup %6609 }
0x1333   :  { %3961 = vrot.lane.b32.xlu1 %v7600_v4, %s6700_s22  ;;  %v3814_v42 = vsel %vm29_vm2, %v7671_v36, 0.0 }
0x1337   :  { %4010 = vrot.lane.b32.xlu1 %v7598_v27, %s6700_s22 }
0x1339   :  { %3912 = vrot.lane.b32.xlu0 %v7571_v12, %s6700_s22 }
0x135b   :  { %3815 = vadd.xlane.f32.xlu1 %v3814_v42 }
0x1394   :  { %v3771_v56 = vpop.xlane.xlu1 %3770 }
0x1395   :  { %v3791_v57 = vsub.f32 %v3759_v44, %v3771_v56 }
0x1397   :  { %v3800_v60 = vmul.f32 1.442695, %v3791_v57 }
0x1399   :  { %6611 = vpow2.f32 %v3800_v60 }
0x139b   :  { %v3774_v4 = vpop.xlane.xlu0 %3773 }
0x139c   :  { %v3792_v54 = vsub.f32 %v3760_v46, %v3774_v4 }
0x139e   :  { %v3802_v27 = vmul.f32 1.442695, %v3792_v54 }
0x139f   :  { %v3777_v59 = vpop.xlane.xlu0 %3776 }
0x13a0   :  { %6613 = vpow2.f32 %v3802_v27  ;;  %v3793_v12 = vsub.f32 %v3761_v61, %v3777_v59 }
0x13a2   :  { %v3804_v2 = vmul.f32 1.442695, %v3793_v12 }
0x13a3   :  { %v3780_v17 = vpop.xlane.xlu1 %3779 }
0x13a4   :  { %6615 = vpow2.f32 %v3804_v2  ;;  %v3783_v15 = vpop.xlane.xlu0 %3782  ;;  %v3794_v20 = vsub.f32 %v7655_v30, %v3780_v17 }
0x13a5   :  { %v3795_v53 = vsub.f32 %v7657_v11, %v3783_v15 }
0x13a6   :  { %v7675_v47 = vpop.eup %6611  ;;  %v3806_v40 = vmul.f32 1.442695, %v3794_v20 }
0x13a7   :  { %v3817_v39 = vsel %vm29_vm2, %v7675_v47, 0.0  ;;  %v3808_v22 = vmul.f32 1.442695, %v3795_v53 }
0x13a8   :  { %3818 = vadd.xlane.f32.xlu0 %v3817_v39  ;;  %6617 = vpow2.f32 %v3806_v40 }
0x13a9   :  { %6619 = vpow2.f32 %v3808_v22 }
0x13ab   :  { %v3786_v35 = vpop.xlane.xlu1 %3785 }
0x13ac   :  { %v3789_v7 = vpop.xlane.xlu0 %3788  ;;  %v3796_v41 = vsub.f32 %v3764_v29, %v3786_v35 }
0x13ad   :  { %v7679_v23 = vpop.eup %6613  ;;  %v3797_v25 = vsub.f32 %v3765_v63, %v3789_v7 }
0x13ae   :  { %v3820_v44 = vsel %vm29_vm2, %v7679_v23, 0.0  ;;  %v3810_v21 = vmul.f32 1.442695, %v3796_v41 }
0x13af   :  { %3821 = vadd.xlane.f32.xlu1 %v3820_v44  ;;  %v3812_v14 = vmul.f32 1.442695, %v3797_v25  ;;  %v3962_v43 = vpop.permute.xlu1 %3961 }
0x13b0   :  { %v3913_v46 = vpop.permute.xlu0 %3912  ;;  %6621 = vpow2.f32 %v3810_v21  ;;  %v3967_v32 = vsel %vm33_vm0, %v3962_v43, 0 }
0x13b1   :  { %v7683_v8 = vpop.eup %6615  ;;  %v3918_v61 = vsel %vm33_vm0, %v3913_v46, 0  ;;  %6623 = vpow2.f32 %v3812_v14 }
0x13b2   :  { %6279 = vmatpush3.bf16.msra.mxu0 %v3918_v61  ;;  %v3823_v5 = vsel %vm29_vm2, %v7683_v8, 0.0 }
0x13b3   :  { %3824 = vadd.xlane.f32.xlu0 %v3823_v5  ;;  %6290 = vmatprep.subr.bf16.mxu0 %v6695_v1  ;;  %v4011_v28 = vpop.permute.xlu1 %4010 }
0x13b4   :  { %v4016_v50 = vsel %vm33_vm0, %v4011_v28, 0 }
0x13c0   :  { %4108 = vrot.lane.b32.xlu1 %v7613_v33, %s6700_s22  ;;  %v7695_v33 = vpop.eup %6617 }
0x13c1   :  { %v3826_v30 = vsel %vm29_vm2, %v7695_v33, 0.0 }
0x13c9   :  { %4059 = vrot.lane.b32.xlu0 %v7611_v16, %s6700_s22  ;;  %v7697_v16 = vpop.eup %6619 }
0x13ca   :  { %v7701_v11 = vpop.eup %6621  ;;  %v3829_v29 = vsel %vm29_vm2, %v7697_v16, 0.0 }
0x13cb   :  { %v3832_v58 = vsel %vm29_vm2, %v7701_v11, 0.0  ;;  %v7707_v13 = vpop.eup %6623 }
0x13cc   :  { %v3835_v63 = vsel %vm29_vm2, %v7707_v13, 0.0 }
0x13e4   :  { %3827 = vadd.xlane.f32.xlu1 %v3826_v30  ;;  %v3816_v31 = vpop.xlane.xlu1 %3815 }
0x13e5   :  { %6625 = vrcp.f32 %v3816_v31 }
0x13e8   :  { %3833 = vadd.xlane.f32.xlu1 %v3832_v58  ;;  %3830 = vadd.xlane.f32.xlu0 %v3829_v29 }
0x13ec   :  { %3836 = vadd.xlane.f32.xlu0 %v3835_v63 }
0x13f2   :  { %v6626_v49 = vpop.eup %6625 }
0x13f3   :  { %v3839_v34 = vmul.f32 %v6626_v49, %v7671_v36 }
0x13f5   :  { %v3854_v37 = vpack.c.bf16 %v3839_v34, %v3839_v34 }
0x13f7   :  { %6275 = vmatmul.mubr.msk.bf16.vlgmr.msra.gmra.mxu1 %vm29_vm2, %v3854_v37 }
0x13f8   :  { %6285 = vmatpush3.bf16.msra.mxu1 %v3967_v32  ;;  %6286 = vmatprep.mubr.msk.bf16.mxu1 %vm6696_vm1, %v6695_v1 }
0x13f9   :  { %4206 = vrot.lane.b32.xlu1 %v7629_v51, %s6700_s22  ;;  %6296 = vmatprep.subr.bf16.mxu1 %v6695_v1 }
0x1402   :  { %4157 = vrot.lane.b32.xlu0 %v7626_v45, %s6700_s22 }
0x1431   :  { %v3819_v52 = vpop.xlane.xlu0 %3818 }
0x1432   :  { %6627 = vrcp.f32 %v3819_v52 }
0x1438   :  { %v3822_v38 = vpop.xlane.xlu1 %3821 }
0x1439   :  { %6629 = vrcp.f32 %v3822_v38 }
0x143c   :  { %v3825_v55 = vpop.xlane.xlu0 %3824  ;;  %v4109_v4 = vpop.permute.xlu1 %4108 }
0x143d   :  { %6631 = vrcp.f32 %v3825_v55  ;;  %v4114_v27 = vsel %vm33_vm0, %v4109_v4, 0 }
0x143f   :  { %v6628_v26 = vpop.eup %6627 }
0x1440   :  { %v3841_v48 = vmul.f32 %v6628_v26, %v7675_v47  ;;  %v4060_v36 = vpop.permute.xlu0 %4059 }
0x1441   :  { %v4065_v60 = vsel %vm33_vm0, %v4060_v36, 0 }
0x1442   :  { %v3855_v24 = vpack.c.bf16 %v3841_v48, %v3841_v48 }
0x1444   :  { %6281 = vmatmul.mubr.msk.bf16.vlgmr.msra.gmra.mxu0 %vm29_vm2, %v3855_v24 }
0x1445   :  { %6291 = vmatpush3.bf16.msra.mxu0 %v4016_v50  ;;  %6292 = vmatprep.mubr.msk.bf16.mxu0 %vm6696_vm1, %v6695_v1 }
0x1446   :  { %v6630_v51 = vpop.eup %6629  ;;  %6302 = vmatprep.subr.bf16.mxu0 %v6695_v1 }
0x1447   :  { %v3843_v45 = vmul.f32 %v6630_v51, %v7679_v23 }
0x1449   :  { %v3856_v42 = vpack.c.bf16 %v3843_v45, %v3843_v45 }
0x144a   :  { %v6632_v56 = vpop.eup %6631 }
0x144b   :  { %v3845_v57 = vmul.f32 %v6632_v56, %v7683_v8  ;;  %6287 = vmatmul.mubr.msk.bf16.vlgmr.msra.gmra.mxu1 %vm29_vm2, %v3856_v42 }
0x144c   :  { %6297 = vmatpush3.bf16.msra.mxu1 %v4065_v60  ;;  %6298 = vmatprep.mubr.msk.bf16.mxu1 %vm6696_vm1, %v6695_v1 }
0x144d   :  { %v3857_v54 = vpack.c.bf16 %v3845_v57, %v3845_v57  ;;  %6308 = vmatprep.subr.bf16.mxu1 %v6695_v1 }
0x144f   :  { %6293 = vmatmul.mubr.msk.bf16.vlgmr.msra.gmra.mxu0 %vm29_vm2, %v3857_v54 }
0x1450   :  { %6303 = vmatpush3.bf16.msra.mxu0 %v4114_v27  ;;  %6304 = vmatprep.mubr.msk.bf16.mxu0 %vm6696_vm1, %v6695_v1 }
0x1451   :  { %6314 = vmatprep.subr.bf16.mxu0 %v6695_v1 }
0x146d   :  { %v3828_v59 = vpop.xlane.xlu1 %3827 }
0x146e   :  { %6633 = vrcp.f32 %v3828_v59 }
0x1471   :  { %v3834_v12 = vpop.xlane.xlu1 %3833  ;;  %v3831_v2 = vpop.xlane.xlu0 %3830 }
0x1472   :  { %6635 = vrcp.f32 %v3834_v12 }
0x1473   :  { %6637 = vrcp.f32 %v3831_v2 }
0x1475   :  { %v3837_v47 = vpop.xlane.xlu0 %3836  ;;  %v4207_v17 = vpop.permute.xlu1 %4206 }
0x1476   :  { %6639 = vrcp.f32 %v3837_v47  ;;  %v4212_v53 = vsel %vm33_vm0, %v4207_v17, 0 }
0x1479   :  { %v4158_v7 = vpop.permute.xlu0 %4157 }
0x147a   :  { %v4163_v8 = vsel %vm33_vm0, %v4158_v7, 0 }
0x147b   :  { %v6634_v39 = vpop.eup %6633 }
0x147c   :  { %v3847_v15 = vmul.f32 %v6634_v39, %v7695_v33  ;;  %v6505_v39 = vld [vmem:[%s8072_s1 + $0x80] sm:$0xff]  }
0x147e   :  { %v3858_v23 = vpack.c.bf16 %v3847_v15, %v3847_v15 }
0x147f   :  { %v6636_v44 = vpop.eup %6635 }
0x1480   :  { %v6638_v46 = vpop.eup %6637  ;;  %6299 = vmatmul.mubr.msk.bf16.vlgmr.msra.gmra.mxu1 %vm29_vm2, %v3858_v23  ;;  %v3851_v5 = vmul.f32 %v6636_v44, %v7701_v11 }
0x1481   :  { %v3849_v61 = vmul.f32 %v6638_v46, %v7697_v16  ;;  %6309 = vmatpush3.bf16.msra.mxu1 %v4163_v8  ;;  %6310 = vmatprep.mubr.msk.bf16.mxu1 %vm6696_vm1, %v6695_v1 }
0x1482   :  { %6320 = vmatprep.subr.bf16.mxu1 %v6695_v1  ;;  %v3860_v40 = vpack.c.bf16 %v3851_v5, %v3851_v5 }
0x1483   :  { %v3859_v20 = vpack.c.bf16 %v3849_v61, %v3849_v61  ;;  %v6640_v35 = vpop.eup %6639 }
0x1484   :  { %v3853_v41 = vmul.f32 %v6640_v35, %v7707_v13 }
0x1485   :  { %6305 = vmatmul.mubr.msk.bf16.vlgmr.msra.gmra.mxu0 %vm29_vm2, %v3859_v20 }
0x1486   :  { %6315 = vmatpush3.bf16.msra.mxu0 %v4212_v53  ;;  %6316 = vmatprep.mubr.msk.bf16.mxu0 %vm6696_vm1, %v6695_v1  ;;  %v3861_v22 = vpack.c.bf16 %v3853_v41, %v3853_v41 }
0x1487   :  { %6328 = vmatprep.subr.bf16.mxu0 %v6695_v1 }
0x1488   :  { %6311 = vmatmul.mubr.msk.bf16.vlgmr.msra.gmra.mxu1 %vm29_vm2, %v3860_v40 }
0x1489   :  { %6324 = vmatprep.mubr.msk.bf16.mxu1 %vm6696_vm1, %v6695_v1  ;;  %6321 = vmatpush3.bf16.msra.mxu1 %v6505_v39 }
0x148a   :  { %6322 = vmatprep.subr.bf16.mxu1 %v6695_v1 }
0x148d   :  { %6317 = vmatmul.mubr.msk.bf16.vlgmr.msra.gmra.mxu0 %vm29_vm2, %v3861_v22 }
0x148e   :  { %6332 = vmatprep.mubr.msk.bf16.mxu0 %vm6696_vm1, %v6695_v1 }
0x14b7   :  { %v3905_v21 = vpop.f32.mrf.mxu1 }
0x14b8   :  { %4262 = vrot.lane.b32.xlu0 %v3905_v21, %s6704_s30 }
0x14b9   :  { %v6276_v25 = vpop.f32.mrf.mxu1 }
0x14bb   :  { %v3908_v14 = vpop.f32.mrf.mxu1 }
0x14bc   :  { %v6507_v14 = vld [vmem:[%s8072_s1 + $0x40] sm:$0xff]  }
0x14bd   :  { %v6277_v43 = vpop.f32.mrf.mxu1  ;;  %6329 = vmatpush3.bf16.msra.mxu0 %v6507_v14 }
0x14be   :  { %6330 = vmatprep.subr.bf16.mxu0 %v6695_v1  ;;  %v6508_v43 = vld [vmem:[%s8072_s1 + $0x38] sm:$0xff]  }
0x14c1   :  { %6331 = vmatpush3.bf16.msra.mxu0 %v6508_v43 }
0x14c2   :  { %6342 = vmatprep.subr.bf16.mxu0 %v6695_v1 }
0x1504   :  { %v3954_v33 = vpop.f32.mrf.mxu0 }
0x1505   :  { %4264 = vrot.lane.b32.xlu1 %v3954_v33, %s6704_s30  ;;  %v5658_v33 = vld [vmem:[%s8073_s2 + $0x8] ss:$0 sm:$0xff] }
0x1506   :  { %v6282_v28 = vpop.f32.mrf.mxu0 }
0x1508   :  { %v3957_v16 = vpop.f32.mrf.mxu0 }
0x150a   :  { %v6283_v30 = vpop.f32.mrf.mxu0 }
0x150b   :  { %v4003_v11 = vpop.f32.mrf.mxu1 }
0x150c   :  { %4266 = vrot.lane.b32.xlu0 %v4003_v11, %s6704_s30 }
0x150d   :  { %v6288_v31 = vpop.f32.mrf.mxu1 }
0x150f   :  { %v4006_v58 = vpop.f32.mrf.mxu1  ;;  %v4052_v29 = vpop.f32.mrf.mxu0 }
0x1510   :  { %4268 = vrot.lane.b32.xlu1 %v4052_v29, %s6704_s30 }
0x1511   :  { %v6289_v13 = vpop.f32.mrf.mxu1  ;;  %v6294_v63 = vpop.f32.mrf.mxu0 }
0x1513   :  { %v4055_v49 = vpop.f32.mrf.mxu0 }
0x1515   :  { %v6295_v34 = vpop.f32.mrf.mxu0 }
0x152a   :  { %v4263_v48 = vpop.permute.xlu0 %4262 }
0x152b   :  { %v4286_v45 = vadd.f32 %v4263_v48, %v7283_v62  ;;  %v7823_v48 = vld [vmem:[%s8073_s2 + $0x20] sm:$0x1] }
0x1540   :  { %v4101_v37 = vpop.f32.mrf.mxu1 }
0x1541   :  { %4270 = vrot.lane.b32.xlu0 %v4101_v37, %s6704_s30  ;;  %v5662_v37 = vld [vmem:[%s8073_s2 + $0x4] ss:$0 sm:$0xff] }
0x1542   :  { %v6300_v32 = vpop.f32.mrf.mxu1 }
0x1544   :  { %v4104_v52 = vpop.f32.mrf.mxu1 }
0x1545   :  { %v4150_v38 = vpop.f32.mrf.mxu0 }
0x1546   :  { %4272 = vrot.lane.b32.xlu1 %v4150_v38, %s6704_s30  ;;  %v6301_v55 = vpop.f32.mrf.mxu1 }
0x1547   :  { %v6306_v26 = vpop.f32.mrf.mxu0 }
0x1548   :  { %v4199_v24 = vpop.f32.mrf.mxu1 }
0x1549   :  { %v4153_v50 = vpop.f32.mrf.mxu0  ;;  %4274 = vrot.lane.b32.xlu0 %v4199_v24, %s6704_s30 }
0x154a   :  { %v6312_v51 = vpop.f32.mrf.mxu1 }
0x154b   :  { %v6307_v36 = vpop.f32.mrf.mxu0 }
0x154c   :  { %v4202_v42 = vpop.f32.mrf.mxu1 }
0x154d   :  { %v4248_v56 = vpop.f32.mrf.mxu0  ;;  %4296 = vrot.lane.b32.xlu0 %v4286_v45, %s6704_s30  ;;  %v4507_v42 = vpack.c.bf16 %v7823_v48, %v7823_v48 }
0x154e   :  { %4276 = vrot.lane.b32.xlu1 %v4248_v56, %s6704_s30  ;;  %v6313_v57 = vpop.f32.mrf.mxu1 }
0x154f   :  { %v6318_v60 = vpop.f32.mrf.mxu0 }
0x1551   :  { %v4251_v4 = vpop.f32.mrf.mxu0 }
0x1553   :  { %v6319_v54 = vpop.f32.mrf.mxu0 }
0x1577   :  { %v4265_v27 = vpop.permute.xlu1 %4264 }
0x1578   :  { %v4287_v59 = vadd.f32 %v4265_v27, %v7291_v0 }
0x157a   :  { %4298 = vrot.lane.b32.xlu1 %v4287_v59, %s6704_s30 }
0x157e   :  { %v4267_v12 = vpop.permute.xlu0 %4266 }
0x157f   :  { %v4288_v2 = vadd.f32 %v4267_v12, %v7336_v3  ;;  %v6506_v3 = vld [vmem:[%s8072_s1 + $0x78] sm:$0xff]  }
0x1580   :  { %6323 = vmatpush3.bf16.msra.mxu1 %v6506_v3 }
0x1581   :  { %4304 = vrot.lane.b32.xlu0 %v4288_v2, %s6705_s12  ;;  %6336 = vmatprep.subr.bf16.mxu1 %v6695_v1 }
0x1582   :  { %v4269_v62 = vpop.permute.xlu1 %4268 }
0x1583   :  { %v4289_v47 = vadd.f32 %v4269_v62, %v7346_v9 }
0x1585   :  { %4306 = vrot.lane.b32.xlu1 %v4289_v47, %s6705_s12 }
0x15b3   :  { %v4271_v15 = vpop.permute.xlu0 %4270 }
0x15b4   :  { %v4290_v0 = vadd.f32 %v4271_v15, %v7344_v19 }
0x15b6   :  { %4312 = vrot.lane.b32.xlu0 %v4290_v0, %s6706_s17 }
0x15b8   :  { %v4273_v9 = vpop.permute.xlu1 %4272 }
0x15b9   :  { %v4291_v7 = vadd.f32 %v4273_v9, %v7361_v6 }
0x15bb   :  { %4314 = vrot.lane.b32.xlu1 %v4291_v7, %s6706_s17  ;;  %v4275_v23 = vpop.permute.xlu0 %4274 }
0x15bc   :  { %v4292_v44 = vadd.f32 %v4275_v23, %v7375_v18 }
0x15be   :  { %4320 = vrot.lane.b32.xlu0 %v4292_v44, %s6707_s19 }
0x15bf   :  { %v4297_v8 = vpop.permute.xlu0 %4296 }
0x15c0   :  { %v4277_v19 = vpop.permute.xlu1 %4276 }
0x15c1   :  { %v4293_v46 = vadd.f32 %v4277_v19, %v7373_v10 }
0x15c3   :  { %4322 = vrot.lane.b32.xlu1 %v4293_v46, %s6707_s19 }
0x15ec   :  { %v4299_v61 = vpop.permute.xlu1 %4298 }
0x15f3   :  { %v4305_v5 = vpop.permute.xlu0 %4304 }
0x15f4   :  { %v4326_v6 = vsel %vm29_vm2, %v4297_v8, %v4305_v5 }
0x15f7   :  { %v4307_v17 = vpop.permute.xlu1 %4306 }
0x15f8   :  { %v4327_v40 = vsel %vm29_vm2, %v4299_v61, %v4307_v17 }
0x1628   :  { %v4313_v20 = vpop.permute.xlu0 %4312 }
0x1629   :  { %v4328_v18 = vsel %vm1012_vm3, %v4326_v6, %v4313_v20 }
0x162d   :  { %v4315_v35 = vpop.permute.xlu1 %4314 }
0x162e   :  { %v4329_v41 = vsel %vm1012_vm3, %v4327_v40, %v4315_v35 }
0x1630   :  { %v4321_v53 = vpop.permute.xlu0 %4320 }
0x1631   :  { %v4330_v10 = vsel %vm1015_vm4, %v4328_v18, %v4321_v53 }
0x1635   :  { %v4323_v22 = vpop.permute.xlu1 %4322 }
0x1636   :  { %v4331_v21 = vsel %vm1015_vm4, %v4329_v41, %v4323_v22 }
0x1637   :  { %v4332_v25 = vpack.c.bf16 %v4331_v21, %v4330_v10 }
0x1639   :  { %6325 = vmatmul.mubr.msk.bf16.vlgmr.msra.gmra.mxu1 %vm1035_vm5, %v4332_v25 }
0x163a   :  { %6338 = vmatprep.mubr.msk.bf16.mxu1 %vm6696_vm1, %v6695_v1 }
0x16f9   :  { %v4386_v28 = vpop.f32.mrf.mxu1 }
0x16fa   :  { %v4387_v16 = vadd.f32 %v5658_v33, %v4386_v28 }
0x16fb   :  { %v6326_v30 = vpop.f32.mrf.mxu1 }
0x16fc   :  { %v4393_v31 = vmax.f32 %v4387_v16, 0.0 }
0x16fd   :  { %v4389_v11 = vpop.f32.mrf.mxu1 }
0x16fe   :  { %v4390_v58 = vadd.f32 %v5658_v33, %v4389_v11  ;;  %v4395_v63 = vadd.f32 %v4393_v31, %v4330_v10 }
0x16ff   :  { %v6327_v29 = vpop.f32.mrf.mxu1 }
0x1700   :  { %v4394_v13 = vmax.f32 %v4390_v58, 0.0 }
0x1702   :  { %v4396_v49 = vadd.f32 %v4394_v13, %v4331_v21 }
0x1704   :  { %v4397_v34 = vpack.c.bf16 %v4396_v49, %v4395_v63 }
0x1706   :  { %6333 = vmatmul.mubr.msk.bf16.vlgmr.msra.gmra.mxu0 %vm1035_vm5, %v4397_v34 }
0x1707   :  { %6344 = vmatprep.mubr.msk.bf16.mxu0 %vm6696_vm1, %v6695_v1 }
0x17c6   :  { %v4456_v32 = vpop.f32.mrf.mxu0 }
0x17c7   :  { %v4457_v52 = vadd.f32 %v5662_v37, %v4456_v32 }
0x17c8   :  { %v6334_v38 = vpop.f32.mrf.mxu0 }
0x17c9   :  { %4471 = vrot.lane.b32.xlu1 %v4457_v52, %s6698_s18  ;;  %v7818_v55 = vpack.c.bf16 %v4457_v52, %v4457_v52 }
0x17ca   :  { %v4459_v26 = vpop.f32.mrf.mxu0 }
0x17cb   :  { %v4460_v24 = vadd.f32 %v5662_v37, %v4459_v26  ;;  %v4515_v50 = vsel %vm29_vm2, %v7818_v55, 0 }
0x17cc   :  { %v6335_v51 = vpop.f32.mrf.mxu0  ;;  %6337 = vmatpush3.bf16.xpose.msra.mxu1 %v4515_v50 }
0x17cd   :  { %4498 = vrot.lane.b32.xlu1 %v7823_v48, %s6698_s18  ;;  %4473 = vrot.lane.b32.xlu0 %v4460_v24, %s6698_s18  ;;  %v7830_v45 = vpack.c.bf16 %v4460_v24, %v4460_v24 }
0x17ce   :  { %6348 = vmatprep.subr.bf16.mxu1 %v6695_v1 }
0x17cf   :  { %v4558_v36 = vsel %vm29_vm2, %v7830_v45, 0 }
0x17d0   :  { %6343 = vmatpush3.bf16.xpose.msra.mxu0 %v4558_v36 }
0x17d1   :  { %4485 = vrot.lane.b32.xlu1 %v4460_v24, %s6699_s21  ;;  %4479 = vrot.lane.b32.xlu0 %v4460_v24, %s6697_s0 }
0x17d2   :  { %6354 = vmatprep.subr.bf16.mxu0 %v6695_v1 }
0x17d3   :  { %6339 = vmatmul.mubr.msk.bf16.vlgmr.msra.gmra.mxu1 %vm29_vm2, %v4507_v42 }
0x17d4   :  { %6350 = vmatprep.mubr.msk.bf16.mxu1 %vm6696_vm1, %v6695_v1 }
0x17d5   :  { %4483 = vrot.lane.b32.xlu1 %v4457_v52, %s6699_s21  ;;  %4477 = vrot.lane.b32.xlu0 %v4457_v52, %s6697_s0 }
0x17d7   :  { %6345 = vmatmul.mubr.msk.bf16.vlgmr.msra.gmra.mxu0 %vm29_vm2, %v4507_v42 }
0x17d8   :  { %6356 = vmatprep.mubr.msk.bf16.mxu0 %vm6696_vm1, %v6695_v1 }
0x17d9   :  { %4501 = vrot.lane.b32.xlu0 %v7823_v48, %s6697_s0 }
0x17dd   :  { %4504 = vrot.lane.b32.xlu0 %v7823_v48, %s6699_s21 }
0x183b   :  { %v4472_v56 = vpop.permute.xlu1 %4471 }
0x183c   :  { %v7852_v57 = vpack.c.bf16 %v4472_v56, %v4472_v56 }
0x183e   :  { %v4604_v60 = vsel %vm29_vm2, %v7852_v57, 0 }
0x183f   :  { %v7856_v4 = vpop.permute.xlu1 %4498  ;;  %6349 = vmatpush3.bf16.xpose.msra.mxu1 %v4604_v60  ;;  %v4474_v54 = vpop.permute.xlu0 %4473 }
0x1840   :  { %v7858_v27 = vpack.c.bf16 %v4474_v54, %v4474_v54  ;;  %6360 = vmatprep.subr.bf16.mxu1 %v6695_v1  ;;  %v4508_v59 = vpack.c.bf16 %v7856_v4, %v7856_v4 }
0x1842   :  { %v4647_v12 = vsel %vm29_vm2, %v7858_v27, 0 }
0x1843   :  { %v4480_v2 = vpop.permute.xlu0 %4479  ;;  %6355 = vmatpush3.bf16.xpose.msra.mxu0 %v4647_v12  ;;  %v4486_v62 = vpop.permute.xlu1 %4485 }
0x1844   :  { %6366 = vmatprep.subr.bf16.mxu0 %v6695_v1  ;;  %v7866_v47 = vpack.c.bf16 %v4480_v2, %v4480_v2  ;;  %v7884_v23 = vpack.c.bf16 %v4486_v62, %v4486_v62 }
0x1846   :  { %6351 = vmatmul.mubr.msk.bf16.vlgmr.msra.gmra.mxu1 %vm29_vm2, %v4508_v59  ;;  %v4736_v0 = vsel %vm29_vm2, %v7866_v47, 0  ;;  %v4825_v46 = vsel %vm29_vm2, %v7884_v23, 0 }
0x1847   :  { %v4478_v39 = vpop.permute.xlu0 %4477  ;;  %6362 = vmatprep.mubr.msk.bf16.mxu1 %vm6696_vm1, %v6695_v1  ;;  %v4484_v9 = vpop.permute.xlu1 %4483 }
0x1848   :  { %v7871_v15 = vpack.c.bf16 %v4478_v39, %v4478_v39  ;;  %v7886_v44 = vpack.c.bf16 %v4484_v9, %v4484_v9 }
0x184a   :  { %v4693_v3 = vsel %vm29_vm2, %v7871_v15, 0  ;;  %6357 = vmatmul.mubr.msk.bf16.vlgmr.msra.gmra.mxu0 %vm29_vm2, %v4508_v59  ;;  %v4782_v8 = vsel %vm29_vm2, %v7886_v44, 0 }
0x184b   :  { %6361 = vmatpush3.bf16.xpose.msra.mxu1 %v4693_v3  ;;  %6367 = vmatpush3.bf16.xpose.msra.mxu0 %v4736_v0  ;;  %v7878_v7 = vpop.permute.xlu0 %4501 }
0x184c   :  { %6368 = vmatprep.mubr.msk.bf16.mxu0 %vm6696_vm1, %v6695_v1  ;;  %6372 = vmatprep.subr.bf16.mxu1 %v6695_v1  ;;  %v4509_v19 = vpack.c.bf16 %v7878_v7, %v7878_v7 }
0x184d   :  { %6378 = vmatprep.subr.bf16.mxu0 %v6695_v1 }
0x184f   :  { %v7896_v61 = vpop.permute.xlu0 %4504 }
0x1850   :  { %v4510_v5 = vpack.c.bf16 %v7896_v61, %v7896_v61 }
0x1852   :  { %6363 = vmatmul.mubr.msk.bf16.vlgmr.msra.gmra.mxu1 %vm29_vm2, %v4509_v19  ;;  %6369 = vmatmul.mubr.msk.bf16.vlgmr.msra.gmra.mxu0 %vm29_vm2, %v4509_v19 }
0x1853   :  { %6373 = vmatpush3.bf16.xpose.msra.mxu1 %v4782_v8  ;;  %6379 = vmatpush3.bf16.xpose.msra.mxu0 %v4825_v46 }
0x1854   :  { %6374 = vmatprep.mubr.msk.bf16.mxu1 %vm6696_vm1, %v6695_v1  ;;  %6380 = vmatprep.mubr.msk.bf16.mxu0 %vm6696_vm1, %v6695_v1 }
0x1855   :  { %6390 = vmatprep.subr.bf16.mxu0 %v6695_v1  ;;  %6384 = vmatprep.subr.bf16.mxu1 %v6695_v1 }
0x185a   :  { %6375 = vmatmul.mubr.msk.bf16.vlgmr.msra.gmra.mxu1 %vm29_vm2, %v4510_v5  ;;  %6381 = vmatmul.mubr.msk.bf16.vlgmr.msra.gmra.mxu0 %vm29_vm2, %v4510_v5 }
0x185b   :  { %6386 = vmatprep.mubr.msk.bf16.mxu1 %vm6696_vm1, %v6695_v1  ;;  %6392 = vmatprep.mubr.msk.bf16.mxu0 %vm6696_vm1, %v6695_v1 }
0x1893   :  { %v4551_v17 = vpop.f32.mrf.mxu1 }
0x1894   :  { %v4867_v20 = vmul.f32 0.17677669, %v4551_v17 }
0x1895   :  { %v6340_v35 = vpop.f32.mrf.mxu1 }
0x1896   :  { %v4876_v53 = vsel %vm4875_vm6, %v4867_v20, -inf }
0x1897   :  { %4877 = vmax.xlane.f32.xlu0 %v4876_v53  ;;  %v4594_v6 = vpop.f32.mrf.mxu0  ;;  %v4554_v40 = vpop.f32.mrf.mxu1 }
0x1898   :  { %v7913_v18 = vmul.f32 0.17677669, %v4594_v6 }
0x1899   :  { %v6346_v41 = vpop.f32.mrf.mxu0  ;;  %v6341_v22 = vpop.f32.mrf.mxu1 }
0x189a   :  { %v4879_v10 = vsel %vm4875_vm6, %v7913_v18, -inf }
0x189b   :  { %4880 = vmax.xlane.f32.xlu1 %v4879_v10  ;;  %v4597_v21 = vpop.f32.mrf.mxu0 }
0x189d   :  { %v6347_v25 = vpop.f32.mrf.mxu0 }
0x1906   :  { %v4640_v14 = vpop.f32.mrf.mxu1 }
0x1907   :  { %v4869_v43 = vmul.f32 0.17677669, %v4640_v14 }
0x1908   :  { %v6352_v33 = vpop.f32.mrf.mxu1 }
0x1909   :  { %v4882_v28 = vsel %vm4875_vm6, %v4869_v43, -inf }
0x190a   :  { %v4643_v16 = vpop.f32.mrf.mxu1  ;;  %4883 = vmax.xlane.f32.xlu1 %v4882_v28  ;;  %v4683_v30 = vpop.f32.mrf.mxu0 }
0x190b   :  { %v4870_v11 = vmul.f32 0.17677669, %v4683_v30 }
0x190c   :  { %v6353_v31 = vpop.f32.mrf.mxu1  ;;  %v6358_v58 = vpop.f32.mrf.mxu0 }
0x190d   :  { %v4885_v29 = vsel %vm4875_vm6, %v4870_v11, -inf }
0x190e   :  { %4886 = vmax.xlane.f32.xlu0 %v4885_v29  ;;  %v4686_v13 = vpop.f32.mrf.mxu0 }
0x1910   :  { %v6359_v63 = vpop.f32.mrf.mxu0 }
0x1912   :  { %v4729_v49 = vpop.f32.mrf.mxu1  ;;  %v4772_v34 = vpop.f32.mrf.mxu0 }
0x1913   :  { %v4871_v37 = vmul.f32 0.17677669, %v4729_v49  ;;  %v4872_v32 = vmul.f32 0.17677669, %v4772_v34 }
0x1914   :  { %v6364_v52 = vpop.f32.mrf.mxu1  ;;  %v6370_v38 = vpop.f32.mrf.mxu0 }
0x1915   :  { %v4888_v26 = vsel %vm4875_vm6, %v4871_v37, -inf  ;;  %v4891_v24 = vsel %vm4875_vm6, %v4872_v32, -inf }
0x1916   :  { %v4732_v50 = vpop.f32.mrf.mxu1  ;;  %4889 = vmax.xlane.f32.xlu1 %v4888_v26  ;;  %4892 = vmax.xlane.f32.xlu0 %v4891_v24  ;;  %v4775_v51 = vpop.f32.mrf.mxu0 }
0x1918   :  { %v6365_v36 = vpop.f32.mrf.mxu1  ;;  %v6371_v42 = vpop.f32.mrf.mxu0 }
0x191a   :  { %v4818_v56 = vpop.f32.mrf.mxu1  ;;  %v4861_v60 = vpop.f32.mrf.mxu0 }
0x191b   :  { %v4873_v54 = vmul.f32 0.17677669, %v4818_v56  ;;  %v7930_v46 = vmul.f32 0.17677669, %v4861_v60 }
0x191c   :  { %v6376_v59 = vpop.f32.mrf.mxu1  ;;  %v6382_v12 = vpop.f32.mrf.mxu0 }
0x191d   :  { %v4894_v2 = vsel %vm4875_vm6, %v4873_v54, -inf  ;;  %v4897_v5 = vsel %vm4875_vm6, %v7930_v46, -inf }
0x191e   :  { %4895 = vmax.xlane.f32.xlu1 %v4894_v2  ;;  %v4821_v62 = vpop.f32.mrf.mxu1  ;;  %v4864_v39 = vpop.f32.mrf.mxu0 }
0x1920   :  { %v6377_v0 = vpop.f32.mrf.mxu1  ;;  %v6383_v3 = vpop.f32.mrf.mxu0 }
0x1921   :  { %v4878_v9 = vpop.xlane.xlu0 %4877 }
0x1922   :  { %v4900_v19 = vsub.f32 %v4867_v20, %v4878_v9 }
0x1924   :  { %v4908_v8 = vmul.f32 1.442695, %v4900_v19 }
0x1926   :  { %6641 = vpow2.f32 %v4908_v8 }
0x192c   :  { %5022 = vrot.lane.b32.xlu0 %v7830_v45, %s6700_s22 }
0x192f   :  { %4973 = vrot.lane.b32.xlu1 %v7818_v55, %s6700_s22 }
0x1933   :  { %5120 = vrot.lane.b32.xlu1 %v7858_v27, %s6700_s22  ;;  %v7934_v45 = vpop.eup %6641  ;;  %v4881_v27 = vpop.xlane.xlu1 %4880 }
0x1934   :  { %v4924_v55 = vsel %vm4875_vm6, %v7934_v45, 0.0 }
0x1937   :  { %5218 = vrot.lane.b32.xlu1 %v7866_v47, %s6700_s22  ;;  %v4901_v47 = vsub.f32 %v7913_v18, %v4881_v27 }
0x1939   :  { %v4910_v17 = vmul.f32 1.442695, %v4901_v47 }
0x193b   :  { %6643 = vpow2.f32 %v4910_v17 }
0x1948   :  { %v7941_v20 = vpop.eup %6643 }
0x1949   :  { %v4927_v35 = vsel %vm4875_vm6, %v7941_v20, 0.0 }
0x194b   :  { %4898 = vmax.xlane.f32.xlu0 %v4897_v5 }
0x195b   :  { %4925 = vadd.xlane.f32.xlu1 %v4924_v55 }
0x1961   :  { %5071 = vrot.lane.b32.xlu0 %v7852_v57, %s6700_s22 }
0x1980   :  { %4928 = vadd.xlane.f32.xlu0 %v4927_v35 }
0x1993   :  { %v4884_v53 = vpop.xlane.xlu1 %4883 }
0x1994   :  { %v4902_v6 = vsub.f32 %v4869_v43, %v4884_v53 }
0x1996   :  { %v4912_v40 = vmul.f32 1.442695, %v4902_v6 }
0x1997   :  { %v4887_v41 = vpop.xlane.xlu0 %4886 }
0x1998   :  { %6645 = vpow2.f32 %v4912_v40  ;;  %v4903_v22 = vsub.f32 %v4870_v11, %v4887_v41 }
0x199a   :  { %v4914_v10 = vmul.f32 1.442695, %v4903_v22 }
0x199c   :  { %6647 = vpow2.f32 %v4914_v10 }
0x199f   :  { %v4890_v57 = vpop.xlane.xlu1 %4889  ;;  %v4893_v21 = vpop.xlane.xlu0 %4892 }
0x19a0   :  { %v4904_v25 = vsub.f32 %v4871_v37, %v4890_v57  ;;  %v4905_v18 = vsub.f32 %v4872_v32, %v4893_v21 }
0x19a2   :  { %v4916_v14 = vmul.f32 1.442695, %v4904_v25  ;;  %v4918_v33 = vmul.f32 1.442695, %v4905_v18 }
0x19a3   :  { %v5023_v28 = vpop.permute.xlu0 %5022 }
0x19a4   :  { %6649 = vpow2.f32 %v4916_v14  ;;  %v5028_v16 = vsel %vm33_vm0, %v5023_v28, 0 }
0x19a5   :  { %v7946_v30 = vpop.eup %6645  ;;  %6651 = vpow2.f32 %v4918_v33  ;;  %6391 = vmatpush3.bf16.msra.mxu0 %v5028_v16 }
0x19a6   :  { %v4930_v43 = vsel %vm4875_vm6, %v7946_v30, 0.0  ;;  %6402 = vmatprep.subr.bf16.mxu0 %v6695_v1 }
0x19a7   :  { %4931 = vadd.xlane.f32.xlu1 %v4930_v43  ;;  %v4896_v11 = vpop.xlane.xlu1 %4895 }
0x19a8   :  { %v4906_v31 = vsub.f32 %v4873_v54, %v4896_v11 }
0x19a9   :  { %v7951_v58 = vpop.eup %6647 }
0x19aa   :  { %v4920_v29 = vmul.f32 1.442695, %v4906_v31  ;;  %v4933_v13 = vsel %vm4875_vm6, %v7951_v58, 0.0 }
0x19ab   :  { %v4974_v63 = vpop.permute.xlu1 %4973  ;;  %4934 = vadd.xlane.f32.xlu0 %v4933_v13 }
0x19ac   :  { %6653 = vpow2.f32 %v4920_v29  ;;  %v4979_v49 = vsel %vm33_vm0, %v4974_v63, 0 }
0x19ad   :  { %6385 = vmatpush3.bf16.msra.mxu1 %v4979_v49 }
0x19ae   :  { %6396 = vmatprep.subr.bf16.mxu1 %v6695_v1 }
0x19af   :  { %v5121_v36 = vpop.permute.xlu1 %5120 }
0x19b0   :  { %v5126_v9 = vsel %vm33_vm0, %v5121_v36, 0 }
0x19b1   :  { %v7957_v34 = vpop.eup %6649 }
0x19b2   :  { %v7959_v37 = vpop.eup %6651  ;;  %v4936_v32 = vsel %vm4875_vm6, %v7957_v34, 0.0 }
0x19b3   :  { %4937 = vadd.xlane.f32.xlu1 %v4936_v32  ;;  %v4939_v52 = vsel %vm4875_vm6, %v7959_v37, 0.0  ;;  %v5219_v42 = vpop.permute.xlu1 %5218 }
0x19b4   :  { %4940 = vadd.xlane.f32.xlu0 %v4939_v52  ;;  %v5224_v53 = vsel %vm33_vm0, %v5219_v42, 0 }
0x19b9   :  { %v7965_v38 = vpop.eup %6653 }
0x19ba   :  { %v4942_v26 = vsel %vm4875_vm6, %v7965_v38, 0.0 }
0x19bb   :  { %4943 = vadd.xlane.f32.xlu1 %v4942_v26 }
0x19ca   :  { %5169 = vrot.lane.b32.xlu0 %v7871_v15, %s6700_s22 }
0x19cc   :  { %5316 = vrot.lane.b32.xlu1 %v7884_v23, %s6700_s22 }
0x19d4   :  { %v4899_v24 = vpop.xlane.xlu0 %4898 }
0x19d5   :  { %v4907_v50 = vsub.f32 %v7930_v46, %v4899_v24 }
0x19d7   :  { %v4922_v51 = vmul.f32 1.442695, %v4907_v50 }
0x19d8   :  { %v5072_v12 = vpop.permute.xlu0 %5071 }
0x19d9   :  { %6655 = vpow2.f32 %v4922_v51  ;;  %v5077_v2 = vsel %vm33_vm0, %v5072_v12, 0 }
0x19e4   :  { %v4926_v56 = vpop.xlane.xlu1 %4925 }
0x19e5   :  { %6657 = vrcp.f32 %v4926_v56 }
0x19e6   :  { %v7974_v60 = vpop.eup %6655 }
0x19e7   :  { %v4945_v54 = vsel %vm4875_vm6, %v7974_v60, 0.0 }
0x19e9   :  { %4946 = vadd.xlane.f32.xlu0 %v4945_v54 }
0x19f2   :  { %v6658_v59 = vpop.eup %6657 }
0x19f3   :  { %v4949_v15 = vmul.f32 %v6658_v59, %v7934_v45 }
0x19f5   :  { %v4964_v23 = vpack.c.bf16 %v4949_v15, %v4949_v15 }
0x19f7   :  { %6387 = vmatmul.mubr.msk.bf16.vlgmr.msra.gmra.mxu1 %vm29_vm2, %v4964_v23 }
0x19f8   :  { %6397 = vmatpush3.bf16.msra.mxu1 %v5077_v2  ;;  %6398 = vmatprep.mubr.msk.bf16.mxu1 %vm6696_vm1, %v6695_v1 }
0x19f9   :  { %6408 = vmatprep.subr.bf16.mxu1 %v6695_v1 }
0x19ff   :  { %5267 = vrot.lane.b32.xlu0 %v7886_v44, %s6700_s22 }
0x1a09   :  { %v4929_v62 = vpop.xlane.xlu0 %4928 }
0x1a0a   :  { %6659 = vrcp.f32 %v4929_v62 }
0x1a17   :  { %v6660_v39 = vpop.eup %6659 }
0x1a18   :  { %v4951_v0 = vmul.f32 %v6660_v39, %v7941_v20 }
0x1a1a   :  { %v4965_v3 = vpack.c.bf16 %v4951_v0, %v4951_v0 }
0x1a1c   :  { %6393 = vmatmul.mubr.msk.bf16.vlgmr.msra.gmra.mxu0 %vm29_vm2, %v4965_v3 }
0x1a1d   :  { %6403 = vmatpush3.bf16.msra.mxu0 %v5126_v9  ;;  %6404 = vmatprep.mubr.msk.bf16.mxu0 %vm6696_vm1, %v6695_v1 }
0x1a1e   :  { %6414 = vmatprep.subr.bf16.mxu0 %v6695_v1 }
0x1a30   :  { %v4932_v19 = vpop.xlane.xlu1 %4931 }
0x1a31   :  { %6661 = vrcp.f32 %v4932_v19 }
0x1a34   :  { %v4935_v46 = vpop.xlane.xlu0 %4934 }
0x1a35   :  { %6663 = vrcp.f32 %v4935_v46 }
0x1a3c   :  { %v4938_v44 = vpop.xlane.xlu1 %4937 }
0x1a3d   :  { %6665 = vrcp.f32 %v4938_v44  ;;  %v4941_v8 = vpop.xlane.xlu0 %4940  ;;  %v6509_v44 = vld [vmem:[%s8072_s1 + $0x90] sm:$0xff]  }
0x1a3e   :  { %v6662_v5 = vpop.eup %6661  ;;  %6667 = vrcp.f32 %v4941_v8 }
0x1a3f   :  { %v4953_v45 = vmul.f32 %v6662_v5, %v7946_v30 }
0x1a41   :  { %v4966_v55 = vpack.c.bf16 %v4953_v45, %v4953_v45  ;;  %v5170_v27 = vpop.permute.xlu0 %5169 }
0x1a42   :  { %v6664_v47 = vpop.eup %6663  ;;  %v5175_v17 = vsel %vm33_vm0, %v5170_v27, 0 }
0x1a43   :  { %v4955_v20 = vmul.f32 %v6664_v47, %v7951_v58  ;;  %6399 = vmatmul.mubr.msk.bf16.vlgmr.msra.gmra.mxu1 %vm29_vm2, %v4966_v55 }
0x1a44   :  { %6409 = vmatpush3.bf16.msra.mxu1 %v5175_v17  ;;  %6410 = vmatprep.mubr.msk.bf16.mxu1 %vm6696_vm1, %v6695_v1  ;;  %v4944_v6 = vpop.xlane.xlu1 %4943 }
0x1a45   :  { %v4967_v35 = vpack.c.bf16 %v4955_v20, %v4955_v20  ;;  %6420 = vmatprep.subr.bf16.mxu1 %v6695_v1  ;;  %6669 = vrcp.f32 %v4944_v6 }
0x1a47   :  { %6405 = vmatmul.mubr.msk.bf16.vlgmr.msra.gmra.mxu0 %vm29_vm2, %v4967_v35 }
0x1a48   :  { %6415 = vmatpush3.bf16.msra.mxu0 %v5224_v53  ;;  %6416 = vmatprep.mubr.msk.bf16.mxu0 %vm6696_vm1, %v6695_v1  ;;  %v5317_v21 = vpop.permute.xlu1 %5316 }
0x1a49   :  { %6426 = vmatprep.subr.bf16.mxu0 %v6695_v1  ;;  %v5322_v18 = vsel %vm33_vm0, %v5317_v21, 0 }
0x1a4a   :  { %v6666_v40 = vpop.eup %6665 }
0x1a4b   :  { %v6668_v41 = vpop.eup %6667  ;;  %v4957_v22 = vmul.f32 %v6666_v40, %v7957_v34 }
0x1a4c   :  { %v4959_v10 = vmul.f32 %v6668_v41, %v7959_v37 }
0x1a4d   :  { %v4968_v57 = vpack.c.bf16 %v4957_v22, %v4957_v22 }
0x1a4e   :  { %v4969_v25 = vpack.c.bf16 %v4959_v10, %v4959_v10 }
0x1a4f   :  { %6411 = vmatmul.mubr.msk.bf16.vlgmr.msra.gmra.mxu1 %vm29_vm2, %v4968_v57 }
0x1a50   :  { %6417 = vmatmul.mubr.msk.bf16.vlgmr.msra.gmra.mxu0 %vm29_vm2, %v4969_v25  ;;  %6422 = vmatprep.mubr.msk.bf16.mxu1 %vm6696_vm1, %v6695_v1 }
0x1a51   :  { %6427 = vmatpush3.bf16.msra.mxu0 %v5322_v18  ;;  %6428 = vmatprep.mubr.msk.bf16.mxu0 %vm6696_vm1, %v6695_v1 }
0x1a52   :  { %6440 = vmatprep.subr.bf16.mxu0 %v6695_v1  ;;  %v6670_v14 = vpop.eup %6669 }
0x1a53   :  { %v4961_v28 = vmul.f32 %v6670_v14, %v7965_v38 }
0x1a55   :  { %v4970_v43 = vpack.c.bf16 %v4961_v28, %v4961_v28 }
0x1a72   :  { %v4947_v33 = vpop.xlane.xlu0 %4946 }
0x1a73   :  { %6671 = vrcp.f32 %v4947_v33 }
0x1a76   :  { %v5268_v16 = vpop.permute.xlu0 %5267 }
0x1a77   :  { %v5273_v30 = vsel %vm33_vm0, %v5268_v16, 0 }
0x1a78   :  { %6421 = vmatpush3.bf16.msra.mxu1 %v5273_v30 }
0x1a79   :  { %6432 = vmatprep.subr.bf16.mxu1 %v6695_v1 }
0x1a7b   :  { %6423 = vmatmul.mubr.msk.bf16.vlgmr.msra.gmra.mxu1 %vm29_vm2, %v4970_v43 }
0x1a7c   :  { %6436 = vmatprep.mubr.msk.bf16.mxu1 %vm6696_vm1, %v6695_v1  ;;  %6433 = vmatpush3.bf16.msra.mxu1 %v6509_v44 }
0x1a7d   :  { %6434 = vmatprep.subr.bf16.mxu1 %v6695_v1 }
0x1a80   :  { %v6672_v11 = vpop.eup %6671 }
0x1a81   :  { %v4963_v31 = vmul.f32 %v6672_v11, %v7974_v60 }
0x1a83   :  { %v4971_v58 = vpack.c.bf16 %v4963_v31, %v4963_v31 }
0x1a85   :  { %6429 = vmatmul.mubr.msk.bf16.vlgmr.msra.gmra.mxu0 %vm29_vm2, %v4971_v58  ;;  %v6512_v58 = vld [vmem:[%s8072_s1 + $0x98] sm:$0xff]  }
0x1a86   :  { %6444 = vmatprep.mubr.msk.bf16.mxu0 %vm6696_vm1, %v6695_v1 }
0x1ab7   :  { %v5015_v29 = vpop.f32.mrf.mxu1 }
0x1ab8   :  { %v5364_v10 = vadd.f32 %v5015_v29, %v7823_v48  ;;  %v5682_v29 = vld [vmem:[%s8073_s2 + $0x9] ss:$0 sm:$0xff] }
0x1ab9   :  { %v6388_v13 = vpop.f32.mrf.mxu1 }
0x1abb   :  { %v5018_v63 = vpop.f32.mrf.mxu1 }
0x1abd   :  { %v6389_v49 = vpop.f32.mrf.mxu1 }
0x1adc   :  { %v5064_v34 = vpop.f32.mrf.mxu0 }
0x1add   :  { %v5365_v6 = vadd.f32 %v5064_v34, %v7823_v48  ;;  %v6511_v48 = vld [vmem:[%s8072_s1 + $0xa0] sm:$0xff]  }
0x1ade   :  { %v6394_v37 = vpop.f32.mrf.mxu0  ;;  %6441 = vmatpush3.bf16.msra.mxu0 %v6511_v48 }
0x1adf   :  { %6442 = vmatprep.subr.bf16.mxu0 %v6695_v1 }
0x1ae0   :  { %v5067_v32 = vpop.f32.mrf.mxu0 }
0x1ae2   :  { %v6395_v52 = vpop.f32.mrf.mxu0  ;;  %6443 = vmatpush3.bf16.msra.mxu0 %v6512_v58 }
0x1b03   :  { %v5113_v38 = vpop.f32.mrf.mxu1 }
0x1b04   :  { %v5366_v26 = vadd.f32 %v5113_v38, %v7856_v4 }
0x1b05   :  { %v6400_v24 = vpop.f32.mrf.mxu1 }
0x1b06   :  { %5374 = vrot.lane.b32.xlu1 %v5366_v26, %s6701_s23 }
0x1b07   :  { %v5116_v50 = vpop.f32.mrf.mxu1  ;;  %v5162_v51 = vpop.f32.mrf.mxu0 }
0x1b08   :  { %v5367_v36 = vadd.f32 %v5162_v51, %v7856_v4 }
0x1b09   :  { %v6401_v42 = vpop.f32.mrf.mxu1  ;;  %v6406_v56 = vpop.f32.mrf.mxu0 }
0x1b0a   :  { %5376 = vrot.lane.b32.xlu1 %v5367_v36, %s6701_s23 }
0x1b0b   :  { %v5165_v60 = vpop.f32.mrf.mxu0 }
0x1b0c   :  { %v5686_v60 = vld [vmem:[%s8073_s2 + $0xa] ss:$0 sm:$0xff] }
0x1b0d   :  { %v6407_v54 = vpop.f32.mrf.mxu0 }
0x1b0f   :  { %v5211_v59 = vpop.f32.mrf.mxu1 }
0x1b10   :  { %v5368_v15 = vadd.f32 %v5211_v59, %v7878_v7  ;;  %v5260_v12 = vpop.f32.mrf.mxu0 }
0x1b11   :  { %v5369_v23 = vadd.f32 %v5260_v12, %v7878_v7  ;;  %v6412_v2 = vpop.f32.mrf.mxu1  ;;  %v6510_v7 = vld [vmem:[%s8072_s1 + $0x88] sm:$0xff]  }
0x1b12   :  { %v6418_v62 = vpop.f32.mrf.mxu0  ;;  %5382 = vrot.lane.b32.xlu1 %v5368_v15, %s6702_s24  ;;  %6435 = vmatpush3.bf16.msra.mxu1 %v6510_v7 }
0x1b13   :  { %5384 = vrot.lane.b32.xlu0 %v5369_v23, %s6702_s24  ;;  %v5214_v39 = vpop.f32.mrf.mxu1 }
0x1b14   :  { %v5263_v4 = vpop.f32.mrf.mxu0 }
0x1b15   :  { %v6413_v0 = vpop.f32.mrf.mxu1 }
0x1b16   :  { %v6419_v3 = vpop.f32.mrf.mxu0 }
0x1b3b   :  { %v5309_v9 = vpop.f32.mrf.mxu1 }
0x1b3c   :  { %v5370_v47 = vadd.f32 %v5309_v9, %v7896_v61 }
0x1b3d   :  { %v6424_v19 = vpop.f32.mrf.mxu1 }
0x1b3f   :  { %v5312_v46 = vpop.f32.mrf.mxu1 }
0x1b41   :  { %v6425_v8 = vpop.f32.mrf.mxu1 }
0x1b45   :  { %v5358_v5 = vpop.f32.mrf.mxu0 }
0x1b46   :  { %v5371_v45 = vadd.f32 %v5358_v5, %v7896_v61 }
0x1b47   :  { %v6430_v55 = vpop.f32.mrf.mxu0 }
0x1b48   :  { %5392 = vrot.lane.b32.xlu0 %v5371_v45, %s6703_s27 }
0x1b49   :  { %v5361_v27 = vpop.f32.mrf.mxu0 }
0x1b4b   :  { %v6431_v17 = vpop.f32.mrf.mxu0 }
0x1b4c   :  { %5390 = vrot.lane.b32.xlu0 %v5370_v47, %s6703_s27 }
0x1b78   :  { %v5375_v20 = vpop.permute.xlu1 %5374 }
0x1b79   :  { %v5396_v61 = vsel %vm29_vm2, %v5364_v10, %v5375_v20 }
0x1b7c   :  { %v5377_v35 = vpop.permute.xlu1 %5376 }
0x1b7d   :  { %v5397_v40 = vsel %vm29_vm2, %v5365_v6, %v5377_v35 }
0x1b84   :  { %v5383_v57 = vpop.permute.xlu1 %5382 }
0x1b85   :  { %v5385_v53 = vpop.permute.xlu0 %5384  ;;  %v5398_v18 = vsel %vm1012_vm3, %v5396_v61, %v5383_v57 }
0x1b86   :  { %v5399_v41 = vsel %vm1012_vm3, %v5397_v40, %v5385_v53 }
0x1bba   :  { %v5393_v22 = vpop.permute.xlu0 %5392 }
0x1bbb   :  { %v5401_v21 = vsel %vm1015_vm4, %v5399_v41, %v5393_v22 }
0x1bbc   :  { %v5403_v25 = vpack.c.bf16 %v5401_v21, %v5401_v21 }
0x1bbe   :  { %v5411_v14 = vunpack.c.l.b16 %v5403_v25  ;;  %v5391_v33 = vpop.permute.xlu0 %5390 }
0x1bbf   :  { %v5400_v28 = vsel %vm1015_vm4, %v5398_v18, %v5391_v33 }
0x1bc0   :  { %v5402_v16 = vpack.c.bf16 %v5400_v28, %v5400_v28  ;;  %v5412_v30 = vrot.slane %v5411_v14, 7 }
0x1bc2   :  { %v5410_v43 = vunpack.c.l.b16 %v5402_v16 }
0x1bc4   :  { %v5414_v11 = vsel %vm5413_vm7, %v5412_v30, %v5410_v43 }
0x1bc5   :  { %v5415_v31 = vpack.c.b16 %v5414_v11, %v5414_v11 }
0x1bc7   :  { %6437 = vmatmul.mubr.msk.bf16.vlgmr.msra.gmra.mxu1 %vm1035_vm5, %v5415_v31 }
0x1c87   :  { %v5465_v13 = vpop.f32.mrf.mxu1 }
0x1c88   :  { %v5466_v63 = vadd.f32 %v5682_v29, %v5465_v13 }
0x1c89   :  { %v6438_v49 = vpop.f32.mrf.mxu1 }
0x1c8a   :  { %v5471_v34 = vmax.f32 %v5466_v63, 0.0 }
0x1c8b   :  { %v5468_v37 = vpop.f32.mrf.mxu1 }
0x1c8c   :  { %v5473_v32 = vrot.slane %v5471_v34, 1  ;;  %v5476_v52 = vadd.f32 %v5471_v34, %v5400_v28 }
0x1c8d   :  { %v6439_v38 = vpop.f32.mrf.mxu1 }
0x1c8e   :  { %v5477_v26 = vadd.f32 %v5473_v32, %v5401_v21  ;;  %v5478_v24 = vpack.c.bf16 %v5476_v52, %v5476_v52 }
0x1c90   :  { %v5479_v1 = vpack.c.bf16 %v5477_v26, %v5477_v26  ;;  %v5491_v51 = vunpack.c.l.b16 %v5478_v24 }
0x1c92   :  { %v5492_v50 = vunpack.c.l.b16 %v5479_v1 }
0x1c94   :  { %v5493_v36 = vrot.slane %v5492_v50, 7 }
0x1c96   :  { %v5494_v42 = vsel %vm5413_vm7, %v5493_v36, %v5491_v51 }
0x1c97   :  { %v5495_v56 = vpack.c.b16 %v5494_v42, %v5494_v42 }
0x1c99   :  { %6445 = vmatmul.mubr.msk.bf16.vlgmr.msra.gmra.mxu0 %vm1035_vm5, %v5495_v56 }
0x1d59   :  { %v5545_v54 = vpop.f32.mrf.mxu0 }
0x1d5a   :  { %v5546_v59 = vadd.f32 %v5686_v60, %v5545_v54 }
0x1d5b   :  { %v6446_v15 = vpop.f32.mrf.mxu0 }
0x1d5c   :  { %5552 = vst.msk [vmem:[#allocation2] sm:$0x3] %vm5551_vm8, %v5546_v59 }
0x1d5d   :  { %v5548_v12 = vpop.f32.mrf.mxu0 }
0x1d5e   :  { %6684 = shalt.err (!%p6681_p4)
}
0x1d5f   :  { %5562 = dma.vmem_to_hbm [thread:$0]  %s5560_s28, 32, %s8074_s3, [#allocation3]   ;;  %v6447_v23 = vpop.f32.mrf.mxu0 }
0x1d60   :  { %6693 = dma.done.wait [#allocation3], 32  }
0x1d61   :  { %6694 = vsyncadd [#allocation3], 4294967264 }
0x1d62   :  { %5566 = vsyncpa [#allocation3], 1 }

</bundles_post_ra>
